<compile_context>
chip_gen: v5e
topology: v5e:2x2
jax: 0.10.0
libtpu: 0.0.40
codegen_flags: <defaults>
</compile_context>

<pallas_src>
import functools
import math

import jax
import jax.numpy as jnp
from jax.experimental import pallas as pl
from jax.experimental.pallas import tpu as pltpu


# --------------------------------------------------------------------------
# generation-aware VMEM budget / tile targets
# --------------------------------------------------------------------------

_HW = None


def _budget():
    global _HW
    if _HW is None:
        try:
            info = pltpu.get_tpu_info()
            cap = int(getattr(info, "vmem_capacity_bytes", 64 * 1024 * 1024))
        except Exception:
            cap = 64 * 1024 * 1024  # conservative fallback
        if cap >= 128 * 1024 * 1024:   # v5e / v6e: 128 MiB VMEM -> big tiles
            _HW = dict(vmem=96 * 1024 * 1024, tm=512, tn=512, tk=512)
        else:                          # v7x: 64 MiB physical VMEM
            _HW = dict(vmem=48 * 1024 * 1024, tm=256, tn=256, tk=512)
    return _HW


# --------------------------------------------------------------------------
# helpers
# --------------------------------------------------------------------------

def _tile(dim, target, align):
    """Largest tile <= target that divides `dim` and is a multiple of `align`
    (the full dim is always a legal block)."""
    if dim <= target:
        return dim
    t = (target // align) * align
    while t >= align:
        if dim % t == 0:
            return t
        t -= align
    return dim


def _pad_axis(a, axis, mult):
    pad = (-a.shape[axis]) % mult
    if pad == 0:
        return a
    widths = [(0, 0)] * a.ndim
    widths[axis] = (0, pad)
    return jnp.pad(a, widths)


def _apply_act(y, activation):
    if activation == "relu":
        return jnp.maximum(y, 0.0)
    if activation == "gelu":
        # gelu_new (tanh approximation), as used in GPT2Block's MLP
        return 0.5 * y * (1.0 + jnp.tanh(0.7978845608028654 * (y + 0.044715 * y * y * y)))
    if activation == "sigmoid":
        return 1.0 / (1.0 + jnp.exp(-y))
    return y


# --------------------------------------------------------------------------
# matmul kernels
# --------------------------------------------------------------------------

def _matmul_k1_kernel(*refs, activation, has_bias, has_residual):
    """Single-K-block matmul: dot + fused bias/act/residual, direct store
    (no f32 accumulator scratch, no extra VMEM copy)."""
    x_ref, w_ref = refs[0], refs[1]
    pos = 2
    b_ref = r_ref = None
    if has_bias:
        b_ref = refs[pos]; pos += 1
    if has_residual:
        r_ref = refs[pos]; pos += 1
    o_ref = refs[pos]

    y = jnp.dot(x_ref[...].astype(jnp.bfloat16), w_ref[...].astype(jnp.bfloat16),
                preferred_element_type=jnp.float32)
    if has_bias:
        y = y + b_ref[...].astype(jnp.float32)
    y = _apply_act(y, activation)
    if has_residual:
        y = y + r_ref[...].astype(jnp.float32)
    o_ref[...] = y.astype(o_ref.dtype)


def _matmul_kernel(*refs, activation, has_bias, has_residual):
    """K-tiled matmul with f32 VMEM accumulator (only used when nk > 1)."""
    x_ref, w_ref = refs[0], refs[1]
    pos = 2
    b_ref = r_ref = None
    if has_bias:
        b_ref = refs[pos]; pos += 1
    if has_residual:
        r_ref = refs[pos]; pos += 1
    o_ref = refs[pos]
    acc_ref = refs[pos + 1]

    k = pl.program_id(2)

    @pl.when(k == 0)
    def _():
        acc_ref[...] = jnp.zeros_like(acc_ref)

    acc_ref[...] += jnp.dot(x_ref[...].astype(jnp.bfloat16),
                            w_ref[...].astype(jnp.bfloat16),
                            preferred_element_type=jnp.float32)

    @pl.when(k == pl.num_programs(2) - 1)
    def _():
        y = acc_ref[...]
        if has_bias:
            y = y + b_ref[...].astype(jnp.float32)
        y = _apply_act(y, activation)
        if has_residual:
            y = y + r_ref[...].astype(jnp.float32)
        o_ref[...] = y.astype(o_ref.dtype)


def linear(x, w, b=None, activation=None, residual=None, out_dtype=jnp.float32,
           tm_target=None, tn_target=None, tk_target=None):
    """y = act(x @ w [+ b]) [+ residual];  x:[M,K]  w:[K,N] (bf16 ok)."""
    hw = _budget()
    tm_target = tm_target or hw["tm"]
    tn_target = tn_target or hw["tn"]
    tk_target = tk_target or hw["tk"]

    M0, K = x.shape
    N0 = w.shape[1]
    # Pad M -> multiple of 8 and N -> multiple of 128 (vocab 50257 -> 50304) so
    # tiles never fall back to a huge full-dim block; zero padding is sliced
    # off below, so results are unchanged.
    x = _pad_axis(x, 0, 8)
    w = _pad_axis(w, 1, 128)
    if b is not None:
        b = _pad_axis(b.reshape(1, -1), 1, 128)
    if residual is not None:
        residual = _pad_axis(_pad_axis(residual, 0, 8), 1, 128)
    M, N = x.shape[0], w.shape[1]

    tm = _tile(M, tm_target, 8)
    tn = _tile(N, tn_target, 128)
    tk = _tile(K, tk_target, 128)
    nm, nn, nk = M // tm, N // tn, K // tk
    has_bias = b is not None
    has_res = residual is not None

    if nk == 1:
        kernel = functools.partial(_matmul_k1_kernel, activation=activation,
                                   has_bias=has_bias, has_residual=has_res)
        in_specs = [pl.BlockSpec((tm, K), lambda i, j: (i, 0)),
                    pl.BlockSpec((K, tn), lambda i, j: (0, j))]
        args = [x, w]
        if has_bias:
            in_specs.append(pl.BlockSpec((1, tn), lambda i, j: (0, j)))
            args.append(b)
        if has_res:
            in_specs.append(pl.BlockSpec((tm, tn), lambda i, j: (i, j)))
            args.append(residual)
        y = pl.pallas_call(
            kernel,
            out_shape=jax.ShapeDtypeStruct((M, N), out_dtype),
            grid=(nm, nn),
            in_specs=in_specs,
            out_specs=pl.BlockSpec((tm, tn), lambda i, j: (i, j)),
            compiler_params=pltpu.CompilerParams(
                dimension_semantics=("parallel", "parallel"),
                vmem_limit_bytes=hw["vmem"]),
        )(*args)
    else:
        kernel = functools.partial(_matmul_kernel, activation=activation,
                                   has_bias=has_bias, has_residual=has_res)
        in_specs = [pl.BlockSpec((tm, tk), lambda i, j, k: (i, k)),
                    pl.BlockSpec((tk, tn), lambda i, j, k: (k, j))]
        args = [x, w]
        if has_bias:
            in_specs.append(pl.BlockSpec((1, tn), lambda i, j, k: (0, j)))
            args.append(b)
        if has_res:
            in_specs.append(pl.BlockSpec((tm, tn), lambda i, j, k: (i, j)))
            args.append(residual)
        y = pl.pallas_call(
            kernel,
            out_shape=jax.ShapeDtypeStruct((M, N), out_dtype),
            grid=(nm, nn, nk),
            in_specs=in_specs,
            out_specs=pl.BlockSpec((tm, tn), lambda i, j, k: (i, j)),
            scratch_shapes=[pltpu.VMEM((tm, tn), jnp.float32)],
            compiler_params=pltpu.CompilerParams(
                dimension_semantics=("parallel", "parallel", "arbitrary"),
                vmem_limit_bytes=hw["vmem"]),
        )(*args)

    if (M, N) != (M0, N0):
        y = y[:M0, :N0]
    return y


# --------------------------------------------------------------------------
# LayerNorm (+ fused matmul) kernels
# --------------------------------------------------------------------------

def _ln_matmul_kernel(x_ref, g_ref, beta_ref, w_ref, b_ref, o_ref, xn_sc, *,
                      eps, activation):
    # LN is recomputed only at j == 0; the normalized (bf16) row block is
    # cached in VMEM and reused for all N tiles of this row block.
    @pl.when(pl.program_id(1) == 0)
    def _():
        x = x_ref[...].astype(jnp.float32)
        mu = jnp.mean(x, axis=-1, keepdims=True)
        xc = x - mu
        var = jnp.mean(xc * xc, axis=-1, keepdims=True)
        xn = xc * jax.lax.rsqrt(var + eps)
        xn = xn * g_ref[...].astype(jnp.float32) + beta_ref[...].astype(jnp.float32)
        xn_sc[...] = xn.astype(jnp.bfloat16)

    y = jnp.dot(xn_sc[...], w_ref[...].astype(jnp.bfloat16),
                preferred_element_type=jnp.float32)
    y = y + b_ref[...].astype(jnp.float32)
    y = _apply_act(y, activation)
    o_ref[...] = y.astype(o_ref.dtype)


def ln_linear(x, gamma, beta, w, b, activation=None, eps=1e-5,
              out_dtype=jnp.float32, tm_target=None, tn_target=None):
    """y = act(LayerNorm(x) @ w + b); LN fused into the matmul (full-K blocks)."""
    hw = _budget()
    tm_target = tm_target or hw["tm"]
    tn_target = tn_target or hw["tn"]

    M0, K = x.shape
    N0 = w.shape[1]
    x = _pad_axis(x, 0, 8)
    w = _pad_axis(w, 1, 128)
    b = _pad_axis(b.reshape(1, -1), 1, 128)
    M, N = x.shape[0], w.shape[1]

    tm = _tile(M, tm_target, 8)
    tn = _tile(N, tn_target, 128)
    kernel = functools.partial(_ln_matmul_kernel, eps=eps, activation=activation)
    y = pl.pallas_call(
        kernel,
        out_shape=jax.ShapeDtypeStruct((M, N), out_dtype),
        grid=(M // tm, N // tn),
        in_specs=[
            pl.BlockSpec((tm, K), lambda i, j: (i, 0)),
            pl.BlockSpec((1, K), lambda i, j: (0, 0)),
            pl.BlockSpec((1, K), lambda i, j: (0, 0)),
            pl.BlockSpec((K, tn), lambda i, j: (0, j)),
            pl.BlockSpec((1, tn), lambda i, j: (0, j)),
        ],
        out_specs=pl.BlockSpec((tm, tn), lambda i, j: (i, j)),
        scratch_shapes=[pltpu.VMEM((tm, K), jnp.bfloat16)],  # normalized-x cache
        compiler_params=pltpu.CompilerParams(
            dimension_semantics=("parallel", "arbitrary"),
            vmem_limit_bytes=hw["vmem"]),
    )(x, gamma.reshape(1, K), beta.reshape(1, K), w, b)
    if (M, N) != (M0, N0):
        y = y[:M0, :N0]
    return y


def _layernorm_kernel(x_ref, g_ref, b_ref, o_ref, *, eps):
    x = x_ref[...].astype(jnp.float32)
    mu = jnp.mean(x, axis=-1, keepdims=True)
    xc = x - mu
    var = jnp.mean(xc * xc, axis=-1, keepdims=True)
    y = xc * jax.lax.rsqrt(var + eps)
    y = y * g_ref[...].astype(jnp.float32) + b_ref[...].astype(jnp.float32)
    o_ref[...] = y.astype(o_ref.dtype)


def layernorm(x, gamma, beta, eps=1e-5):
    """Row-tiled LayerNorm over the last dim; x:[M,H]."""
    hw = _budget()
    M0, H = x.shape
    x = _pad_axis(x, 0, 8)
    M = x.shape[0]
    tm = _tile(M, hw["tm"], 8)
    kernel = functools.partial(_layernorm_kernel, eps=eps)
    y = pl.pallas_call(
        kernel,
        out_shape=jax.ShapeDtypeStruct((M, H), jnp.float32),
        grid=(M // tm,),
        in_specs=[
            pl.BlockSpec((tm, H), lambda i: (i, 0)),
            pl.BlockSpec((1, H), lambda i: (0, 0)),
            pl.BlockSpec((1, H), lambda i: (0, 0)),
        ],
        out_specs=pl.BlockSpec((tm, H), lambda i: (i, 0)),
        compiler_params=pltpu.CompilerParams(
            dimension_semantics=("parallel",),
            vmem_limit_bytes=hw["vmem"]),
    )(x, gamma.reshape(1, H), beta.reshape(1, H))
    if M != M0:
        y = y[:M0]
    return y


# --------------------------------------------------------------------------
# flash attention: head-batched, lower-triangular block enumeration
# --------------------------------------------------------------------------

def _flash_attn_kernel(qi_ref, ki_ref, q_ref, k_ref, v_ref, o_ref,
                       q_sc, m_sc, l_sc, acc_sc, *, scale, t, nH, Dh):
    p_idx = pl.program_id(1)
    qi = qi_ref[p_idx]
    ki = ki_ref[p_idx]

    # First kv block of this q tile: cache the scaled (softmax scale folded in
    # once) q tile in bf16 and reset the online-softmax state.
    @pl.when(ki == 0)
    def _():
        q = q_ref[...].astype(jnp.float32) * scale          # (t, nH, Dh)
        for h in range(nH):
            q_sc[h] = q[:, h, :].astype(jnp.bfloat16)
        m_sc[...] = jnp.full(m_sc.shape, -1e30, jnp.float32)  # -1e30 avoids inf-inf NaNs
        l_sc[...] = jnp.zeros(l_sc.shape, jnp.float32)
        acc_sc[...] = jnp.zeros(acc_sc.shape, jnp.float32)

    # Causal mask for this (qi, ki) block (all-True for strictly-lower blocks).
    row = qi * t + jax.lax.broadcasted_iota(jnp.int32, (t, t), 0)
    col = ki * t + jax.lax.broadcasted_iota(jnp.int32, (t, t), 1)
    mask = col <= row

    k = k_ref[...]                                          # (t, nH, Dh) bf16
    v = v_ref[...]
    for h in range(nH):                                     # static unroll over heads
        s = jax.lax.dot_general(q_sc[h], k[:, h, :], (((1,), (1,)), ((), ())),
                                preferred_element_type=jnp.float32)   # (t, t)
        s = jnp.where(mask, s, -1e30)
        m_prev = m_sc[h]
        m_new = jnp.maximum(m_prev, jnp.max(s, axis=-1, keepdims=True))
        alpha = jnp.exp(m_prev - m_new)
        prob = jnp.exp(s - m_new)
        l_sc[h] = alpha * l_sc[h] + jnp.sum(prob, axis=-1, keepdims=True)
        acc_sc[h] = alpha * acc_sc[h] + jnp.dot(
            prob.astype(jnp.bfloat16), v[:, h, :], preferred_element_type=jnp.float32)
        m_sc[h] = m_new

    # ki == qi is the last (diagonal) kv block of this q tile under the
    # lower-triangular enumeration; write the merged-head (t, H) output block
    # (the HBM writeback is one lane-dense DMA of the whole block).
    @pl.when(ki == qi)
    def _():
        for h in range(nH):
            inv = pl.reciprocal(l_sc[h], approx=True)
            o_ref[:, h * Dh:(h + 1) * Dh] = (acc_sc[h] * inv).astype(o_ref.dtype)


def _attn_tile(S):
    for cand in (512, 256, 128):
        if S % cand == 0:
            return cand
    t = min(S, 128)
    t -= t % 8
    while t >= 8:
        if S % t == 0:
            return t
        t -= 8
    return S  # TODO(synk): pad S for sequence lengths not divisible by 8.


def causal_attention(qkv, B, S, nH, Dh, out_dtype=jnp.bfloat16):
    """qkv: [B, S, 3, nH, Dh] (bf16, straight from the c_attn reshape).
    Returns [B, S, nH*Dh] merged-head attention output (causal, no padding mask).
    Only lower-triangular (qi, ki) blocks are enumerated, so fully-masked KV
    blocks are never DMA'd; all heads are processed per grid step."""
    hw = _budget()
    H = nH * Dh
    scale = 1.0 / math.sqrt(Dh)
    t = _attn_tile(S)
    nq = S // t

    qi_list, ki_list = [], []
    for qi in range(nq):
        for ki in range(qi + 1):
            qi_list.append(qi)
            ki_list.append(ki)
    qi_arr = jnp.asarray(qi_list, dtype=jnp.int32)
    ki_arr = jnp.asarray(ki_list, dtype=jnp.int32)
    n_pairs = len(qi_list)

    kernel = functools.partial(_flash_attn_kernel, scale=scale, t=t, nH=nH, Dh=Dh)

    def q_map(b, p, qi_r, ki_r):
        return (b, qi_r[p], 0, 0, 0)

    def k_map(b, p, qi_r, ki_r):
        return (b, ki_r[p], 1, 0, 0)

    def v_map(b, p, qi_r, ki_r):
        return (b, ki_r[p], 2, 0, 0)

    def o_map(b, p, qi_r, ki_r):
        return (b, qi_r[p], 0)

    blk = (None, t, None, nH, Dh)
    grid_spec = pltpu.PrefetchScalarGridSpec(
        num_scalar_prefetch=2,
        grid=(B, n_pairs),
        in_specs=[pl.BlockSpec(blk, q_map),
                  pl.BlockSpec(blk, k_map),
                  pl.BlockSpec(blk, v_map)],
        out_specs=pl.BlockSpec((None, t, H), o_map),
        scratch_shapes=[
            pltpu.VMEM((nH, t, Dh), jnp.bfloat16),   # scaled q cache
            pltpu.VMEM((nH, t, 1), jnp.float32),     # running max m
            pltpu.VMEM((nH, t, 1), jnp.float32),     # running sum l
            pltpu.VMEM((nH, t, Dh), jnp.float32),    # output accumulator
        ])
    return pl.pallas_call(
        kernel,
        out_shape=jax.ShapeDtypeStruct((B, S, H), out_dtype),
        grid_spec=grid_spec,
        compiler_params=pltpu.CompilerParams(
            dimension_semantics=("parallel", "arbitrary"),
            vmem_limit_bytes=hw["vmem"]),
    )(qi_arr, ki_arr, qkv, qkv, qkv)


# --------------------------------------------------------------------------
# fused task-head MLP chain (one pallas_call per branch instead of one per layer)
# --------------------------------------------------------------------------

def _mlp_chain_kernel(*refs, acts):
    x_ref = refs[0]
    n = len(acts)
    o_ref = refs[1 + 2 * n]
    h = x_ref[...].astype(jnp.float32)
    for i in range(n):
        w = refs[1 + 2 * i][...]
        b = refs[2 + 2 * i][...]
        h = jnp.dot(h.astype(jnp.bfloat16), w.astype(jnp.bfloat16),
                    preferred_element_type=jnp.float32) + b.astype(jnp.float32)
        h = _apply_act(h, acts[i])
    o_ref[...] = h.astype(o_ref.dtype)


def mlp_chain(x, layers, out_dtype=jnp.float32):
    """Fused sequence of tiny Linear(+act) layers; layers = [(w, b, act), ...]."""
    hw = _budget()
    Bx, _ = x.shape
    acts = tuple(a for (_, _, a) in layers)
    n_out = layers[-1][0].shape[1]
    args = [x]
    in_specs = [pl.BlockSpec(x.shape, lambda i: (0, 0))]
    for (w, b, _) in layers:
        args.append(w)
        in_specs.append(pl.BlockSpec(w.shape, lambda i: (0, 0)))
        b2 = b.reshape(1, -1)
        args.append(b2)
        in_specs.append(pl.BlockSpec(b2.shape, lambda i: (0, 0)))
    kernel = functools.partial(_mlp_chain_kernel, acts=acts)
    return pl.pallas_call(
        kernel,
        out_shape=jax.ShapeDtypeStruct((Bx, n_out), out_dtype),
        grid=(1,),
        in_specs=in_specs,
        out_specs=pl.BlockSpec((Bx, n_out), lambda i: (0, 0)),
        compiler_params=pltpu.CompilerParams(
            dimension_semantics=("arbitrary",),
            vmem_limit_bytes=hw["vmem"]),
    )(*args)


# --------------------------------------------------------------------------
# Model glue (reshapes / parameter plumbing) in plain JAX
# --------------------------------------------------------------------------

def gpt2_block(x2, lp, B, S, nH, Dh):
    """One GPT2Block (pre-LN attn + pre-LN MLP).  x2: [B*S, H] float32."""
    H = nH * Dh
    # attention sub-block: ln1 fused into c_attn; qkv carried in bf16; the
    # (B,S,3,nH,Dh) reshape is contiguous -> free (no slicing / transpose glue)
    qkv = ln_linear(x2, lp["ln1_g"], lp["ln1_b"], lp["c_attn_w"], lp["c_attn_b"],
                    out_dtype=jnp.bfloat16)
    qkv = qkv.reshape(B, S, 3, nH, Dh)
    attn = causal_attention(qkv, B, S, nH, Dh)              # (B, S, H) bf16, head-merged
    x2 = linear(attn.reshape(B * S, H), lp["c_proj_w"], lp["c_proj_b"],
                residual=x2)                                 # residual stream stays f32
    # MLP sub-block: ln2 fused into c_fc (bf16 intermediate), residual fused into proj
    m = ln_linear(x2, lp["ln2_g"], lp["ln2_b"], lp["fc_w"], lp["fc_b"],
                  activation="gelu", out_dtype=jnp.bfloat16)
    x2 = linear(m, lp["proj_w"], lp["proj_b"], residual=x2)
    return x2


def cidadao_forward(params, input_ids, cfg, task="generation",
                    attention_mask=None, position_ids=None):
    B, S = input_ids.shape
    H = cfg["hidden_size"]
    nH = cfg["num_attention_heads"]
    Dh = H // nH

    if position_ids is None:
        position_ids = jnp.broadcast_to(jnp.arange(S, dtype=jnp.int32)[None, :], (B, S))

    # TransparencyEmbeddings: word + position embeddings, LayerNorm, dropout(id).
    x = params["word_emb"][input_ids] + params["pos_emb"][position_ids]
    # TODO(synk): entity/financial/legal/corruption embeddings (hidden//4 wide) are not
    # shape-compatible with hidden-size embeds in the reference; only the `None` path is done.
    x2 = layernorm(x.reshape(B * S, H), params["emb_ln_g"], params["emb_ln_b"])

    # TODO(synk): non-None attention_mask (padding mask) not plumbed; causal-only attention.
    for lp in params["layers"]:
        x2 = gpt2_block(x2, lp, B, S, nH, Dh)

    x2 = layernorm(x2, params["lnf_g"], params["lnf_b"])
    hidden = x2.reshape(B, S, H)
    outputs = {"last_hidden_state": hidden}

    if task == "anomaly_detection":
        pooled = jnp.mean(hidden, axis=1)                    # (B, H)
        a = params["anomaly"]
        outputs["anomaly_logits"] = mlp_chain(
            pooled, [(a["w1"], a["b1"], "relu"),
                     (a["w2"], a["b2"], "relu"),
                     (a["w3"], a["b3"], None)])
        outputs["confidence_score"] = mlp_chain(
            pooled, [(a["cw1"], a["cb1"], "relu"),
                     (a["cw2"], a["cb2"], "sigmoid")])
    elif task == "financial_analysis":
        pooled = jnp.mean(hidden, axis=1)
        f = params["financial"]
        outputs["estimated_value"] = mlp_chain(
            pooled, [(f["vw1"], f["vb1"], "relu"), (f["vw2"], f["vb2"], None)])
        outputs["risk_logits"] = mlp_chain(
            pooled, [(f["rw1"], f["rb1"], "relu"), (f["rw2"], f["rb2"], None)])
    elif task == "legal_reasoning":
        pooled = jnp.mean(hidden, axis=1)
        l = params["legal"]
        outputs["legal_type_logits"] = mlp_chain(
            pooled, [(l["lw1"], l["lb1"], "relu"), (l["lw2"], l["lb2"], None)])
        outputs["compliance_logits"] = mlp_chain(
            pooled, [(l["cw1"], l["cb1"], "relu"), (l["cw2"], l["cb2"], None)])
    elif task == "generation":
        # bias-free LM head; N padded to a 128 multiple inside linear()
        # TODO(synk): optional fp8 weight path for v7x not implemented (needs scale plumbing).
        logits = linear(x2, params["lm_head_w"], b=None, tn_target=512)
        outputs["logits"] = logits.reshape(B, S, cfg["vocab_size"])
    return outputs


# --------------------------------------------------------------------------
# Deterministic synthetic parameter init (normal std=0.02, zero bias, LN=1/0).
# Matmul weights are stored in bf16 (MXU inputs); LN params / biases / the
# residual stream stay f32, accumulation is f32.
# --------------------------------------------------------------------------

def init_params(key, cfg):
    H = cfg["hidden_size"]
    I = cfg["intermediate_size"]
    V = cfg["vocab_size"]
    Fd = cfg["financial_analysis_dim"]
    Ld = cfg["legal_understanding_dim"]
    keys = iter(jax.random.split(key, 256))

    def nrm(shape, dtype=jnp.bfloat16):
        return (0.02 * jax.random.normal(next(keys), shape, jnp.float32)).astype(dtype)

    params = {
        "word_emb": nrm((V, H), jnp.float32),
        "pos_emb": nrm((cfg["max_position_embeddings"], H), jnp.float32),
        "emb_ln_g": jnp.ones((H,), jnp.float32),
        "emb_ln_b": jnp.zeros((H,), jnp.float32),
        "lnf_g": jnp.ones((H,), jnp.float32),
        "lnf_b": jnp.zeros((H,), jnp.float32),
        "lm_head_w": nrm((H, V)),
        "layers": [],
    }
    for _ in range(cfg["num_hidden_layers"]):
        params["layers"].append({
            "ln1_g": jnp.ones((H,), jnp.float32), "ln1_b": jnp.zeros((H,), jnp.float32),
            "c_attn_w": nrm((H, 3 * H)), "c_attn_b": jnp.zeros((3 * H,), jnp.float32),
            "c_proj_w": nrm((H, H)), "c_proj_b": jnp.zeros((H,), jnp.float32),
            "ln2_g": jnp.ones((H,), jnp.float32), "ln2_b": jnp.zeros((H,), jnp.float32),
            "fc_w": nrm((H, I)), "fc_b": jnp.zeros((I,), jnp.float32),
            "proj_w": nrm((I, H)), "proj_b": jnp.zeros((H,), jnp.float32),
        })
    params["anomaly"] = {
        "w1": nrm((H, H // 2)), "b1": jnp.zeros((H // 2,), jnp.float32),
        "w2": nrm((H // 2, H // 4)), "b2": jnp.zeros((H // 4,), jnp.float32),
        "w3": nrm((H // 4, 3)), "b3": jnp.zeros((3,), jnp.float32),
        "cw1": nrm((H, H // 4)), "cb1": jnp.zeros((H // 4,), jnp.float32),
        "cw2": nrm((H // 4, 1)), "cb2": jnp.zeros((1,), jnp.float32),
    }
    params["financial"] = {
        "vw1": nrm((H, Fd)), "vb1": jnp.zeros((Fd,), jnp.float32),
        "vw2": nrm((Fd, 1)), "vb2": jnp.zeros((1,), jnp.float32),
        "rw1": nrm((H, Fd)), "rb1": jnp.zeros((Fd,), jnp.float32),
        "rw2": nrm((Fd, 5)), "rb2": jnp.zeros((5,), jnp.float32),
    }
    params["legal"] = {
        "lw1": nrm((H, Ld)), "lb1": jnp.zeros((Ld,), jnp.float32),
        "lw2": nrm((Ld, 10)), "lb2": jnp.zeros((10,), jnp.float32),
        "cw1": nrm((H, Ld)), "cb1": jnp.zeros((Ld,), jnp.float32),
        "cw2": nrm((Ld, 2)), "cb2": jnp.zeros((2,), jnp.float32),
    }
    return params


# --------------------------------------------------------------------------

if __name__ == "__main__":
    # Small, shape-consistent config (scaled down from the 1024-hidden original).
    cfg = dict(
        hidden_size=128,
        num_attention_heads=4,
        num_hidden_layers=2,
        intermediate_size=512,          # 4 * hidden, like GPT-2
        max_position_embeddings=64,
        vocab_size=512,
        financial_analysis_dim=64,
        legal_understanding_dim=32,
    )
    B, S = 2, 16

    key = jax.random.PRNGKey(0)
    pkey, ikey = jax.random.split(key)
    params = init_params(pkey, cfg)
    input_ids = jax.random.randint(ikey, (B, S), 0, cfg["vocab_size"], dtype=jnp.int32)

    # jit with cfg/task captured statically so XLA fuses the glue between pallas_calls
    gen_fn = jax.jit(lambda p, ids: cidadao_forward(p, ids, cfg, task="generation"))
    anom_fn = jax.jit(lambda p, ids: cidadao_forward(p, ids, cfg, task="anomaly_detection"))

    # generation task (default): hidden states + LM logits
    out_gen = gen_fn(params, input_ids)
    jax.block_until_ready(out_gen["logits"])
    assert out_gen["last_hidden_state"].shape == (B, S, cfg["hidden_size"])
    assert out_gen["logits"].shape == (B, S, cfg["vocab_size"])
    assert bool(jnp.all(jnp.isfinite(out_gen["logits"])))

    # anomaly-detection task: exercise the fused specialty-head kernel too
    out_anom = anom_fn(params, input_ids)
    jax.block_until_ready(out_anom["anomaly_logits"])
    assert out_anom["anomaly_logits"].shape == (B, 3)
    assert out_anom["confidence_score"].shape == (B, 1)
    assert bool(jnp.all(jnp.isfinite(out_anom["anomaly_logits"])))

    print("KERNEL_OK")
</pallas_src>

<mosaic_0001>
module attributes {stable_mosaic.version = 11 : i64} {
  func.func @_layernorm_kernel(%arg0: i32, %arg1: memref<32x128xf32, #tpu.memory_space<vmem>>, %arg2: memref<1x128xf32, #tpu.memory_space<vmem>>, %arg3: memref<1x128xf32, #tpu.memory_space<vmem>>, %arg4: memref<32x128xf32, #tpu.memory_space<vmem>>) attributes {dimension_semantics = [#tpu.dimension_semantics<parallel>], iteration_bounds = array<i64: 1>, scalar_prefetch = 0 : i64, scratch_operands = 0 : i64, tpu.core_type = #tpu.core_type<tc>, window_params = [{transform_indices = @transform_0, window_bounds = array<i64: 32, 128>}, {pipeline_mode = #tpu.pipeline_mode<synchronous>, transform_indices = @transform_1, window_bounds = array<i64: 1, 128>}, {pipeline_mode = #tpu.pipeline_mode<synchronous>, transform_indices = @transform_2, window_bounds = array<i64: 1, 128>}, {transform_indices = @transform_3, window_bounds = array<i64: 32, 128>}]} {
    %c0 = arith.constant 0 : index
    %c0_0 = arith.constant 0 : index
    %0 = vector.load %arg1[%c0, %c0_0] : memref<32x128xf32, #tpu.memory_space<vmem>>, vector<32x128xf32>
    %cst = arith.constant dense<0.000000e+00> : vector<32xf32>
    %1 = vector.multi_reduction <add>, %0, %cst [1] : vector<32x128xf32> to vector<32xf32>
    %2 = vector.shape_cast %1 : vector<32xf32> to vector<32x1xf32>
    %cst_1 = arith.constant 1.280000e+02 : f32
    %3 = vector.broadcast %cst_1 : f32 to vector<32x1xf32>
    %4 = arith.divf %2, %3 : vector<32x1xf32>
    %5 = vector.broadcast %4 : vector<32x1xf32> to vector<32x128xf32>
    %6 = arith.subf %0, %5 : vector<32x128xf32>
    %7 = arith.mulf %6, %6 : vector<32x128xf32>
    %cst_2 = arith.constant dense<0.000000e+00> : vector<32xf32>
    %8 = vector.multi_reduction <add>, %7, %cst_2 [1] : vector<32x128xf32> to vector<32xf32>
    %9 = vector.shape_cast %8 : vector<32xf32> to vector<32x1xf32>
    %cst_3 = arith.constant 1.280000e+02 : f32
    %10 = vector.broadcast %cst_3 : f32 to vector<32x1xf32>
    %11 = arith.divf %9, %10 : vector<32x1xf32>
    %cst_4 = arith.constant 9.99999974E-6 : f32
    %12 = vector.broadcast %cst_4 : f32 to vector<32x1xf32>
    %13 = arith.addf %11, %12 : vector<32x1xf32>
    %14 = math.rsqrt %13 : vector<32x1xf32>
    %15 = vector.broadcast %14 : vector<32x1xf32> to vector<32x128xf32>
    %16 = arith.mulf %6, %15 : vector<32x128xf32>
    %c0_5 = arith.constant 0 : index
    %c0_6 = arith.constant 0 : index
    %17 = vector.load %arg2[%c0_5, %c0_6] : memref<1x128xf32, #tpu.memory_space<vmem>>, vector<1x128xf32>
    %18 = vector.broadcast %17 : vector<1x128xf32> to vector<32x128xf32>
    %19 = arith.mulf %16, %18 : vector<32x128xf32>
    %c0_7 = arith.constant 0 : index
    %c0_8 = arith.constant 0 : index
    %20 = vector.load %arg3[%c0_7, %c0_8] : memref<1x128xf32, #tpu.memory_space<vmem>>, vector<1x128xf32>
    %21 = vector.broadcast %20 : vector<1x128xf32> to vector<32x128xf32>
    %22 = arith.addf %19, %21 : vector<32x128xf32>
    %c0_9 = arith.constant 0 : index
    %c0_10 = arith.constant 0 : index
    %23 = vector.load %arg4[%c0_9, %c0_10] : memref<32x128xf32, #tpu.memory_space<vmem>>, vector<32x128xf32>
    tpu.vector_store %arg4[%c0_9, %c0_10], %22 {strides = array<i32>} : memref<32x128xf32, #tpu.memory_space<vmem>>, vector<32x128xf32>,
    return
  }
  func.func @transform_0(%arg0: i32) -> (i32, i32) {
    %c0_i32 = arith.constant 0 : i32
    %c0_i32_0 = arith.constant 0 : i32
    return %arg0, %c0_i32 : i32, i32
  }
  func.func @transform_1(%arg0: i32) -> (i32, i32) {
    %c0_i32 = arith.constant 0 : i32
    %c0_i32_0 = arith.constant 0 : i32
    %c0_i32_1 = arith.constant 0 : i32
    return %c0_i32, %c0_i32_0 : i32, i32
  }
  func.func @transform_2(%arg0: i32) -> (i32, i32) {
    %c0_i32 = arith.constant 0 : i32
    %c0_i32_0 = arith.constant 0 : i32
    %c0_i32_1 = arith.constant 0 : i32
    return %c0_i32, %c0_i32_0 : i32, i32
  }
  func.func @transform_3(%arg0: i32) -> (i32, i32) {
    %c0_i32 = arith.constant 0 : i32
    %c0_i32_0 = arith.constant 0 : i32
    return %arg0, %c0_i32 : i32, i32
  }
}

module attributes {stable_mosaic.version = 11 : i64} {
  func.func @_ln_matmul_kernel(%arg0: i32, %arg1: i32, %arg2: memref<32x128xf32, #tpu.memory_space<vmem>>, %arg3: memref<1x128xf32, #tpu.memory_space<vmem>>, %arg4: memref<1x128xf32, #tpu.memory_space<vmem>>, %arg5: memref<128x128xbf16, #tpu.memory_space<vmem>>, %arg6: memref<1x128xf32, #tpu.memory_space<vmem>>, %arg7: memref<32x128xbf16, #tpu.memory_space<vmem>>, %arg8: memref<32x128xbf16, #tpu.memory_space<vmem>>) attributes {dimension_semantics = [#tpu.dimension_semantics<parallel>, #tpu.dimension_semantics<arbitrary>], iteration_bounds = array<i64: 1, 3>, scalar_prefetch = 0 : i64, scratch_operands = 1 : i64, tpu.core_type = #tpu.core_type<tc>, window_params = [{transform_indices = @transform_0, window_bounds = array<i64: 32, 128>}, {pipeline_mode = #tpu.pipeline_mode<synchronous>, transform_indices = @transform_1, window_bounds = array<i64: 1, 128>}, {pipeline_mode = #tpu.pipeline_mode<synchronous>, transform_indices = @transform_2, window_bounds = array<i64: 1, 128>}, {transform_indices = @transform_3, window_bounds = array<i64: 128, 128>}, {transform_indices = @transform_4, window_bounds = array<i64: 1, 128>}, {transform_indices = @transform_5, window_bounds = array<i64: 32, 128>}]} {
    %c0_i32 = arith.constant 0 : i32
    %0 = arith.cmpi eq, %arg1, %c0_i32 : i32
    %1 = arith.extui %0 : i1 to i32
    %c0_i32_0 = arith.constant 0 : i32
    %2 = arith.cmpi ne, %1, %c0_i32_0 : i32
    scf.if %2 {
      %c0_8 = arith.constant 0 : index
      %c0_9 = arith.constant 0 : index
      %11 = vector.load %arg2[%c0_8, %c0_9] : memref<32x128xf32, #tpu.memory_space<vmem>>, vector<32x128xf32>
      %cst_10 = arith.constant dense<0.000000e+00> : vector<32xf32>
      %12 = vector.multi_reduction <add>, %11, %cst_10 [1] : vector<32x128xf32> to vector<32xf32>
      %13 = vector.shape_cast %12 : vector<32xf32> to vector<32x1xf32>
      %cst_11 = arith.constant 1.280000e+02 : f32
      %14 = vector.broadcast %cst_11 : f32 to vector<32x1xf32>
      %15 = arith.divf %13, %14 : vector<32x1xf32>
      %16 = vector.broadcast %15 : vector<32x1xf32> to vector<32x128xf32>
      %17 = arith.subf %11, %16 : vector<32x128xf32>
      %18 = arith.mulf %17, %17 : vector<32x128xf32>
      %cst_12 = arith.constant dense<0.000000e+00> : vector<32xf32>
      %19 = vector.multi_reduction <add>, %18, %cst_12 [1] : vector<32x128xf32> to vector<32xf32>
      %20 = vector.shape_cast %19 : vector<32xf32> to vector<32x1xf32>
      %cst_13 = arith.constant 1.280000e+02 : f32
      %21 = vector.broadcast %cst_13 : f32 to vector<32x1xf32>
      %22 = arith.divf %20, %21 : vector<32x1xf32>
      %cst_14 = arith.constant 9.99999974E-6 : f32
      %23 = vector.broadcast %cst_14 : f32 to vector<32x1xf32>
      %24 = arith.addf %22, %23 : vector<32x1xf32>
      %25 = math.rsqrt %24 : vector<32x1xf32>
      %26 = vector.broadcast %25 : vector<32x1xf32> to vector<32x128xf32>
      %27 = arith.mulf %17, %26 : vector<32x128xf32>
      %c0_15 = arith.constant 0 : index
      %c0_16 = arith.constant 0 : index
      %28 = vector.load %arg3[%c0_15, %c0_16] : memref<1x128xf32, #tpu.memory_space<vmem>>, vector<1x128xf32>
      %29 = vector.broadcast %28 : vector<1x128xf32> to vector<32x128xf32>
      %30 = arith.mulf %27, %29 : vector<32x128xf32>
      %c0_17 = arith.constant 0 : index
      %c0_18 = arith.constant 0 : index
      %31 = vector.load %arg4[%c0_17, %c0_18] : memref<1x128xf32, #tpu.memory_space<vmem>>, vector<1x128xf32>
      %32 = vector.broadcast %31 : vector<1x128xf32> to vector<32x128xf32>
      %33 = arith.addf %30, %32 : vector<32x128xf32>
      %34 = arith.truncf %33 : vector<32x128xf32> to vector<32x128xbf16>
      %c0_19 = arith.constant 0 : index
      %c0_20 = arith.constant 0 : index
      %35 = vector.load %arg8[%c0_19, %c0_20] : memref<32x128xbf16, #tpu.memory_space<vmem>>, vector<32x128xbf16>
      tpu.vector_store %arg8[%c0_19, %c0_20], %34 {strides = array<i32>} : memref<32x128xbf16, #tpu.memory_space<vmem>>, vector<32x128xbf16>,
    } else {
    }
    %c0 = arith.constant 0 : index
    %c0_1 = arith.constant 0 : index
    %3 = vector.load %arg8[%c0, %c0_1] : memref<32x128xbf16, #tpu.memory_space<vmem>>, vector<32x128xbf16>
    %c0_2 = arith.constant 0 : index
    %c0_3 = arith.constant 0 : index
    %4 = vector.load %arg5[%c0_2, %c0_3] : memref<128x128xbf16, #tpu.memory_space<vmem>>, vector<128x128xbf16>
    %cst = arith.constant dense<0.000000e+00> : vector<32x128xf32>
    %5 = tpu.matmul %3, %4, %cst {dimension_numbers = #tpu.dot_dimension_numbers<[1], [0], [0], [1], [0, 0, 1, 1], [], []>} : vector<32x128xbf16>, vector<128x128xbf16>, vector<32x128xf32> -> vector<32x128xf32>
    %c0_4 = arith.constant 0 : index
    %c0_5 = arith.constant 0 : index
    %6 = vector.load %arg6[%c0_4, %c0_5] : memref<1x128xf32, #tpu.memory_space<vmem>>, vector<1x128xf32>
    %7 = vector.broadcast %6 : vector<1x128xf32> to vector<32x128xf32>
    %8 = arith.addf %5, %7 : vector<32x128xf32>
    %9 = arith.truncf %8 : vector<32x128xf32> to vector<32x128xbf16>
    %c0_6 = arith.constant 0 : index
    %c0_7 = arith.constant 0 : index
    %10 = vector.load %arg7[%c0_6, %c0_7] : memref<32x128xbf16, #tpu.memory_space<vmem>>, vector<32x128xbf16>
    tpu.vector_store %arg7[%c0_6, %c0_7], %9 {strides = array<i32>} : memref<32x128xbf16, #tpu.memory_space<vmem>>, vector<32x128xbf16>,
    return
  }
  func.func @transform_0(%arg0: i32, %arg1: i32) -> (i32, i32) {
    %c0_i32 = arith.constant 0 : i32
    %c0_i32_0 = arith.constant 0 : i32
    return %arg0, %c0_i32 : i32, i32
  }
  func.func @transform_1(%arg0: i32, %arg1: i32) -> (i32, i32) {
    %c0_i32 = arith.constant 0 : i32
    %c0_i32_0 = arith.constant 0 : i32
    %c0_i32_1 = arith.constant 0 : i32
    return %c0_i32, %c0_i32_0 : i32, i32
  }
  func.func @transform_2(%arg0: i32, %arg1: i32) -> (i32, i32) {
    %c0_i32 = arith.constant 0 : i32
    %c0_i32_0 = arith.constant 0 : i32
    %c0_i32_1 = arith.constant 0 : i32
    return %c0_i32, %c0_i32_0 : i32, i32
  }
  func.func @transform_3(%arg0: i32, %arg1: i32) -> (i32, i32) {
    %c0_i32 = arith.constant 0 : i32
    %c0_i32_0 = arith.constant 0 : i32
    return %c0_i32, %arg1 : i32, i32
  }
  func.func @transform_4(%arg0: i32, %arg1: i32) -> (i32, i32) {
    %c0_i32 = arith.constant 0 : i32
    %c0_i32_0 = arith.constant 0 : i32
    return %c0_i32, %arg1 : i32, i32
  }
  func.func @transform_5(%arg0: i32, %arg1: i32) -> (i32, i32) {
    %c0_i32 = arith.constant 0 : i32
    return %arg0, %arg1 : i32, i32
  }
}

module attributes {stable_mosaic.version = 11 : i64} {
  func.func @_flash_attn_kernel(%arg0: i32, %arg1: i32, %arg2: memref<1xi32, #tpu.memory_space<smem>>, %arg3: memref<1xi32, #tpu.memory_space<smem>>, %arg4: memref<1x16x1x4x32xbf16, #tpu.memory_space<vmem>>, %arg5: memref<1x16x1x4x32xbf16, #tpu.memory_space<vmem>>, %arg6: memref<1x16x1x4x32xbf16, #tpu.memory_space<vmem>>, %arg7: memref<1x16x128xbf16, #tpu.memory_space<vmem>>, %arg8: memref<4x16x32xbf16, #tpu.memory_space<vmem>>, %arg9: memref<4x16x1xf32, #tpu.memory_space<vmem>>, %arg10: memref<4x16x1xf32, #tpu.memory_space<vmem>>, %arg11: memref<4x16x32xf32, #tpu.memory_space<vmem>>) attributes {dimension_semantics = [#tpu.dimension_semantics<parallel>, #tpu.dimension_semantics<arbitrary>], iteration_bounds = array<i64: 2, 1>, scalar_prefetch = 2 : i64, scratch_operands = 4 : i64, tpu.core_type = #tpu.core_type<tc>, window_params = [{transform_indices = @transform_0, window_bounds = array<i64: 1, 16, 1, 4, 32>}, {transform_indices = @transform_1, window_bounds = array<i64: 1, 16, 1, 4, 32>}, {transform_indices = @transform_2, window_bounds = array<i64: 1, 16, 1, 4, 32>}, {transform_indices = @transform_3, window_bounds = array<i64: 1, 16, 128>}]} {
    %0 = arith.index_cast %arg1 : i32 to index
    %1 = memref.load %arg2[%0] : memref<1xi32, #tpu.memory_space<smem>>
    %2 = arith.index_cast %arg1 : i32 to index
    %3 = memref.load %arg3[%2] : memref<1xi32, #tpu.memory_space<smem>>
    %c0_i32 = arith.constant 0 : i32
    %4 = arith.cmpi eq, %3, %c0_i32 : i32
    %5 = arith.extui %4 : i1 to i32
    %c0_i32_0 = arith.constant 0 : i32
    %6 = arith.cmpi ne, %5, %c0_i32_0 : i32
    scf.if %6 {
      %c0_112 = arith.constant 0 : index
      %c0_113 = arith.constant 0 : index
      %c0_114 = arith.constant 0 : index
      %c0_115 = arith.constant 0 : index
      %c0_116 = arith.constant 0 : index
      %187 = vector.load %arg4[%c0_112, %c0_113, %c0_114, %c0_115, %c0_116] : memref<1x16x1x4x32xbf16, #tpu.memory_space<vmem>>, vector<1x16x1x4x32xbf16>
      %188 = vector.shape_cast %187 : vector<1x16x1x4x32xbf16> to vector<16x4x32xbf16>
      %189 = arith.extf %188 : vector<16x4x32xbf16> to vector<16x4x32xf32>
      %cst_117 = arith.constant 0.176776692 : f32
      %190 = vector.broadcast %cst_117 : f32 to vector<16x4x32xf32>
      %191 = arith.mulf %189, %190 : vector<16x4x32xf32>
      %192 = vector.extract_strided_slice %191 {offsets = [0, 0, 0], sizes = [16, 1, 32], strides = [1, 1, 1]} : vector<16x4x32xf32> to vector<16x1x32xf32>
      %193 = vector.shape_cast %192 : vector<16x1x32xf32> to vector<16x32xf32>
      %194 = arith.truncf %193 : vector<16x32xf32> to vector<16x32xbf16>
      %c0_118 = arith.constant 0 : index
      %c0_119 = arith.constant 0 : index
      %c0_120 = arith.constant 0 : index
      %195 = vector.load %arg8[%c0_118, %c0_119, %c0_120] : memref<4x16x32xbf16, #tpu.memory_space<vmem>>, vector<1x16x32xbf16>
      %196 = vector.shape_cast %195 : vector<1x16x32xbf16> to vector<16x32xbf16>
      %197 = vector.shape_cast %194 : vector<16x32xbf16> to vector<1x16x32xbf16>
      tpu.vector_store %arg8[%c0_118, %c0_119, %c0_120], %197 {strides = array<i32>} : memref<4x16x32xbf16, #tpu.memory_space<vmem>>, vector<1x16x32xbf16>,
      %198 = vector.extract_strided_slice %191 {offsets = [0, 1, 0], sizes = [16, 1, 32], strides = [1, 1, 1]} : vector<16x4x32xf32> to vector<16x1x32xf32>
      %199 = vector.shape_cast %198 : vector<16x1x32xf32> to vector<16x32xf32>
      %200 = arith.truncf %199 : vector<16x32xf32> to vector<16x32xbf16>
      %c1_121 = arith.constant 1 : index
      %c0_122 = arith.constant 0 : index
      %c0_123 = arith.constant 0 : index
      %201 = vector.load %arg8[%c1_121, %c0_122, %c0_123] : memref<4x16x32xbf16, #tpu.memory_space<vmem>>, vector<1x16x32xbf16>
      %202 = vector.shape_cast %201 : vector<1x16x32xbf16> to vector<16x32xbf16>
      %203 = vector.shape_cast %200 : vector<16x32xbf16> to vector<1x16x32xbf16>
      tpu.vector_store %arg8[%c1_121, %c0_122, %c0_123], %203 {strides = array<i32>} : memref<4x16x32xbf16, #tpu.memory_space<vmem>>, vector<1x16x32xbf16>,
      %204 = vector.extract_strided_slice %191 {offsets = [0, 2, 0], sizes = [16, 1, 32], strides = [1, 1, 1]} : vector<16x4x32xf32> to vector<16x1x32xf32>
      %205 = vector.shape_cast %204 : vector<16x1x32xf32> to vector<16x32xf32>
      %206 = arith.truncf %205 : vector<16x32xf32> to vector<16x32xbf16>
      %c2_124 = arith.constant 2 : index
      %c0_125 = arith.constant 0 : index
      %c0_126 = arith.constant 0 : index
      %207 = vector.load %arg8[%c2_124, %c0_125, %c0_126] : memref<4x16x32xbf16, #tpu.memory_space<vmem>>, vector<1x16x32xbf16>
      %208 = vector.shape_cast %207 : vector<1x16x32xbf16> to vector<16x32xbf16>
      %209 = vector.shape_cast %206 : vector<16x32xbf16> to vector<1x16x32xbf16>
      tpu.vector_store %arg8[%c2_124, %c0_125, %c0_126], %209 {strides = array<i32>} : memref<4x16x32xbf16, #tpu.memory_space<vmem>>, vector<1x16x32xbf16>,
      %210 = vector.extract_strided_slice %191 {offsets = [0, 3, 0], sizes = [16, 1, 32], strides = [1, 1, 1]} : vector<16x4x32xf32> to vector<16x1x32xf32>
      %211 = vector.shape_cast %210 : vector<16x1x32xf32> to vector<16x32xf32>
      %212 = arith.truncf %211 : vector<16x32xf32> to vector<16x32xbf16>
      %c3_127 = arith.constant 3 : index
      %c0_128 = arith.constant 0 : index
      %c0_129 = arith.constant 0 : index
      %213 = vector.load %arg8[%c3_127, %c0_128, %c0_129] : memref<4x16x32xbf16, #tpu.memory_space<vmem>>, vector<1x16x32xbf16>
      %214 = vector.shape_cast %213 : vector<1x16x32xbf16> to vector<16x32xbf16>
      %215 = vector.shape_cast %212 : vector<16x32xbf16> to vector<1x16x32xbf16>
      tpu.vector_store %arg8[%c3_127, %c0_128, %c0_129], %215 {strides = array<i32>} : memref<4x16x32xbf16, #tpu.memory_space<vmem>>, vector<1x16x32xbf16>,
      %cst_130 = arith.constant -1.000000e+30 : f32
      %216 = vector.broadcast %cst_130 : f32 to vector<4x16x1xf32>
      %c0_131 = arith.constant 0 : index
      %c0_132 = arith.constant 0 : index
      %c0_133 = arith.constant 0 : index
      %217 = vector.load %arg9[%c0_131, %c0_132, %c0_133] : memref<4x16x1xf32, #tpu.memory_space<vmem>>, vector<4x16x1xf32>
      tpu.vector_store %arg9[%c0_131, %c0_132, %c0_133], %216 {strides = array<i32>} : memref<4x16x1xf32, #tpu.memory_space<vmem>>, vector<4x16x1xf32>,
      %cst_134 = arith.constant 0.000000e+00 : f32
      %218 = vector.broadcast %cst_134 : f32 to vector<4x16x1xf32>
      %c0_135 = arith.constant 0 : index
      %c0_136 = arith.constant 0 : index
      %c0_137 = arith.constant 0 : index
      %219 = vector.load %arg10[%c0_135, %c0_136, %c0_137] : memref<4x16x1xf32, #tpu.memory_space<vmem>>, vector<4x16x1xf32>
      tpu.vector_store %arg10[%c0_135, %c0_136, %c0_137], %218 {strides = array<i32>} : memref<4x16x1xf32, #tpu.memory_space<vmem>>, vector<4x16x1xf32>,
      %cst_138 = arith.constant 0.000000e+00 : f32
      %220 = vector.broadcast %cst_138 : f32 to vector<4x16x32xf32>
      %c0_139 = arith.constant 0 : index
      %c0_140 = arith.constant 0 : index
      %c0_141 = arith.constant 0 : index
      %221 = vector.load %arg11[%c0_139, %c0_140, %c0_141] : memref<4x16x32xf32, #tpu.memory_space<vmem>>, vector<4x16x32xf32>
      tpu.vector_store %arg11[%c0_139, %c0_140, %c0_141], %220 {strides = array<i32>} : memref<4x16x32xf32, #tpu.memory_space<vmem>>, vector<4x16x32xf32>,
    } else {
    }
    %c16_i32 = arith.constant 16 : i32
    %7 = arith.muli %1, %c16_i32 : i32
    %8 = tpu.iota {dimensions = array<i32: 0>} : vector<16x16xi32>
    %9 = vector.broadcast %7 : i32 to vector<16x16xi32>
    %10 = arith.addi %9, %8 : vector<16x16xi32>
    %c16_i32_1 = arith.constant 16 : i32
    %11 = arith.muli %3, %c16_i32_1 : i32
    %12 = tpu.iota {dimensions = array<i32: 1>} : vector<16x16xi32>
    %13 = vector.broadcast %11 : i32 to vector<16x16xi32>
    %14 = arith.addi %13, %12 : vector<16x16xi32>
    %15 = arith.cmpi sle, %14, %10 : vector<16x16xi32>
    %c0 = arith.constant 0 : index
    %c0_2 = arith.constant 0 : index
    %c0_3 = arith.constant 0 : index
    %c0_4 = arith.constant 0 : index
    %c0_5 = arith.constant 0 : index
    %16 = vector.load %arg5[%c0, %c0_2, %c0_3, %c0_4, %c0_5] : memref<1x16x1x4x32xbf16, #tpu.memory_space<vmem>>, vector<1x16x1x4x32xbf16>
    %17 = vector.shape_cast %16 : vector<1x16x1x4x32xbf16> to vector<16x4x32xbf16>
    %c0_6 = arith.constant 0 : index
    %c0_7 = arith.constant 0 : index
    %c0_8 = arith.constant 0 : index
    %c0_9 = arith.constant 0 : index
    %c0_10 = arith.constant 0 : index
    %18 = vector.load %arg6[%c0_6, %c0_7, %c0_8, %c0_9, %c0_10] : memref<1x16x1x4x32xbf16, #tpu.memory_space<vmem>>, vector<1x16x1x4x32xbf16>
    %19 = vector.shape_cast %18 : vector<1x16x1x4x32xbf16> to vector<16x4x32xbf16>
    %c0_11 = arith.constant 0 : index
    %c0_12 = arith.constant 0 : index
    %c0_13 = arith.constant 0 : index
    %20 = vector.load %arg8[%c0_11, %c0_12, %c0_13] : memref<4x16x32xbf16, #tpu.memory_space<vmem>>, vector<1x16x32xbf16>
    %21 = vector.shape_cast %20 : vector<1x16x32xbf16> to vector<16x32xbf16>
    %22 = vector.extract_strided_slice %17 {offsets = [0, 0, 0], sizes = [16, 1, 32], strides = [1, 1, 1]} : vector<16x4x32xbf16> to vector<16x1x32xbf16>
    %23 = vector.shape_cast %22 : vector<16x1x32xbf16> to vector<16x32xbf16>
    %cst = arith.constant dense<0.000000e+00> : vector<16x16xf32>
    %24 = tpu.matmul %21, %23, %cst {dimension_numbers = #tpu.dot_dimension_numbers<[1], [1], [0], [0], [0, 0, 1, 0], [], []>} : vector<16x32xbf16>, vector<16x32xbf16>, vector<16x16xf32> -> vector<16x16xf32>
    %cst_14 = arith.constant -1.000000e+30 : f32
    %25 = vector.broadcast %cst_14 : f32 to vector<16x16xf32>
    %26 = arith.select %15, %24, %25 : vector<16x16xi1>, vector<16x16xf32>
    %c0_15 = arith.constant 0 : index
    %c0_16 = arith.constant 0 : index
    %c0_17 = arith.constant 0 : index
    %27 = vector.load %arg9[%c0_15, %c0_16, %c0_17] : memref<4x16x1xf32, #tpu.memory_space<vmem>>, vector<1x16x1xf32>
    %28 = vector.shape_cast %27 : vector<1x16x1xf32> to vector<16x1xf32>
    %cst_18 = arith.constant dense<0xFF800000> : vector<16xf32>
    %29 = vector.multi_reduction <maximumf>, %26, %cst_18 [1] : vector<16x16xf32> to vector<16xf32>
    %30 = vector.shape_cast %29 : vector<16xf32> to vector<16x1xf32>
    %31 = arith.maximumf %28, %30 : vector<16x1xf32>
    %32 = arith.subf %28, %31 : vector<16x1xf32>
    %33 = math.exp %32 : vector<16x1xf32>
    %34 = vector.broadcast %31 : vector<16x1xf32> to vector<16x16xf32>
    %35 = arith.subf %26, %34 : vector<16x16xf32>
    %36 = math.exp %35 : vector<16x16xf32>
    %c0_19 = arith.constant 0 : index
    %c0_20 = arith.constant 0 : index
    %c0_21 = arith.constant 0 : index
    %37 = vector.load %arg10[%c0_19, %c0_20, %c0_21] : memref<4x16x1xf32, #tpu.memory_space<vmem>>, vector<1x16x1xf32>
    %38 = vector.shape_cast %37 : vector<1x16x1xf32> to vector<16x1xf32>
    %39 = arith.mulf %33, %38 : vector<16x1xf32>
    %cst_22 = arith.constant dense<0.000000e+00> : vector<16xf32>
    %40 = vector.multi_reduction <add>, %36, %cst_22 [1] : vector<16x16xf32> to vector<16xf32>
    %41 = vector.shape_cast %40 : vector<16xf32> to vector<16x1xf32>
    %42 = arith.addf %39, %41 : vector<16x1xf32>
    %c0_23 = arith.constant 0 : index
    %c0_24 = arith.constant 0 : index
    %c0_25 = arith.constant 0 : index
    %43 = vector.load %arg10[%c0_23, %c0_24, %c0_25] : memref<4x16x1xf32, #tpu.memory_space<vmem>>, vector<1x16x1xf32>
    %44 = vector.shape_cast %43 : vector<1x16x1xf32> to vector<16x1xf32>
    %45 = vector.shape_cast %42 : vector<16x1xf32> to vector<1x16x1xf32>
    tpu.vector_store %arg10[%c0_23, %c0_24, %c0_25], %45 {strides = array<i32>} : memref<4x16x1xf32, #tpu.memory_space<vmem>>, vector<1x16x1xf32>,
    %c0_26 = arith.constant 0 : index
    %c0_27 = arith.constant 0 : index
    %c0_28 = arith.constant 0 : index
    %46 = vector.load %arg11[%c0_26, %c0_27, %c0_28] : memref<4x16x32xf32, #tpu.memory_space<vmem>>, vector<1x16x32xf32>
    %47 = vector.shape_cast %46 : vector<1x16x32xf32> to vector<16x32xf32>
    %48 = vector.broadcast %33 : vector<16x1xf32> to vector<16x32xf32>
    %49 = arith.mulf %48, %47 : vector<16x32xf32>
    %50 = arith.truncf %36 : vector<16x16xf32> to vector<16x16xbf16>
    %51 = vector.extract_strided_slice %19 {offsets = [0, 0, 0], sizes = [16, 1, 32], strides = [1, 1, 1]} : vector<16x4x32xbf16> to vector<16x1x32xbf16>
    %52 = vector.shape_cast %51 : vector<16x1x32xbf16> to vector<16x32xbf16>
    %cst_29 = arith.constant dense<0.000000e+00> : vector<16x32xf32>
    %53 = tpu.matmul %50, %52, %cst_29 {dimension_numbers = #tpu.dot_dimension_numbers<[1], [0], [0], [1], [0, 0, 1, 1], [], []>} : vector<16x16xbf16>, vector<16x32xbf16>, vector<16x32xf32> -> vector<16x32xf32>
    %54 = arith.addf %49, %53 : vector<16x32xf32>
    %c0_30 = arith.constant 0 : index
    %c0_31 = arith.constant 0 : index
    %c0_32 = arith.constant 0 : index
    %55 = vector.load %arg11[%c0_30, %c0_31, %c0_32] : memref<4x16x32xf32, #tpu.memory_space<vmem>>, vector<1x16x32xf32>
    %56 = vector.shape_cast %55 : vector<1x16x32xf32> to vector<16x32xf32>
    %57 = vector.shape_cast %54 : vector<16x32xf32> to vector<1x16x32xf32>
    tpu.vector_store %arg11[%c0_30, %c0_31, %c0_32], %57 {strides = array<i32>} : memref<4x16x32xf32, #tpu.memory_space<vmem>>, vector<1x16x32xf32>,
    %c0_33 = arith.constant 0 : index
    %c0_34 = arith.constant 0 : index
    %c0_35 = arith.constant 0 : index
    %58 = vector.load %arg9[%c0_33, %c0_34, %c0_35] : memref<4x16x1xf32, #tpu.memory_space<vmem>>, vector<1x16x1xf32>
    %59 = vector.shape_cast %58 : vector<1x16x1xf32> to vector<16x1xf32>
    %60 = vector.shape_cast %31 : vector<16x1xf32> to vector<1x16x1xf32>
    tpu.vector_store %arg9[%c0_33, %c0_34, %c0_35], %60 {strides = array<i32>} : memref<4x16x1xf32, #tpu.memory_space<vmem>>, vector<1x16x1xf32>,
    %c1 = arith.constant 1 : index
    %c0_36 = arith.constant 0 : index
    %c0_37 = arith.constant 0 : index
    %61 = vector.load %arg8[%c1, %c0_36, %c0_37] : memref<4x16x32xbf16, #tpu.memory_space<vmem>>, vector<1x16x32xbf16>
    %62 = vector.shape_cast %61 : vector<1x16x32xbf16> to vector<16x32xbf16>
    %63 = vector.extract_strided_slice %17 {offsets = [0, 1, 0], sizes = [16, 1, 32], strides = [1, 1, 1]} : vector<16x4x32xbf16> to vector<16x1x32xbf16>
    %64 = vector.shape_cast %63 : vector<16x1x32xbf16> to vector<16x32xbf16>
    %cst_38 = arith.constant dense<0.000000e+00> : vector<16x16xf32>
    %65 = tpu.matmul %62, %64, %cst_38 {dimension_numbers = #tpu.dot_dimension_numbers<[1], [1], [0], [0], [0, 0, 1, 0], [], []>} : vector<16x32xbf16>, vector<16x32xbf16>, vector<16x16xf32> -> vector<16x16xf32>
    %cst_39 = arith.constant -1.000000e+30 : f32
    %66 = vector.broadcast %cst_39 : f32 to vector<16x16xf32>
    %67 = arith.select %15, %65, %66 : vector<16x16xi1>, vector<16x16xf32>
    %c1_40 = arith.constant 1 : index
    %c0_41 = arith.constant 0 : index
    %c0_42 = arith.constant 0 : index
    %68 = vector.load %arg9[%c1_40, %c0_41, %c0_42] : memref<4x16x1xf32, #tpu.memory_space<vmem>>, vector<1x16x1xf32>
    %69 = vector.shape_cast %68 : vector<1x16x1xf32> to vector<16x1xf32>
    %cst_43 = arith.constant dense<0xFF800000> : vector<16xf32>
    %70 = vector.multi_reduction <maximumf>, %67, %cst_43 [1] : vector<16x16xf32> to vector<16xf32>
    %71 = vector.shape_cast %70 : vector<16xf32> to vector<16x1xf32>
    %72 = arith.maximumf %69, %71 : vector<16x1xf32>
    %73 = arith.subf %69, %72 : vector<16x1xf32>
    %74 = math.exp %73 : vector<16x1xf32>
    %75 = vector.broadcast %72 : vector<16x1xf32> to vector<16x16xf32>
    %76 = arith.subf %67, %75 : vector<16x16xf32>
    %77 = math.exp %76 : vector<16x16xf32>
    %c1_44 = arith.constant 1 : index
    %c0_45 = arith.constant 0 : index
    %c0_46 = arith.constant 0 : index
    %78 = vector.load %arg10[%c1_44, %c0_45, %c0_46] : memref<4x16x1xf32, #tpu.memory_space<vmem>>, vector<1x16x1xf32>
    %79 = vector.shape_cast %78 : vector<1x16x1xf32> to vector<16x1xf32>
    %80 = arith.mulf %74, %79 : vector<16x1xf32>
    %cst_47 = arith.constant dense<0.000000e+00> : vector<16xf32>
    %81 = vector.multi_reduction <add>, %77, %cst_47 [1] : vector<16x16xf32> to vector<16xf32>
    %82 = vector.shape_cast %81 : vector<16xf32> to vector<16x1xf32>
    %83 = arith.addf %80, %82 : vector<16x1xf32>
    %c1_48 = arith.constant 1 : index
    %c0_49 = arith.constant 0 : index
    %c0_50 = arith.constant 0 : index
    %84 = vector.load %arg10[%c1_48, %c0_49, %c0_50] : memref<4x16x1xf32, #tpu.memory_space<vmem>>, vector<1x16x1xf32>
    %85 = vector.shape_cast %84 : vector<1x16x1xf32> to vector<16x1xf32>
    %86 = vector.shape_cast %83 : vector<16x1xf32> to vector<1x16x1xf32>
    tpu.vector_store %arg10[%c1_48, %c0_49, %c0_50], %86 {strides = array<i32>} : memref<4x16x1xf32, #tpu.memory_space<vmem>>, vector<1x16x1xf32>,
    %c1_51 = arith.constant 1 : index
    %c0_52 = arith.constant 0 : index
    %c0_53 = arith.constant 0 : index
    %87 = vector.load %arg11[%c1_51, %c0_52, %c0_53] : memref<4x16x32xf32, #tpu.memory_space<vmem>>, vector<1x16x32xf32>
    %88 = vector.shape_cast %87 : vector<1x16x32xf32> to vector<16x32xf32>
    %89 = vector.broadcast %74 : vector<16x1xf32> to vector<16x32xf32>
    %90 = arith.mulf %89, %88 : vector<16x32xf32>
    %91 = arith.truncf %77 : vector<16x16xf32> to vector<16x16xbf16>
    %92 = vector.extract_strided_slice %19 {offsets = [0, 1, 0], sizes = [16, 1, 32], strides = [1, 1, 1]} : vector<16x4x32xbf16> to vector<16x1x32xbf16>
    %93 = vector.shape_cast %92 : vector<16x1x32xbf16> to vector<16x32xbf16>
    %cst_54 = arith.constant dense<0.000000e+00> : vector<16x32xf32>
    %94 = tpu.matmul %91, %93, %cst_54 {dimension_numbers = #tpu.dot_dimension_numbers<[1], [0], [0], [1], [0, 0, 1, 1], [], []>} : vector<16x16xbf16>, vector<16x32xbf16>, vector<16x32xf32> -> vector<16x32xf32>
    %95 = arith.addf %90, %94 : vector<16x32xf32>
    %c1_55 = arith.constant 1 : index
    %c0_56 = arith.constant 0 : index
    %c0_57 = arith.constant 0 : index
    %96 = vector.load %arg11[%c1_55, %c0_56, %c0_57] : memref<4x16x32xf32, #tpu.memory_space<vmem>>, vector<1x16x32xf32>
    %97 = vector.shape_cast %96 : vector<1x16x32xf32> to vector<16x32xf32>
    %98 = vector.shape_cast %95 : vector<16x32xf32> to vector<1x16x32xf32>
    tpu.vector_store %arg11[%c1_55, %c0_56, %c0_57], %98 {strides = array<i32>} : memref<4x16x32xf32, #tpu.memory_space<vmem>>, vector<1x16x32xf32>,
    %c1_58 = arith.constant 1 : index
    %c0_59 = arith.constant 0 : index
    %c0_60 = arith.constant 0 : index
    %99 = vector.load %arg9[%c1_58, %c0_59, %c0_60] : memref<4x16x1xf32, #tpu.memory_space<vmem>>, vector<1x16x1xf32>
    %100 = vector.shape_cast %99 : vector<1x16x1xf32> to vector<16x1xf32>
    %101 = vector.shape_cast %72 : vector<16x1xf32> to vector<1x16x1xf32>
    tpu.vector_store %arg9[%c1_58, %c0_59, %c0_60], %101 {strides = array<i32>} : memref<4x16x1xf32, #tpu.memory_space<vmem>>, vector<1x16x1xf32>,
    %c2 = arith.constant 2 : index
    %c0_61 = arith.constant 0 : index
    %c0_62 = arith.constant 0 : index
    %102 = vector.load %arg8[%c2, %c0_61, %c0_62] : memref<4x16x32xbf16, #tpu.memory_space<vmem>>, vector<1x16x32xbf16>
    %103 = vector.shape_cast %102 : vector<1x16x32xbf16> to vector<16x32xbf16>
    %104 = vector.extract_strided_slice %17 {offsets = [0, 2, 0], sizes = [16, 1, 32], strides = [1, 1, 1]} : vector<16x4x32xbf16> to vector<16x1x32xbf16>
    %105 = vector.shape_cast %104 : vector<16x1x32xbf16> to vector<16x32xbf16>
    %cst_63 = arith.constant dense<0.000000e+00> : vector<16x16xf32>
    %106 = tpu.matmul %103, %105, %cst_63 {dimension_numbers = #tpu.dot_dimension_numbers<[1], [1], [0], [0], [0, 0, 1, 0], [], []>} : vector<16x32xbf16>, vector<16x32xbf16>, vector<16x16xf32> -> vector<16x16xf32>
    %cst_64 = arith.constant -1.000000e+30 : f32
    %107 = vector.broadcast %cst_64 : f32 to vector<16x16xf32>
    %108 = arith.select %15, %106, %107 : vector<16x16xi1>, vector<16x16xf32>
    %c2_65 = arith.constant 2 : index
    %c0_66 = arith.constant 0 : index
    %c0_67 = arith.constant 0 : index
    %109 = vector.load %arg9[%c2_65, %c0_66, %c0_67] : memref<4x16x1xf32, #tpu.memory_space<vmem>>, vector<1x16x1xf32>
    %110 = vector.shape_cast %109 : vector<1x16x1xf32> to vector<16x1xf32>
    %cst_68 = arith.constant dense<0xFF800000> : vector<16xf32>
    %111 = vector.multi_reduction <maximumf>, %108, %cst_68 [1] : vector<16x16xf32> to vector<16xf32>
    %112 = vector.shape_cast %111 : vector<16xf32> to vector<16x1xf32>
    %113 = arith.maximumf %110, %112 : vector<16x1xf32>
    %114 = arith.subf %110, %113 : vector<16x1xf32>
    %115 = math.exp %114 : vector<16x1xf32>
    %116 = vector.broadcast %113 : vector<16x1xf32> to vector<16x16xf32>
    %117 = arith.subf %108, %116 : vector<16x16xf32>
    %118 = math.exp %117 : vector<16x16xf32>
    %c2_69 = arith.constant 2 : index
    %c0_70 = arith.constant 0 : index
    %c0_71 = arith.constant 0 : index
    %119 = vector.load %arg10[%c2_69, %c0_70, %c0_71] : memref<4x16x1xf32, #tpu.memory_space<vmem>>, vector<1x16x1xf32>
    %120 = vector.shape_cast %119 : vector<1x16x1xf32> to vector<16x1xf32>
    %121 = arith.mulf %115, %120 : vector<16x1xf32>
    %cst_72 = arith.constant dense<0.000000e+00> : vector<16xf32>
    %122 = vector.multi_reduction <add>, %118, %cst_72 [1] : vector<16x16xf32> to vector<16xf32>
    %123 = vector.shape_cast %122 : vector<16xf32> to vector<16x1xf32>
    %124 = arith.addf %121, %123 : vector<16x1xf32>
    %c2_73 = arith.constant 2 : index
    %c0_74 = arith.constant 0 : index
    %c0_75 = arith.constant 0 : index
    %125 = vector.load %arg10[%c2_73, %c0_74, %c0_75] : memref<4x16x1xf32, #tpu.memory_space<vmem>>, vector<1x16x1xf32>
    %126 = vector.shape_cast %125 : vector<1x16x1xf32> to vector<16x1xf32>
    %127 = vector.shape_cast %124 : vector<16x1xf32> to vector<1x16x1xf32>
    tpu.vector_store %arg10[%c2_73, %c0_74, %c0_75], %127 {strides = array<i32>} : memref<4x16x1xf32, #tpu.memory_space<vmem>>, vector<1x16x1xf32>,
    %c2_76 = arith.constant 2 : index
    %c0_77 = arith.constant 0 : index
    %c0_78 = arith.constant 0 : index
    %128 = vector.load %arg11[%c2_76, %c0_77, %c0_78] : memref<4x16x32xf32, #tpu.memory_space<vmem>>, vector<1x16x32xf32>
    %129 = vector.shape_cast %128 : vector<1x16x32xf32> to vector<16x32xf32>
    %130 = vector.broadcast %115 : vector<16x1xf32> to vector<16x32xf32>
    %131 = arith.mulf %130, %129 : vector<16x32xf32>
    %132 = arith.truncf %118 : vector<16x16xf32> to vector<16x16xbf16>
    %133 = vector.extract_strided_slice %19 {offsets = [0, 2, 0], sizes = [16, 1, 32], strides = [1, 1, 1]} : vector<16x4x32xbf16> to vector<16x1x32xbf16>
    %134 = vector.shape_cast %133 : vector<16x1x32xbf16> to vector<16x32xbf16>
    %cst_79 = arith.constant dense<0.000000e+00> : vector<16x32xf32>
    %135 = tpu.matmul %132, %134, %cst_79 {dimension_numbers = #tpu.dot_dimension_numbers<[1], [0], [0], [1], [0, 0, 1, 1], [], []>} : vector<16x16xbf16>, vector<16x32xbf16>, vector<16x32xf32> -> vector<16x32xf32>
    %136 = arith.addf %131, %135 : vector<16x32xf32>
    %c2_80 = arith.constant 2 : index
    %c0_81 = arith.constant 0 : index
    %c0_82 = arith.constant 0 : index
    %137 = vector.load %arg11[%c2_80, %c0_81, %c0_82] : memref<4x16x32xf32, #tpu.memory_space<vmem>>, vector<1x16x32xf32>
    %138 = vector.shape_cast %137 : vector<1x16x32xf32> to vector<16x32xf32>
    %139 = vector.shape_cast %136 : vector<16x32xf32> to vector<1x16x32xf32>
    tpu.vector_store %arg11[%c2_80, %c0_81, %c0_82], %139 {strides = array<i32>} : memref<4x16x32xf32, #tpu.memory_space<vmem>>, vector<1x16x32xf32>,
    %c2_83 = arith.constant 2 : index
    %c0_84 = arith.constant 0 : index
    %c0_85 = arith.constant 0 : index
    %140 = vector.load %arg9[%c2_83, %c0_84, %c0_85] : memref<4x16x1xf32, #tpu.memory_space<vmem>>, vector<1x16x1xf32>
    %141 = vector.shape_cast %140 : vector<1x16x1xf32> to vector<16x1xf32>
    %142 = vector.shape_cast %113 : vector<16x1xf32> to vector<1x16x1xf32>
    tpu.vector_store %arg9[%c2_83, %c0_84, %c0_85], %142 {strides = array<i32>} : memref<4x16x1xf32, #tpu.memory_space<vmem>>, vector<1x16x1xf32>,
    %c3 = arith.constant 3 : index
    %c0_86 = arith.constant 0 : index
    %c0_87 = arith.constant 0 : index
    %143 = vector.load %arg8[%c3, %c0_86, %c0_87] : memref<4x16x32xbf16, #tpu.memory_space<vmem>>, vector<1x16x32xbf16>
    %144 = vector.shape_cast %143 : vector<1x16x32xbf16> to vector<16x32xbf16>
    %145 = vector.extract_strided_slice %17 {offsets = [0, 3, 0], sizes = [16, 1, 32], strides = [1, 1, 1]} : vector<16x4x32xbf16> to vector<16x1x32xbf16>
    %146 = vector.shape_cast %145 : vector<16x1x32xbf16> to vector<16x32xbf16>
    %cst_88 = arith.constant dense<0.000000e+00> : vector<16x16xf32>
    %147 = tpu.matmul %144, %146, %cst_88 {dimension_numbers = #tpu.dot_dimension_numbers<[1], [1], [0], [0], [0, 0, 1, 0], [], []>} : vector<16x32xbf16>, vector<16x32xbf16>, vector<16x16xf32> -> vector<16x16xf32>
    %cst_89 = arith.constant -1.000000e+30 : f32
    %148 = vector.broadcast %cst_89 : f32 to vector<16x16xf32>
    %149 = arith.select %15, %147, %148 : vector<16x16xi1>, vector<16x16xf32>
    %c3_90 = arith.constant 3 : index
    %c0_91 = arith.constant 0 : index
    %c0_92 = arith.constant 0 : index
    %150 = vector.load %arg9[%c3_90, %c0_91, %c0_92] : memref<4x16x1xf32, #tpu.memory_space<vmem>>, vector<1x16x1xf32>
    %151 = vector.shape_cast %150 : vector<1x16x1xf32> to vector<16x1xf32>
    %cst_93 = arith.constant dense<0xFF800000> : vector<16xf32>
    %152 = vector.multi_reduction <maximumf>, %149, %cst_93 [1] : vector<16x16xf32> to vector<16xf32>
    %153 = vector.shape_cast %152 : vector<16xf32> to vector<16x1xf32>
    %154 = arith.maximumf %151, %153 : vector<16x1xf32>
    %155 = arith.subf %151, %154 : vector<16x1xf32>
    %156 = math.exp %155 : vector<16x1xf32>
    %157 = vector.broadcast %154 : vector<16x1xf32> to vector<16x16xf32>
    %158 = arith.subf %149, %157 : vector<16x16xf32>
    %159 = math.exp %158 : vector<16x16xf32>
    %c3_94 = arith.constant 3 : index
    %c0_95 = arith.constant 0 : index
    %c0_96 = arith.constant 0 : index
    %160 = vector.load %arg10[%c3_94, %c0_95, %c0_96] : memref<4x16x1xf32, #tpu.memory_space<vmem>>, vector<1x16x1xf32>
    %161 = vector.shape_cast %160 : vector<1x16x1xf32> to vector<16x1xf32>
    %162 = arith.mulf %156, %161 : vector<16x1xf32>
    %cst_97 = arith.constant dense<0.000000e+00> : vector<16xf32>
    %163 = vector.multi_reduction <add>, %159, %cst_97 [1] : vector<16x16xf32> to vector<16xf32>
    %164 = vector.shape_cast %163 : vector<16xf32> to vector<16x1xf32>
    %165 = arith.addf %162, %164 : vector<16x1xf32>
    %c3_98 = arith.constant 3 : index
    %c0_99 = arith.constant 0 : index
    %c0_100 = arith.constant 0 : index
    %166 = vector.load %arg10[%c3_98, %c0_99, %c0_100] : memref<4x16x1xf32, #tpu.memory_space<vmem>>, vector<1x16x1xf32>
    %167 = vector.shape_cast %166 : vector<1x16x1xf32> to vector<16x1xf32>
    %168 = vector.shape_cast %165 : vector<16x1xf32> to vector<1x16x1xf32>
    tpu.vector_store %arg10[%c3_98, %c0_99, %c0_100], %168 {strides = array<i32>} : memref<4x16x1xf32, #tpu.memory_space<vmem>>, vector<1x16x1xf32>,
    %c3_101 = arith.constant 3 : index
    %c0_102 = arith.constant 0 : index
    %c0_103 = arith.constant 0 : index
    %169 = vector.load %arg11[%c3_101, %c0_102, %c0_103] : memref<4x16x32xf32, #tpu.memory_space<vmem>>, vector<1x16x32xf32>
    %170 = vector.shape_cast %169 : vector<1x16x32xf32> to vector<16x32xf32>
    %171 = vector.broadcast %156 : vector<16x1xf32> to vector<16x32xf32>
    %172 = arith.mulf %171, %170 : vector<16x32xf32>
    %173 = arith.truncf %159 : vector<16x16xf32> to vector<16x16xbf16>
    %174 = vector.extract_strided_slice %19 {offsets = [0, 3, 0], sizes = [16, 1, 32], strides = [1, 1, 1]} : vector<16x4x32xbf16> to vector<16x1x32xbf16>
    %175 = vector.shape_cast %174 : vector<16x1x32xbf16> to vector<16x32xbf16>
    %cst_104 = arith.constant dense<0.000000e+00> : vector<16x32xf32>
    %176 = tpu.matmul %173, %175, %cst_104 {dimension_numbers = #tpu.dot_dimension_numbers<[1], [0], [0], [1], [0, 0, 1, 1], [], []>} : vector<16x16xbf16>, vector<16x32xbf16>, vector<16x32xf32> -> vector<16x32xf32>
    %177 = arith.addf %172, %176 : vector<16x32xf32>
    %c3_105 = arith.constant 3 : index
    %c0_106 = arith.constant 0 : index
    %c0_107 = arith.constant 0 : index
    %178 = vector.load %arg11[%c3_105, %c0_106, %c0_107] : memref<4x16x32xf32, #tpu.memory_space<vmem>>, vector<1x16x32xf32>
    %179 = vector.shape_cast %178 : vector<1x16x32xf32> to vector<16x32xf32>
    %180 = vector.shape_cast %177 : vector<16x32xf32> to vector<1x16x32xf32>
    tpu.vector_store %arg11[%c3_105, %c0_106, %c0_107], %180 {strides = array<i32>} : memref<4x16x32xf32, #tpu.memory_space<vmem>>, vector<1x16x32xf32>,
    %c3_108 = arith.constant 3 : index
    %c0_109 = arith.constant 0 : index
    %c0_110 = arith.constant 0 : index
    %181 = vector.load %arg9[%c3_108, %c0_109, %c0_110] : memref<4x16x1xf32, #tpu.memory_space<vmem>>, vector<1x16x1xf32>
    %182 = vector.shape_cast %181 : vector<1x16x1xf32> to vector<16x1xf32>
    %183 = vector.shape_cast %154 : vector<16x1xf32> to vector<1x16x1xf32>
    tpu.vector_store %arg9[%c3_108, %c0_109, %c0_110], %183 {strides = array<i32>} : memref<4x16x1xf32, #tpu.memory_space<vmem>>, vector<1x16x1xf32>,
    %184 = arith.cmpi eq, %3, %1 : i32
    %185 = arith.extui %184 : i1 to i32
    %c0_i32_111 = arith.constant 0 : i32
    %186 = arith.cmpi ne, %185, %c0_i32_111 : i32
    scf.if %186 {
      %c0_112 = arith.constant 0 : index
      %c0_113 = arith.constant 0 : index
      %c0_114 = arith.constant 0 : index
      %187 = vector.load %arg10[%c0_112, %c0_113, %c0_114] : memref<4x16x1xf32, #tpu.memory_space<vmem>>, vector<1x16x1xf32>
      %188 = vector.shape_cast %187 : vector<1x16x1xf32> to vector<16x1xf32>
      %189 = tpu.reciprocal %188 {approx = true} : vector<16x1xf32> -> vector<16x1xf32>
      %c0_115 = arith.constant 0 : index
      %c0_116 = arith.constant 0 : index
      %c0_117 = arith.constant 0 : index
      %190 = vector.load %arg11[%c0_115, %c0_116, %c0_117] : memref<4x16x32xf32, #tpu.memory_space<vmem>>, vector<1x16x32xf32>
      %191 = vector.shape_cast %190 : vector<1x16x32xf32> to vector<16x32xf32>
      %192 = vector.broadcast %189 : vector<16x1xf32> to vector<16x32xf32>
      %193 = arith.mulf %191, %192 : vector<16x32xf32>
      %194 = arith.truncf %193 : vector<16x32xf32> to vector<16x32xbf16>
      %c0_118 = arith.constant 0 : index
      %c0_119 = arith.constant 0 : index
      %c0_120 = arith.constant 0 : index
      %195 = vector.load %arg7[%c0_118, %c0_119, %c0_120] : memref<1x16x128xbf16, #tpu.memory_space<vmem>>, vector<1x16x32xbf16>
      %196 = vector.shape_cast %195 : vector<1x16x32xbf16> to vector<16x32xbf16>
      %197 = vector.shape_cast %194 : vector<16x32xbf16> to vector<1x16x32xbf16>
      tpu.vector_store %arg7[%c0_118, %c0_119, %c0_120], %197 {strides = array<i32>} : memref<1x16x128xbf16, #tpu.memory_space<vmem>>, vector<1x16x32xbf16>,
      %c1_121 = arith.constant 1 : index
      %c0_122 = arith.constant 0 : index
      %c0_123 = arith.constant 0 : index
      %198 = vector.load %arg10[%c1_121, %c0_122, %c0_123] : memref<4x16x1xf32, #tpu.memory_space<vmem>>, vector<1x16x1xf32>
      %199 = vector.shape_cast %198 : vector<1x16x1xf32> to vector<16x1xf32>
      %200 = tpu.reciprocal %199 {approx = true} : vector<16x1xf32> -> vector<16x1xf32>
      %c1_124 = arith.constant 1 : index
      %c0_125 = arith.constant 0 : index
      %c0_126 = arith.constant 0 : index
      %201 = vector.load %arg11[%c1_124, %c0_125, %c0_126] : memref<4x16x32xf32, #tpu.memory_space<vmem>>, vector<1x16x32xf32>
      %202 = vector.shape_cast %201 : vector<1x16x32xf32> to vector<16x32xf32>
      %203 = vector.broadcast %200 : vector<16x1xf32> to vector<16x32xf32>
      %204 = arith.mulf %202, %203 : vector<16x32xf32>
      %205 = arith.truncf %204 : vector<16x32xf32> to vector<16x32xbf16>
      %c0_127 = arith.constant 0 : index
      %c0_128 = arith.constant 0 : index
      %c32 = arith.constant 32 : index
      %206 = vector.load %arg7[%c0_127, %c0_128, %c32] : memref<1x16x128xbf16, #tpu.memory_space<vmem>>, vector<1x16x32xbf16>
      %207 = vector.shape_cast %206 : vector<1x16x32xbf16> to vector<16x32xbf16>
      %208 = vector.shape_cast %205 : vector<16x32xbf16> to vector<1x16x32xbf16>
      tpu.vector_store %arg7[%c0_127, %c0_128, %c32], %208 {strides = array<i32>} : memref<1x16x128xbf16, #tpu.memory_space<vmem>>, vector<1x16x32xbf16>,
      %c2_129 = arith.constant 2 : index
      %c0_130 = arith.constant 0 : index
      %c0_131 = arith.constant 0 : index
      %209 = vector.load %arg10[%c2_129, %c0_130, %c0_131] : memref<4x16x1xf32, #tpu.memory_space<vmem>>, vector<1x16x1xf32>
      %210 = vector.shape_cast %209 : vector<1x16x1xf32> to vector<16x1xf32>
      %211 = tpu.reciprocal %210 {approx = true} : vector<16x1xf32> -> vector<16x1xf32>
      %c2_132 = arith.constant 2 : index
      %c0_133 = arith.constant 0 : index
      %c0_134 = arith.constant 0 : index
      %212 = vector.load %arg11[%c2_132, %c0_133, %c0_134] : memref<4x16x32xf32, #tpu.memory_space<vmem>>, vector<1x16x32xf32>
      %213 = vector.shape_cast %212 : vector<1x16x32xf32> to vector<16x32xf32>
      %214 = vector.broadcast %211 : vector<16x1xf32> to vector<16x32xf32>
      %215 = arith.mulf %213, %214 : vector<16x32xf32>
      %216 = arith.truncf %215 : vector<16x32xf32> to vector<16x32xbf16>
      %c0_135 = arith.constant 0 : index
      %c0_136 = arith.constant 0 : index
      %c64 = arith.constant 64 : index
      %217 = vector.load %arg7[%c0_135, %c0_136, %c64] : memref<1x16x128xbf16, #tpu.memory_space<vmem>>, vector<1x16x32xbf16>
      %218 = vector.shape_cast %217 : vector<1x16x32xbf16> to vector<16x32xbf16>
      %219 = vector.shape_cast %216 : vector<16x32xbf16> to vector<1x16x32xbf16>
      tpu.vector_store %arg7[%c0_135, %c0_136, %c64], %219 {strides = array<i32>} : memref<1x16x128xbf16, #tpu.memory_space<vmem>>, vector<1x16x32xbf16>,
      %c3_137 = arith.constant 3 : index
      %c0_138 = arith.constant 0 : index
      %c0_139 = arith.constant 0 : index
      %220 = vector.load %arg10[%c3_137, %c0_138, %c0_139] : memref<4x16x1xf32, #tpu.memory_space<vmem>>, vector<1x16x1xf32>
      %221 = vector.shape_cast %220 : vector<1x16x1xf32> to vector<16x1xf32>
      %222 = tpu.reciprocal %221 {approx = true} : vector<16x1xf32> -> vector<16x1xf32>
      %c3_140 = arith.constant 3 : index
      %c0_141 = arith.constant 0 : index
      %c0_142 = arith.constant 0 : index
      %223 = vector.load %arg11[%c3_140, %c0_141, %c0_142] : memref<4x16x32xf32, #tpu.memory_space<vmem>>, vector<1x16x32xf32>
      %224 = vector.shape_cast %223 : vector<1x16x32xf32> to vector<16x32xf32>
      %225 = vector.broadcast %222 : vector<16x1xf32> to vector<16x32xf32>
      %226 = arith.mulf %224, %225 : vector<16x32xf32>
      %227 = arith.truncf %226 : vector<16x32xf32> to vector<16x32xbf16>
      %c0_143 = arith.constant 0 : index
      %c0_144 = arith.constant 0 : index
      %c96 = arith.constant 96 : index
      %228 = vector.load %arg7[%c0_143, %c0_144, %c96] : memref<1x16x128xbf16, #tpu.memory_space<vmem>>, vector<1x16x32xbf16>
      %229 = vector.shape_cast %228 : vector<1x16x32xbf16> to vector<16x32xbf16>
      %230 = vector.shape_cast %227 : vector<16x32xbf16> to vector<1x16x32xbf16>
      tpu.vector_store %arg7[%c0_143, %c0_144, %c96], %230 {strides = array<i32>} : memref<1x16x128xbf16, #tpu.memory_space<vmem>>, vector<1x16x32xbf16>,
    } else {
    }
    return
  }
  func.func @transform_0(%arg0: i32, %arg1: i32, %arg2: memref<1xi32, #tpu.memory_space<smem>>, %arg3: memref<1xi32, #tpu.memory_space<smem>>) -> (i32, i32, i32, i32, i32) {
    %0 = arith.index_cast %arg1 : i32 to index
    %1 = memref.load %arg2[%0] : memref<1xi32, #tpu.memory_space<smem>>
    %c0_i32 = arith.constant 0 : i32
    %c0_i32_0 = arith.constant 0 : i32
    %c0_i32_1 = arith.constant 0 : i32
    %c0_i32_2 = arith.constant 0 : i32
    return %arg0, %1, %c0_i32, %c0_i32_0, %c0_i32_1 : i32, i32, i32, i32, i32
  }
  func.func @transform_1(%arg0: i32, %arg1: i32, %arg2: memref<1xi32, #tpu.memory_space<smem>>, %arg3: memref<1xi32, #tpu.memory_space<smem>>) -> (i32, i32, i32, i32, i32) {
    %0 = arith.index_cast %arg1 : i32 to index
    %1 = memref.load %arg3[%0] : memref<1xi32, #tpu.memory_space<smem>>
    %c1_i32 = arith.constant 1 : i32
    %c0_i32 = arith.constant 0 : i32
    %c0_i32_0 = arith.constant 0 : i32
    %c0_i32_1 = arith.constant 0 : i32
    return %arg0, %1, %c1_i32, %c0_i32, %c0_i32_0 : i32, i32, i32, i32, i32
  }
  func.func @transform_2(%arg0: i32, %arg1: i32, %arg2: memref<1xi32, #tpu.memory_space<smem>>, %arg3: memref<1xi32, #tpu.memory_space<smem>>) -> (i32, i32, i32, i32, i32) {
    %0 = arith.index_cast %arg1 : i32 to index
    %1 = memref.load %arg3[%0] : memref<1xi32, #tpu.memory_space<smem>>
    %c2_i32 = arith.constant 2 : i32
    %c0_i32 = arith.constant 0 : i32
    %c0_i32_0 = arith.constant 0 : i32
    %c0_i32_1 = arith.constant 0 : i32
    return %arg0, %1, %c2_i32, %c0_i32, %c0_i32_0 : i32, i32, i32, i32, i32
  }
  func.func @transform_3(%arg0: i32, %arg1: i32, %arg2: memref<1xi32, #tpu.memory_space<smem>>, %arg3: memref<1xi32, #tpu.memory_space<smem>>) -> (i32, i32, i32) {
    %0 = arith.index_cast %arg1 : i32 to index
    %1 = memref.load %arg2[%0] : memref<1xi32, #tpu.memory_space<smem>>
    %c0_i32 = arith.constant 0 : i32
    %c0_i32_0 = arith.constant 0 : i32
    return %arg0, %1, %c0_i32 : i32, i32, i32
  }
}

module attributes {stable_mosaic.version = 11 : i64} {
  func.func @_matmul_k1_kernel(%arg0: i32, %arg1: i32, %arg2: memref<32x128xbf16, #tpu.memory_space<vmem>>, %arg3: memref<128x128xbf16, #tpu.memory_space<vmem>>, %arg4: memref<1x128xf32, #tpu.memory_space<vmem>>, %arg5: memref<32x128xf32, #tpu.memory_space<vmem>>, %arg6: memref<32x128xf32, #tpu.memory_space<vmem>>) attributes {dimension_semantics = [#tpu.dimension_semantics<parallel>, #tpu.dimension_semantics<parallel>], iteration_bounds = array<i64: 1, 1>, scalar_prefetch = 0 : i64, scratch_operands = 0 : i64, tpu.core_type = #tpu.core_type<tc>, window_params = [{transform_indices = @transform_0, window_bounds = array<i64: 32, 128>}, {transform_indices = @transform_1, window_bounds = array<i64: 128, 128>}, {transform_indices = @transform_2, window_bounds = array<i64: 1, 128>}, {transform_indices = @transform_3, window_bounds = array<i64: 32, 128>}, {transform_indices = @transform_4, window_bounds = array<i64: 32, 128>}]} {
    %c0 = arith.constant 0 : index
    %c0_0 = arith.constant 0 : index
    %0 = vector.load %arg2[%c0, %c0_0] : memref<32x128xbf16, #tpu.memory_space<vmem>>, vector<32x128xbf16>
    %c0_1 = arith.constant 0 : index
    %c0_2 = arith.constant 0 : index
    %1 = vector.load %arg3[%c0_1, %c0_2] : memref<128x128xbf16, #tpu.memory_space<vmem>>, vector<128x128xbf16>
    %cst = arith.constant dense<0.000000e+00> : vector<32x128xf32>
    %2 = tpu.matmul %0, %1, %cst {dimension_numbers = #tpu.dot_dimension_numbers<[1], [0], [0], [1], [0, 0, 1, 1], [], []>} : vector<32x128xbf16>, vector<128x128xbf16>, vector<32x128xf32> -> vector<32x128xf32>
    %c0_3 = arith.constant 0 : index
    %c0_4 = arith.constant 0 : index
    %3 = vector.load %arg4[%c0_3, %c0_4] : memref<1x128xf32, #tpu.memory_space<vmem>>, vector<1x128xf32>
    %4 = vector.broadcast %3 : vector<1x128xf32> to vector<32x128xf32>
    %5 = arith.addf %2, %4 : vector<32x128xf32>
    %c0_5 = arith.constant 0 : index
    %c0_6 = arith.constant 0 : index
    %6 = vector.load %arg5[%c0_5, %c0_6] : memref<32x128xf32, #tpu.memory_space<vmem>>, vector<32x128xf32>
    %7 = arith.addf %5, %6 : vector<32x128xf32>
    %c0_7 = arith.constant 0 : index
    %c0_8 = arith.constant 0 : index
    %8 = vector.load %arg6[%c0_7, %c0_8] : memref<32x128xf32, #tpu.memory_space<vmem>>, vector<32x128xf32>
    tpu.vector_store %arg6[%c0_7, %c0_8], %7 {strides = array<i32>} : memref<32x128xf32, #tpu.memory_space<vmem>>, vector<32x128xf32>,
    return
  }
  func.func @transform_0(%arg0: i32, %arg1: i32) -> (i32, i32) {
    %c0_i32 = arith.constant 0 : i32
    %c0_i32_0 = arith.constant 0 : i32
    return %arg0, %c0_i32 : i32, i32
  }
  func.func @transform_1(%arg0: i32, %arg1: i32) -> (i32, i32) {
    %c0_i32 = arith.constant 0 : i32
    %c0_i32_0 = arith.constant 0 : i32
    return %c0_i32, %arg1 : i32, i32
  }
  func.func @transform_2(%arg0: i32, %arg1: i32) -> (i32, i32) {
    %c0_i32 = arith.constant 0 : i32
    %c0_i32_0 = arith.constant 0 : i32
    return %c0_i32, %arg1 : i32, i32
  }
  func.func @transform_3(%arg0: i32, %arg1: i32) -> (i32, i32) {
    %c0_i32 = arith.constant 0 : i32
    return %arg0, %arg1 : i32, i32
  }
  func.func @transform_4(%arg0: i32, %arg1: i32) -> (i32, i32) {
    %c0_i32 = arith.constant 0 : i32
    return %arg0, %arg1 : i32, i32
  }
}

module attributes {stable_mosaic.version = 11 : i64} {
  func.func @_ln_matmul_kernel(%arg0: i32, %arg1: i32, %arg2: memref<32x128xf32, #tpu.memory_space<vmem>>, %arg3: memref<1x128xf32, #tpu.memory_space<vmem>>, %arg4: memref<1x128xf32, #tpu.memory_space<vmem>>, %arg5: memref<128x256xbf16, #tpu.memory_space<vmem>>, %arg6: memref<1x256xf32, #tpu.memory_space<vmem>>, %arg7: memref<32x256xbf16, #tpu.memory_space<vmem>>, %arg8: memref<32x128xbf16, #tpu.memory_space<vmem>>) attributes {dimension_semantics = [#tpu.dimension_semantics<parallel>, #tpu.dimension_semantics<arbitrary>], iteration_bounds = array<i64: 1, 2>, scalar_prefetch = 0 : i64, scratch_operands = 1 : i64, tpu.core_type = #tpu.core_type<tc>, window_params = [{transform_indices = @transform_0, window_bounds = array<i64: 32, 128>}, {pipeline_mode = #tpu.pipeline_mode<synchronous>, transform_indices = @transform_1, window_bounds = array<i64: 1, 128>}, {pipeline_mode = #tpu.pipeline_mode<synchronous>, transform_indices = @transform_2, window_bounds = array<i64: 1, 128>}, {transform_indices = @transform_3, window_bounds = array<i64: 128, 256>}, {transform_indices = @transform_4, window_bounds = array<i64: 1, 256>}, {transform_indices = @transform_5, window_bounds = array<i64: 32, 256>}]} {
    %c0_i32 = arith.constant 0 : i32
    %0 = arith.cmpi eq, %arg1, %c0_i32 : i32
    %1 = arith.extui %0 : i1 to i32
    %c0_i32_0 = arith.constant 0 : i32
    %2 = arith.cmpi ne, %1, %c0_i32_0 : i32
    scf.if %2 {
      %c0_12 = arith.constant 0 : index
      %c0_13 = arith.constant 0 : index
      %24 = vector.load %arg2[%c0_12, %c0_13] : memref<32x128xf32, #tpu.memory_space<vmem>>, vector<32x128xf32>
      %cst_14 = arith.constant dense<0.000000e+00> : vector<32xf32>
      %25 = vector.multi_reduction <add>, %24, %cst_14 [1] : vector<32x128xf32> to vector<32xf32>
      %26 = vector.shape_cast %25 : vector<32xf32> to vector<32x1xf32>
      %cst_15 = arith.constant 1.280000e+02 : f32
      %27 = vector.broadcast %cst_15 : f32 to vector<32x1xf32>
      %28 = arith.divf %26, %27 : vector<32x1xf32>
      %29 = vector.broadcast %28 : vector<32x1xf32> to vector<32x128xf32>
      %30 = arith.subf %24, %29 : vector<32x128xf32>
      %31 = arith.mulf %30, %30 : vector<32x128xf32>
      %cst_16 = arith.constant dense<0.000000e+00> : vector<32xf32>
      %32 = vector.multi_reduction <add>, %31, %cst_16 [1] : vector<32x128xf32> to vector<32xf32>
      %33 = vector.shape_cast %32 : vector<32xf32> to vector<32x1xf32>
      %cst_17 = arith.constant 1.280000e+02 : f32
      %34 = vector.broadcast %cst_17 : f32 to vector<32x1xf32>
      %35 = arith.divf %33, %34 : vector<32x1xf32>
      %cst_18 = arith.constant 9.99999974E-6 : f32
      %36 = vector.broadcast %cst_18 : f32 to vector<32x1xf32>
      %37 = arith.addf %35, %36 : vector<32x1xf32>
      %38 = math.rsqrt %37 : vector<32x1xf32>
      %39 = vector.broadcast %38 : vector<32x1xf32> to vector<32x128xf32>
      %40 = arith.mulf %30, %39 : vector<32x128xf32>
      %c0_19 = arith.constant 0 : index
      %c0_20 = arith.constant 0 : index
      %41 = vector.load %arg3[%c0_19, %c0_20] : memref<1x128xf32, #tpu.memory_space<vmem>>, vector<1x128xf32>
      %42 = vector.broadcast %41 : vector<1x128xf32> to vector<32x128xf32>
      %43 = arith.mulf %40, %42 : vector<32x128xf32>
      %c0_21 = arith.constant 0 : index
      %c0_22 = arith.constant 0 : index
      %44 = vector.load %arg4[%c0_21, %c0_22] : memref<1x128xf32, #tpu.memory_space<vmem>>, vector<1x128xf32>
      %45 = vector.broadcast %44 : vector<1x128xf32> to vector<32x128xf32>
      %46 = arith.addf %43, %45 : vector<32x128xf32>
      %47 = arith.truncf %46 : vector<32x128xf32> to vector<32x128xbf16>
      %c0_23 = arith.constant 0 : index
      %c0_24 = arith.constant 0 : index
      %48 = vector.load %arg8[%c0_23, %c0_24] : memref<32x128xbf16, #tpu.memory_space<vmem>>, vector<32x128xbf16>
      tpu.vector_store %arg8[%c0_23, %c0_24], %47 {strides = array<i32>} : memref<32x128xbf16, #tpu.memory_space<vmem>>, vector<32x128xbf16>,
    } else {
    }
    %c0 = arith.constant 0 : index
    %c0_1 = arith.constant 0 : index
    %3 = vector.load %arg8[%c0, %c0_1] : memref<32x128xbf16, #tpu.memory_space<vmem>>, vector<32x128xbf16>
    %c0_2 = arith.constant 0 : index
    %c0_3 = arith.constant 0 : index
    %4 = vector.load %arg5[%c0_2, %c0_3] : memref<128x256xbf16, #tpu.memory_space<vmem>>, vector<128x256xbf16>
    %cst = arith.constant dense<0.000000e+00> : vector<32x256xf32>
    %5 = tpu.matmul %3, %4, %cst {dimension_numbers = #tpu.dot_dimension_numbers<[1], [0], [0], [1], [0, 0, 1, 1], [], []>} : vector<32x128xbf16>, vector<128x256xbf16>, vector<32x256xf32> -> vector<32x256xf32>
    %c0_4 = arith.constant 0 : index
    %c0_5 = arith.constant 0 : index
    %6 = vector.load %arg6[%c0_4, %c0_5] : memref<1x256xf32, #tpu.memory_space<vmem>>, vector<1x256xf32>
    %7 = vector.broadcast %6 : vector<1x256xf32> to vector<32x256xf32>
    %8 = arith.addf %5, %7 : vector<32x256xf32>
    %cst_6 = arith.constant 5.000000e-01 : f32
    %9 = vector.broadcast %cst_6 : f32 to vector<32x256xf32>
    %10 = arith.mulf %9, %8 : vector<32x256xf32>
    %cst_7 = arith.constant 4.471500e-02 : f32
    %11 = vector.broadcast %cst_7 : f32 to vector<32x256xf32>
    %12 = arith.mulf %11, %8 : vector<32x256xf32>
    %13 = arith.mulf %12, %8 : vector<32x256xf32>
    %14 = arith.mulf %13, %8 : vector<32x256xf32>
    %15 = arith.addf %8, %14 : vector<32x256xf32>
    %cst_8 = arith.constant 0.797884583 : f32
    %16 = vector.broadcast %cst_8 : f32 to vector<32x256xf32>
    %17 = arith.mulf %16, %15 : vector<32x256xf32>
    %18 = math.tanh %17 : vector<32x256xf32>
    %cst_9 = arith.constant 1.000000e+00 : f32
    %19 = vector.broadcast %cst_9 : f32 to vector<32x256xf32>
    %20 = arith.addf %19, %18 : vector<32x256xf32>
    %21 = arith.mulf %10, %20 : vector<32x256xf32>
    %22 = arith.truncf %21 : vector<32x256xf32> to vector<32x256xbf16>
    %c0_10 = arith.constant 0 : index
    %c0_11 = arith.constant 0 : index
    %23 = vector.load %arg7[%c0_10, %c0_11] : memref<32x256xbf16, #tpu.memory_space<vmem>>, vector<32x256xbf16>
    tpu.vector_store %arg7[%c0_10, %c0_11], %22 {strides = array<i32>} : memref<32x256xbf16, #tpu.memory_space<vmem>>, vector<32x256xbf16>,
    return
  }
  func.func @transform_0(%arg0: i32, %arg1: i32) -> (i32, i32) {
    %c0_i32 = arith.constant 0 : i32
    %c0_i32_0 = arith.constant 0 : i32
    return %arg0, %c0_i32 : i32, i32
  }
  func.func @transform_1(%arg0: i32, %arg1: i32) -> (i32, i32) {
    %c0_i32 = arith.constant 0 : i32
    %c0_i32_0 = arith.constant 0 : i32
    %c0_i32_1 = arith.constant 0 : i32
    return %c0_i32, %c0_i32_0 : i32, i32
  }
  func.func @transform_2(%arg0: i32, %arg1: i32) -> (i32, i32) {
    %c0_i32 = arith.constant 0 : i32
    %c0_i32_0 = arith.constant 0 : i32
    %c0_i32_1 = arith.constant 0 : i32
    return %c0_i32, %c0_i32_0 : i32, i32
  }
  func.func @transform_3(%arg0: i32, %arg1: i32) -> (i32, i32) {
    %c0_i32 = arith.constant 0 : i32
    %c0_i32_0 = arith.constant 0 : i32
    return %c0_i32, %arg1 : i32, i32
  }
  func.func @transform_4(%arg0: i32, %arg1: i32) -> (i32, i32) {
    %c0_i32 = arith.constant 0 : i32
    %c0_i32_0 = arith.constant 0 : i32
    return %c0_i32, %arg1 : i32, i32
  }
  func.func @transform_5(%arg0: i32, %arg1: i32) -> (i32, i32) {
    %c0_i32 = arith.constant 0 : i32
    return %arg0, %arg1 : i32, i32
  }
}

module attributes {stable_mosaic.version = 11 : i64} {
  func.func @_matmul_k1_kernel(%arg0: i32, %arg1: i32, %arg2: memref<32x128xbf16, #tpu.memory_space<vmem>>, %arg3: memref<128x128xbf16, #tpu.memory_space<vmem>>, %arg4: memref<1x128xf32, #tpu.memory_space<vmem>>, %arg5: memref<32x128xf32, #tpu.memory_space<vmem>>, %arg6: memref<32x128xf32, #tpu.memory_space<vmem>>) attributes {dimension_semantics = [#tpu.dimension_semantics<parallel>, #tpu.dimension_semantics<parallel>], iteration_bounds = array<i64: 1, 1>, scalar_prefetch = 0 : i64, scratch_operands = 0 : i64, tpu.core_type = #tpu.core_type<tc>, window_params = [{transform_indices = @transform_0, window_bounds = array<i64: 32, 128>}, {transform_indices = @transform_1, window_bounds = array<i64: 128, 128>}, {transform_indices = @transform_2, window_bounds = array<i64: 1, 128>}, {transform_indices = @transform_3, window_bounds = array<i64: 32, 128>}, {transform_indices = @transform_4, window_bounds = array<i64: 32, 128>}]} {
    %c0 = arith.constant 0 : index
    %c0_0 = arith.constant 0 : index
    %0 = vector.load %arg2[%c0, %c0_0] : memref<32x128xbf16, #tpu.memory_space<vmem>>, vector<32x128xbf16>
    %c0_1 = arith.constant 0 : index
    %c0_2 = arith.constant 0 : index
    %1 = vector.load %arg3[%c0_1, %c0_2] : memref<128x128xbf16, #tpu.memory_space<vmem>>, vector<128x128xbf16>
    %cst = arith.constant dense<0.000000e+00> : vector<32x128xf32>
    %2 = tpu.matmul %0, %1, %cst {dimension_numbers = #tpu.dot_dimension_numbers<[1], [0], [0], [1], [0, 0, 1, 1], [], []>} : vector<32x128xbf16>, vector<128x128xbf16>, vector<32x128xf32> -> vector<32x128xf32>
    %c0_3 = arith.constant 0 : index
    %c0_4 = arith.constant 0 : index
    %3 = vector.load %arg4[%c0_3, %c0_4] : memref<1x128xf32, #tpu.memory_space<vmem>>, vector<1x128xf32>
    %4 = vector.broadcast %3 : vector<1x128xf32> to vector<32x128xf32>
    %5 = arith.addf %2, %4 : vector<32x128xf32>
    %c0_5 = arith.constant 0 : index
    %c0_6 = arith.constant 0 : index
    %6 = vector.load %arg5[%c0_5, %c0_6] : memref<32x128xf32, #tpu.memory_space<vmem>>, vector<32x128xf32>
    %7 = arith.addf %5, %6 : vector<32x128xf32>
    %c0_7 = arith.constant 0 : index
    %c0_8 = arith.constant 0 : index
    %8 = vector.load %arg6[%c0_7, %c0_8] : memref<32x128xf32, #tpu.memory_space<vmem>>, vector<32x128xf32>
    tpu.vector_store %arg6[%c0_7, %c0_8], %7 {strides = array<i32>} : memref<32x128xf32, #tpu.memory_space<vmem>>, vector<32x128xf32>,
    return
  }
  func.func @transform_0(%arg0: i32, %arg1: i32) -> (i32, i32) {
    %c0_i32 = arith.constant 0 : i32
    %c0_i32_0 = arith.constant 0 : i32
    return %arg0, %c0_i32 : i32, i32
  }
  func.func @transform_1(%arg0: i32, %arg1: i32) -> (i32, i32) {
    %c0_i32 = arith.constant 0 : i32
    %c0_i32_0 = arith.constant 0 : i32
    return %c0_i32, %arg1 : i32, i32
  }
  func.func @transform_2(%arg0: i32, %arg1: i32) -> (i32, i32) {
    %c0_i32 = arith.constant 0 : i32
    %c0_i32_0 = arith.constant 0 : i32
    return %c0_i32, %arg1 : i32, i32
  }
  func.func @transform_3(%arg0: i32, %arg1: i32) -> (i32, i32) {
    %c0_i32 = arith.constant 0 : i32
    return %arg0, %arg1 : i32, i32
  }
  func.func @transform_4(%arg0: i32, %arg1: i32) -> (i32, i32) {
    %c0_i32 = arith.constant 0 : i32
    return %arg0, %arg1 : i32, i32
  }
}

module attributes {stable_mosaic.version = 11 : i64} {
  func.func @_matmul_k1_kernel(%arg0: i32, %arg1: i32, %arg2: memref<32x512xbf16, #tpu.memory_space<vmem>>, %arg3: memref<512x128xbf16, #tpu.memory_space<vmem>>, %arg4: memref<1x128xf32, #tpu.memory_space<vmem>>, %arg5: memref<32x128xf32, #tpu.memory_space<vmem>>, %arg6: memref<32x128xf32, #tpu.memory_space<vmem>>) attributes {dimension_semantics = [#tpu.dimension_semantics<parallel>, #tpu.dimension_semantics<parallel>], iteration_bounds = array<i64: 1, 1>, scalar_prefetch = 0 : i64, scratch_operands = 0 : i64, tpu.core_type = #tpu.core_type<tc>, window_params = [{transform_indices = @transform_0, window_bounds = array<i64: 32, 512>}, {transform_indices = @transform_1, window_bounds = array<i64: 512, 128>}, {transform_indices = @transform_2, window_bounds = array<i64: 1, 128>}, {transform_indices = @transform_3, window_bounds = array<i64: 32, 128>}, {transform_indices = @transform_4, window_bounds = array<i64: 32, 128>}]} {
    %c0 = arith.constant 0 : index
    %c0_0 = arith.constant 0 : index
    %0 = vector.load %arg2[%c0, %c0_0] : memref<32x512xbf16, #tpu.memory_space<vmem>>, vector<32x512xbf16>
    %c0_1 = arith.constant 0 : index
    %c0_2 = arith.constant 0 : index
    %1 = vector.load %arg3[%c0_1, %c0_2] : memref<512x128xbf16, #tpu.memory_space<vmem>>, vector<512x128xbf16>
    %cst = arith.constant dense<0.000000e+00> : vector<32x128xf32>
    %2 = tpu.matmul %0, %1, %cst {dimension_numbers = #tpu.dot_dimension_numbers<[1], [0], [0], [1], [0, 0, 1, 1], [], []>} : vector<32x512xbf16>, vector<512x128xbf16>, vector<32x128xf32> -> vector<32x128xf32>
    %c0_3 = arith.constant 0 : index
    %c0_4 = arith.constant 0 : index
    %3 = vector.load %arg4[%c0_3, %c0_4] : memref<1x128xf32, #tpu.memory_space<vmem>>, vector<1x128xf32>
    %4 = vector.broadcast %3 : vector<1x128xf32> to vector<32x128xf32>
    %5 = arith.addf %2, %4 : vector<32x128xf32>
    %c0_5 = arith.constant 0 : index
    %c0_6 = arith.constant 0 : index
    %6 = vector.load %arg5[%c0_5, %c0_6] : memref<32x128xf32, #tpu.memory_space<vmem>>, vector<32x128xf32>
    %7 = arith.addf %5, %6 : vector<32x128xf32>
    %c0_7 = arith.constant 0 : index
    %c0_8 = arith.constant 0 : index
    %8 = vector.load %arg6[%c0_7, %c0_8] : memref<32x128xf32, #tpu.memory_space<vmem>>, vector<32x128xf32>
    tpu.vector_store %arg6[%c0_7, %c0_8], %7 {strides = array<i32>} : memref<32x128xf32, #tpu.memory_space<vmem>>, vector<32x128xf32>,
    return
  }
  func.func @transform_0(%arg0: i32, %arg1: i32) -> (i32, i32) {
    %c0_i32 = arith.constant 0 : i32
    %c0_i32_0 = arith.constant 0 : i32
    return %arg0, %c0_i32 : i32, i32
  }
  func.func @transform_1(%arg0: i32, %arg1: i32) -> (i32, i32) {
    %c0_i32 = arith.constant 0 : i32
    %c0_i32_0 = arith.constant 0 : i32
    return %c0_i32, %arg1 : i32, i32
  }
  func.func @transform_2(%arg0: i32, %arg1: i32) -> (i32, i32) {
    %c0_i32 = arith.constant 0 : i32
    %c0_i32_0 = arith.constant 0 : i32
    return %c0_i32, %arg1 : i32, i32
  }
  func.func @transform_3(%arg0: i32, %arg1: i32) -> (i32, i32) {
    %c0_i32 = arith.constant 0 : i32
    return %arg0, %arg1 : i32, i32
  }
  func.func @transform_4(%arg0: i32, %arg1: i32) -> (i32, i32) {
    %c0_i32 = arith.constant 0 : i32
    return %arg0, %arg1 : i32, i32
  }
}

module attributes {stable_mosaic.version = 11 : i64} {
  func.func @_matmul_k1_kernel(%arg0: i32, %arg1: i32, %arg2: memref<32x128xf32, #tpu.memory_space<vmem>>, %arg3: memref<128x512xbf16, #tpu.memory_space<vmem>>, %arg4: memref<32x512xf32, #tpu.memory_space<vmem>>) attributes {dimension_semantics = [#tpu.dimension_semantics<parallel>, #tpu.dimension_semantics<parallel>], iteration_bounds = array<i64: 1, 1>, scalar_prefetch = 0 : i64, scratch_operands = 0 : i64, tpu.core_type = #tpu.core_type<tc>, window_params = [{transform_indices = @transform_0, window_bounds = array<i64: 32, 128>}, {transform_indices = @transform_1, window_bounds = array<i64: 128, 512>}, {transform_indices = @transform_2, window_bounds = array<i64: 32, 512>}]} {
    %c0 = arith.constant 0 : index
    %c0_0 = arith.constant 0 : index
    %0 = vector.load %arg2[%c0, %c0_0] : memref<32x128xf32, #tpu.memory_space<vmem>>, vector<32x128xf32>
    %1 = arith.truncf %0 : vector<32x128xf32> to vector<32x128xbf16>
    %c0_1 = arith.constant 0 : index
    %c0_2 = arith.constant 0 : index
    %2 = vector.load %arg3[%c0_1, %c0_2] : memref<128x512xbf16, #tpu.memory_space<vmem>>, vector<128x512xbf16>
    %cst = arith.constant dense<0.000000e+00> : vector<32x512xf32>
    %3 = tpu.matmul %1, %2, %cst {dimension_numbers = #tpu.dot_dimension_numbers<[1], [0], [0], [1], [0, 0, 1, 1], [], []>} : vector<32x128xbf16>, vector<128x512xbf16>, vector<32x512xf32> -> vector<32x512xf32>
    %c0_3 = arith.constant 0 : index
    %c0_4 = arith.constant 0 : index
    %4 = vector.load %arg4[%c0_3, %c0_4] : memref<32x512xf32, #tpu.memory_space<vmem>>, vector<32x512xf32>
    tpu.vector_store %arg4[%c0_3, %c0_4], %3 {strides = array<i32>} : memref<32x512xf32, #tpu.memory_space<vmem>>, vector<32x512xf32>,
    return
  }
  func.func @transform_0(%arg0: i32, %arg1: i32) -> (i32, i32) {
    %c0_i32 = arith.constant 0 : i32
    %c0_i32_0 = arith.constant 0 : i32
    return %arg0, %c0_i32 : i32, i32
  }
  func.func @transform_1(%arg0: i32, %arg1: i32) -> (i32, i32) {
    %c0_i32 = arith.constant 0 : i32
    %c0_i32_0 = arith.constant 0 : i32
    return %c0_i32, %arg1 : i32, i32
  }
  func.func @transform_2(%arg0: i32, %arg1: i32) -> (i32, i32) {
    %c0_i32 = arith.constant 0 : i32
    return %arg0, %arg1 : i32, i32
  }
}

</mosaic_0001>

<bundles_post_ra>
// kernel: _lambda_.13
= control target key start
LH: loop header
LB: loop body
LE: loop exit
PB: predicated region body
PF: predicated region fallthrough
CT: control target
= control target key end

     0   :  { %v142_v4 = vmov 128.0   ;;  %s203_s0 = inlined_call_operand.vmem [shape: f32[32,128], index: 0, kind: input, shape index: {}]   ;;  %s204_s1 = inlined_call_operand.vmem [shape: f32[1,128], index: 1, kind: input, shape index: {}]   ;;  %s205_s2 = inlined_call_operand.vmem [shape: f32[1,128], index: 2, kind: input, shape index: {}]   ;;  %s206_s3 = inlined_call_operand.vmem [shape: f32[32,128], index: 3, kind: output, shape index: {}]  }
   0x1   :  { %v16_v0 = vld [vmem:[%s203_s0 + $0x10] sm:$0xff]  ;;  %v14_v1 = vld [vmem:[%s203_s0] sm:$0xff]  ;;  %v17_v2 = vld [vmem:[%s203_s0 + $0x18] sm:$0xff]  ;;  %132 = vrcp.f32 %v142_v4 }
   0x2   :  { %22 = vadd.xlane.f32.xlu1 %v16_v0  ;;  %18 = vadd.xlane.f32.xlu0 %v14_v1  ;;  %v15_v3 = vld [vmem:[%s203_s0 + $0x8] sm:$0xff]  ;;  %v130_v53 = vld [vmem:[%s204_s1] ss:$0 sm:$0xff] }
   0x3   :  { %v131_v58 = vld [vmem:[%s205_s2] ss:$0 sm:$0xff] }
   0x7   :  { %v133_v5 = vpop.eup %132 }
   0x8   :  { %v27_v6 = vmul.f32 128.0, %v133_v5  ;;  %vm31_vm0 = vweird.f32 %v133_v5 }
   0xa   :  { %24 = vadd.xlane.f32.xlu1 %v17_v2  ;;  %20 = vadd.xlane.f32.xlu0 %v15_v3  ;;  %v28_v7 = vsub.f32 1.0, %v27_v6 }
   0xc   :  { %v29_v8 = vmul.f32 %v133_v5, %v28_v7 }
   0xe   :  { %v30_v9 = vadd.f32 %v133_v5, %v29_v8 }
  0x10   :  { %v32_v10 = vsel %vm31_vm0, %v133_v5, %v30_v9 }
  0x75   :  { %v23_v11 = vpop.xlane.xlu1 %22  ;;  %v19_v12 = vpop.xlane.xlu0 %18 }
  0x76   :  { %v35_v13 = vmul.f32 %v32_v10, %v23_v11  ;;  %v33_v14 = vmul.f32 %v32_v10, %v19_v12 }
  0x78   :  { %v39_v15 = vsub.f32 %v16_v0, %v35_v13  ;;  %v37_v16 = vsub.f32 %v14_v1, %v33_v14 }
  0x7a   :  { %v43_v17 = vmul.f32 %v39_v15, %v39_v15  ;;  %v41_v18 = vmul.f32 %v37_v16, %v37_v16 }
  0x7c   :  { %49 = vadd.xlane.f32.xlu0 %v43_v17  ;;  %45 = vadd.xlane.f32.xlu2 %v41_v18 }
  0x7d   :  { %v25_v19 = vpop.xlane.xlu1 %24  ;;  %v21_v20 = vpop.xlane.xlu0 %20 }
  0x7e   :  { %v36_v21 = vmul.f32 %v32_v10, %v25_v19  ;;  %v34_v22 = vmul.f32 %v32_v10, %v21_v20 }
  0x80   :  { %v175_v23 = vsub.f32 %v17_v2, %v36_v21  ;;  %v177_v24 = vsub.f32 %v15_v3, %v34_v22 }
  0x82   :  { %v44_v25 = vmul.f32 %v175_v23, %v175_v23  ;;  %v42_v26 = vmul.f32 %v177_v24, %v177_v24 }
  0x84   :  { %51 = vadd.xlane.f32.xlu1 %v44_v25  ;;  %47 = vadd.xlane.f32.xlu2 %v42_v26 }
  0xef   :  { %v46_v27 = vpop.xlane.xlu2 %45  ;;  %v50_v28 = vpop.xlane.xlu0 %49 }
  0xf0   :  { %v53_v29 = vmul.f32 %v46_v27, %v32_v10  ;;  %v55_v30 = vmul.f32 %v50_v28, %v32_v10 }
  0xf2   :  { %v57_v31 = vadd.f32 1e-05, %v53_v29  ;;  %v59_v32 = vadd.f32 1e-05, %v55_v30 }
  0xf4   :  { %134 = vrsqrt.f32 %v57_v31  ;;  %vm67_vm3 = vweird.f32 %v57_v31  ;;  %vm87_vm5 = vweird.f32 %v59_v32 }
  0xf5   :  { %136 = vrsqrt.f32 %v59_v32 }
  0xf7   :  { %v52_v33 = vpop.xlane.xlu1 %51  ;;  %v48_v34 = vpop.xlane.xlu2 %47 }
  0xf8   :  { %v56_v35 = vmul.f32 %v52_v33, %v32_v10  ;;  %v54_v36 = vmul.f32 %v48_v34, %v32_v10 }
  0xfa   :  { %v135_v37 = vpop.eup %134  ;;  %v60_v38 = vadd.f32 1e-05, %v56_v35  ;;  %v58_v39 = vadd.f32 1e-05, %v54_v36 }
  0xfb   :  { %v137_v40 = vpop.eup %136  ;;  %v62_v41 = vmul.f32 %v135_v37, %v57_v31  ;;  %vm68_vm1 = vweird.f32 %v135_v37 }
  0xfc   :  { %v82_v42 = vmul.f32 %v137_v40, %v59_v32  ;;  %138 = vrsqrt.f32 %v60_v38  ;;  %vm88_vm2 = vweird.f32 %v137_v40  ;;  %vm69_vm4 = vmor %vm67_vm3, %vm68_vm1  ;;  %vm97_vm9 = vweird.f32 %v60_v38 }
  0xfd   :  { %v63_v43 = vmul.f32 %v135_v37, %v62_v41  ;;  %140 = vrsqrt.f32 %v58_v39  ;;  %vm89_vm6 = vmor %vm87_vm5, %vm88_vm2  ;;  %vm77_vm11 = vweird.f32 %v58_v39 }
  0xfe   :  { %v83_v44 = vmul.f32 %v137_v40, %v82_v42 }
  0xff   :  { %v64_v45 = vmul.f32 0.5, %v63_v43 }
 0x100   :  { %v84_v46 = vmul.f32 0.5, %v83_v44 }
 0x101   :  { %v65_v47 = vsub.f32 1.5, %v64_v45 }
 0x102   :  { %v139_v48 = vpop.eup %138  ;;  %v85_v49 = vsub.f32 1.5, %v84_v46 }
 0x103   :  { %v141_v50 = vpop.eup %140  ;;  %v66_v51 = vmul.f32 %v135_v37, %v65_v47  ;;  %v92_v52 = vmul.f32 %v139_v48, %v60_v38  ;;  %vm98_vm7 = vweird.f32 %v139_v48 }
 0x104   :  { %v86_v54 = vmul.f32 %v137_v40, %v85_v49  ;;  %v72_v55 = vmul.f32 %v141_v50, %v58_v39  ;;  %vm78_vm8 = vweird.f32 %v141_v50  ;;  %vm99_vm10 = vmor %vm97_vm9, %vm98_vm7 }
 0x105   :  { %v70_v56 = vsel %vm69_vm4, %v135_v37, %v66_v51  ;;  %v93_v57 = vmul.f32 %v139_v48, %v92_v52  ;;  %vm79_vm12 = vmor %vm77_vm11, %vm78_vm8 }
 0x106   :  { %v101_v59 = vmul.f32 %v70_v56, %v37_v16  ;;  %v90_v60 = vsel %vm89_vm6, %v137_v40, %v86_v54  ;;  %v73_v61 = vmul.f32 %v141_v50, %v72_v55 }
 0x107   :  { %v103_v62 = vmul.f32 %v90_v60, %v39_v15  ;;  %v94_v63 = vmul.f32 0.5, %v93_v57 }
 0x108   :  { %v109_v0 = vmul.f32 %v130_v53, %v101_v59  ;;  %v74_v1 = vmul.f32 0.5, %v73_v61 }
 0x109   :  { %v111_v2 = vmul.f32 %v130_v53, %v103_v62  ;;  %v95_v3 = vsub.f32 1.5, %v94_v63 }
 0x10a   :  { %v117_v4 = vadd.f32 %v131_v58, %v109_v0  ;;  %v75_v5 = vsub.f32 1.5, %v74_v1 }
 0x10b   :  { %v119_v6 = vadd.f32 %v131_v58, %v111_v2  ;;  %v96_v7 = vmul.f32 %v139_v48, %v95_v3 }
 0x10c   :  { %121 = vst [vmem:[%s206_s3] sm:$0xff] %v117_v4  ;;  %v76_v8 = vmul.f32 %v141_v50, %v75_v5 }
 0x10d   :  { %123 = vst [vmem:[%s206_s3 + $0x10] sm:$0xff] %v119_v6  ;;  %v100_v9 = vsel %vm99_vm10, %v139_v48, %v96_v7 }
 0x10e   :  { %v104_v10 = vmul.f32 %v100_v9, %v175_v23  ;;  %v80_v11 = vsel %vm79_vm12, %v141_v50, %v76_v8 }
 0x10f   :  { %v102_v12 = vmul.f32 %v80_v11, %v177_v24 }
 0x110   :  { %v112_v13 = vmul.f32 %v130_v53, %v104_v10 }
 0x111   :  { %v110_v14 = vmul.f32 %v130_v53, %v102_v12 }
 0x112   :  { %v120_v15 = vadd.f32 %v131_v58, %v112_v13 }
 0x113   :  { %v118_v16 = vadd.f32 %v131_v58, %v110_v14 }
 0x114   :  { %124 = vst [vmem:[%s206_s3 + $0x18] sm:$0xff] %v120_v15 }
 0x115   :  { %122 = vst [vmem:[%s206_s3 + $0x8] sm:$0xff] %v118_v16 }

// kernel: _lambda_.14
= control target key start
LH: loop header
LB: loop body
LE: loop exit
PB: predicated region body
PF: predicated region fallthrough
CT: control target
= control target key end

     0   :  { %10 = vsyncpa [#allocation4], 0  ;;  %s1128_s0 = inlined_call_operand.vmem [shape: f32[32,128], index: 0, kind: input, shape index: {}]   ;;  %s1129_s1 = inlined_call_operand.vmem [shape: f32[1,128], index: 1, kind: input, shape index: {}]   ;;  %s1130_s2 = inlined_call_operand.vmem [shape: f32[1,128], index: 2, kind: input, shape index: {}]   ;;  %s1131_s3 = inlined_call_operand.hbm [shape: bf16[128,384], index: 3, kind: input, shape index: {}]   ;;  %s1132_s4 = inlined_call_operand.vmem [shape: f32[1,384], index: 4, kind: input, shape index: {}]   ;;  %s1133_s5 = inlined_call_operand.vmem [shape: bf16[32,384], index: 5, kind: output, shape index: {}]  }
   0x1   :  { %12 = vsyncpa [#allocation4 + $0x1], 0  ;;  %s965_s18 = smov 0   ;;  %s967_s19 = smov 0  }
   0x2   :  { %s969_s20 = smov 0   ;;  %s971_s21 = smov 0  }
   0x3   :  { %s973_s22 = smov 0   ;;  %s975_s23 = smov 0  }
   0x4 LB: > { %s682_s24 = sadd.s32 4294967295, %s929_s23   ;;  %s27_s25 = sadd.s32 1, %s925_s22  ;;  %s929_s23 = sphi %s975_s23, %s18_s23   ;;  %s925_s22 = sphi %s973_s22, %s1141_s22   ;;  %s921_s21 = sphi %s971_s21, %s1140_s21   ;;  %s917_s20 = sphi %s969_s20, %s1139_s20   ;;  %s913_s19 = sphi %s967_s19, %s1138_s19   ;;  %s909_s18 = sphi %s965_s18, %s1137_s18  }
   0x5   : > { %p28_p0 = scmp.ge.s32.totalorder %s27_s25, 3  ;;  %s105_s26 = sadd.s32 1, %s917_s20 }
   0x6   : > { %p112_p1 = scmp.ne.s32.totalorder %s917_s20, %s913_s19  ;;  %p113_p2 = scmp.eq.s32.totalorder %s929_s23, 0 }
   0x7   : > { %s1143_s25 = smov (%p28_p0, %s27_s25), 0  ;;  %p118_p4 = scmp.ne.s32.totalorder %s913_s19, %s909_s18 }
   0x8   : > { %p1001_p3 = por %p113_p2, %p112_p1  ;;  %s102_s28 = ssub.s32 %s925_s22, %s1143_s25 }
   0x9   : > { %p119_p5 = scmp.eq.s32.totalorder %s682_s24, 0  ;;  %p103_p6 = scmp.eq.s32.totalorder %s102_s28, 0 }
   0xa   : > { %p170_p7 = scmp.eq.s32.totalorder %s682_s24, 2  ;;  %p783_p10 = scmp.lt.s32.totalorder %s929_s23, 3 }
   0xb   : > { %p1008_p8 = por %p119_p5, %p118_p4  ;;  %s211_s7 = sand.u32 1, %s917_s20  }
   0xc   : > { %s1013_s30 = scalar_select %p103_p6, %s917_s20, %s105_s26  }
   0xd   : > { %p1015_p9 = por %p170_p7, %p112_p1  ;;  %s688_s8 = sshll.u32 %s925_s22, 2 }
   0xe   : > { %s687_s9 = sshll.u32 %s211_s7, 6  ;;  %s219_s12 = scalar_lea.hbm %s1131_s3, %s688_s8 }
   0xf   : > { %s220_s13 = sshll.u32 %s219_s12, 4  ;;  %s215_s14 = scalar_lea.vmem [#allocation3], %s687_s9  ;;  %s221_s13 = int_to_ptr.hbm [resolvable:$true] %s220_s13 }
  0x10   : > { %s222_s15 = sshll.u32 %s215_s14, 4  ;;  %p780_p11 = pnand %p783_p10, %p1001_p3  ;;  %s223_s15 = int_to_ptr.vmem [resolvable:$true] %s222_s15 }
  0x11   : > { %p689_p12 = scmp.ge.s32.totalorder %s929_s23, 1  ;;  %s212_s16 = scalar_lea.sflag [#allocation4], %s211_s7 }
  0x12   : > { %s931_s17 = smov 192   ;;  %s932_s18 = smov 64  }
  0x13   : > { %s933_s24 = smov 4   ;;  %p236_p13 = scmp.lt.s32.totalorder %s929_s23, 4 }
  0x14   : > { %782 = dma.hbm_to_vmem [thread:$0]  (!%p780_p11), %s221_s13, 1024, %s223_s15, %s212_s16, %s931_s17, %s932_s18, %s933_s24  }
  0x15   : > { %p237_p0 = pnand %p689_p12, %p236_p13 }
  0x16   : > { %s242_s26 = sand.u32 (!%p237_p0), 1, %s913_s19  }
  0x17   : > { %240 = sbr.rel (%p237_p0) target bundleno = 498 (0x1f2), region = 40  ;;  %s690_s28 = sshll.u32 (!%p237_p0), %s242_s26, 6 }
  0x18   : > { %s243_s8 = scalar_lea.sflag (!%p237_p0), [#allocation4], %s242_s26  ;;  %s1030_s9 = scalar_lea.vmem (!%p237_p0), [#allocation3], %s690_s28 }
  0x1c   : > { %904 = dma.done.wait (%p1008_p8), %s243_s8, 1024  }
  0x1d   : > { %906 = vsyncadd (%p1008_p8), %s243_s8, 4294966272  ;;  %s691_s27 = sshll.u32 %s242_s26, 4  ;;  %p287_p1 = scmp.lt.s32.totalorder %s921_s21, 2 }
  0x1e   : > { %s1044_s13 = scalar_lea.vmem [#allocation5], %s691_s27  ;;  %p692_p2 = scmp.ne.s32.totalorder %s921_s21, 0 }
  0x1f   : > { %s1038_s7 = scalar_select %p287_p1, %s921_s21, 2 }
  0x20   : > { %294 = sbr.rel (%p692_p2) target bundleno = 316 (0x13c), region = 48 }
  0x21   : > { %s289_s12 = scalar_lea.vmem %s1132_s4, %s1038_s7 }
  0x25   : > { %v297_v0 = vld [vmem:[%s1128_s0 + $0x10] sm:$0xff]  ;;  %v295_v1 = vld [vmem:[%s1128_s0] sm:$0xff]  ;;  %v298_v2 = vld [vmem:[%s1128_s0 + $0x18] sm:$0xff]  ;;  %v934_v4 = vmov 128.0  }
  0x26   : > { %303 = vadd.xlane.f32.xlu1 %v297_v0  ;;  %299 = vadd.xlane.f32.xlu0 %v295_v1  ;;  %v296_v3 = vld [vmem:[%s1128_s0 + $0x8] sm:$0xff]  ;;  %838 = vrcp.f32 %v934_v4  ;;  %v836_v62 = vld [vmem:[%s1129_s1] ss:$0 sm:$0xff] }
  0x2c   : > { %v839_v5 = vpop.eup %838 }
  0x2d   : > { %v308_v6 = vmul.f32 128.0, %v839_v5  ;;  %vm312_vm0 = vweird.f32 %v839_v5 }
  0x2e   : > { %305 = vadd.xlane.f32.xlu1 %v298_v2  ;;  %301 = vadd.xlane.f32.xlu0 %v296_v3 }
  0x2f   : > { %v309_v7 = vsub.f32 1.0, %v308_v6 }
  0x31   : > { %v310_v8 = vmul.f32 %v839_v5, %v309_v7 }
  0x33   : > { %v311_v9 = vadd.f32 %v839_v5, %v310_v8 }
  0x35   : > { %v313_v10 = vsel %vm312_vm0, %v839_v5, %v311_v9  ;;  %v837_v5 = vld [vmem:[%s1130_s2] ss:$0 sm:$0xff] }
  0x99   : > { %v304_v11 = vpop.xlane.xlu1 %303  ;;  %v300_v12 = vpop.xlane.xlu0 %299 }
  0x9a   : > { %v316_v13 = vmul.f32 %v313_v10, %v304_v11  ;;  %v314_v14 = vmul.f32 %v313_v10, %v300_v12 }
  0x9c   : > { %v1059_v15 = vsub.f32 %v297_v0, %v316_v13  ;;  %v1061_v16 = vsub.f32 %v295_v1, %v314_v14 }
  0x9e   : > { %v324_v17 = vmul.f32 %v1059_v15, %v1059_v15  ;;  %v322_v18 = vmul.f32 %v1061_v16, %v1061_v16 }
  0xa0   : > { %330 = vadd.xlane.f32.xlu0 %v324_v17  ;;  %326 = vadd.xlane.f32.xlu2 %v322_v18 }
  0xa1   : > { %v306_v19 = vpop.xlane.xlu1 %305  ;;  %v302_v20 = vpop.xlane.xlu0 %301 }
  0xa2   : > { %v317_v21 = vmul.f32 %v313_v10, %v306_v19  ;;  %v315_v22 = vmul.f32 %v313_v10, %v302_v20 }
  0xa4   : > { %v1067_v23 = vsub.f32 %v298_v2, %v317_v21  ;;  %v1069_v24 = vsub.f32 %v296_v3, %v315_v22 }
  0xa6   : > { %v325_v25 = vmul.f32 %v1067_v23, %v1067_v23  ;;  %v323_v26 = vmul.f32 %v1069_v24, %v1069_v24 }
  0xa8   : > { %332 = vadd.xlane.f32.xlu1 %v325_v25  ;;  %328 = vadd.xlane.f32.xlu2 %v323_v26 }
 0x113   : > { %v327_v27 = vpop.xlane.xlu2 %326  ;;  %v331_v28 = vpop.xlane.xlu0 %330 }
 0x114   : > { %v334_v29 = vmul.f32 %v327_v27, %v313_v10  ;;  %v336_v30 = vmul.f32 %v331_v28, %v313_v10 }
 0x116   : > { %v338_v31 = vadd.f32 1e-05, %v334_v29  ;;  %v340_v32 = vadd.f32 1e-05, %v336_v30 }
 0x118   : > { %840 = vrsqrt.f32 %v338_v31  ;;  %vm368_vm3 = vweird.f32 %v340_v32  ;;  %vm348_vm4 = vweird.f32 %v338_v31 }
 0x119   : > { %842 = vrsqrt.f32 %v340_v32 }
 0x11b   : > { %v333_v33 = vpop.xlane.xlu1 %332  ;;  %v329_v34 = vpop.xlane.xlu2 %328 }
 0x11c   : > { %v337_v35 = vmul.f32 %v333_v33, %v313_v10  ;;  %v335_v36 = vmul.f32 %v329_v34, %v313_v10 }
 0x11e   : > { %v841_v37 = vpop.eup %840  ;;  %v341_v38 = vadd.f32 1e-05, %v337_v35  ;;  %v339_v39 = vadd.f32 1e-05, %v335_v36 }
 0x11f   : > { %v843_v40 = vpop.eup %842  ;;  %v343_v41 = vmul.f32 %v841_v37, %v338_v31  ;;  %vm349_vm2 = vweird.f32 %v841_v37 }
 0x120   : > { %v363_v42 = vmul.f32 %v843_v40, %v340_v32  ;;  %844 = vrsqrt.f32 %v341_v38  ;;  %vm369_vm1 = vweird.f32 %v843_v40  ;;  %vm350_vm6 = vmor %vm348_vm4, %vm349_vm2  ;;  %vm378_vm9 = vweird.f32 %v341_v38 }
 0x121   : > { %v344_v43 = vmul.f32 %v841_v37, %v343_v41  ;;  %846 = vrsqrt.f32 %v339_v39  ;;  %vm370_vm5 = vmor %vm368_vm3, %vm369_vm1  ;;  %vm358_vm11 = vweird.f32 %v339_v39 }
 0x122   : > { %v364_v44 = vmul.f32 %v843_v40, %v363_v42 }
 0x123   : > { %v345_v45 = vmul.f32 0.5, %v344_v43 }
 0x124   : > { %v365_v46 = vmul.f32 0.5, %v364_v44 }
 0x125   : > { %v346_v47 = vsub.f32 1.5, %v345_v45 }
 0x126   : > { %v845_v48 = vpop.eup %844  ;;  %v366_v49 = vsub.f32 1.5, %v365_v46 }
 0x127   : > { %v847_v50 = vpop.eup %846  ;;  %v373_v51 = vmul.f32 %v845_v48, %v341_v38  ;;  %v347_v52 = vmul.f32 %v841_v37, %v346_v47  ;;  %vm379_vm7 = vweird.f32 %v845_v48 }
 0x128   : > { %v367_v53 = vmul.f32 %v843_v40, %v366_v49  ;;  %v353_v54 = vmul.f32 %v847_v50, %v339_v39  ;;  %vm359_vm8 = vweird.f32 %v847_v50  ;;  %vm380_vm10 = vmor %vm378_vm9, %vm379_vm7 }
 0x129   : > { %v374_v55 = vmul.f32 %v845_v48, %v373_v51  ;;  %v351_v59 = vsel %vm350_vm6, %v841_v37, %v347_v52  ;;  %vm360_vm12 = vmor %vm358_vm11, %vm359_vm8 }
 0x12a   : > { %v354_v56 = vmul.f32 %v847_v50, %v353_v54  ;;  %v371_v57 = vsel %vm370_vm5, %v843_v40, %v367_v53  ;;  %v382_v1 = vmul.f32 %v351_v59, %v1061_v16 }
 0x12b   : > { %v375_v58 = vmul.f32 0.5, %v374_v55  ;;  %v384_v63 = vmul.f32 %v371_v57, %v1059_v15 }
 0x12c   : > { %v355_v60 = vmul.f32 0.5, %v354_v56  ;;  %v390_v9 = vmul.f32 %v836_v62, %v382_v1 }
 0x12d   : > { %v376_v61 = vsub.f32 1.5, %v375_v58  ;;  %v392_v6 = vmul.f32 %v836_v62, %v384_v63 }
 0x12e   : > { %v356_v0 = vsub.f32 1.5, %v355_v60  ;;  %v398_v15 = vadd.f32 %v837_v5, %v390_v9 }
 0x12f   : > { %v377_v2 = vmul.f32 %v845_v48, %v376_v61  ;;  %v400_v13 = vadd.f32 %v837_v5, %v392_v6 }
 0x130   : > { %v357_v3 = vmul.f32 %v847_v50, %v356_v0 }
 0x131   : > { %v381_v4 = vsel %vm380_vm10, %v845_v48, %v377_v2 }
 0x132   : > { %v385_v7 = vmul.f32 %v381_v4, %v1067_v23  ;;  %v361_v8 = vsel %vm360_vm12, %v847_v50, %v357_v3 }
 0x133   : > { %v383_v10 = vmul.f32 %v361_v8, %v1069_v24 }
 0x134   : > { %v393_v11 = vmul.f32 %v836_v62, %v385_v7 }
 0x135   : > { %v391_v12 = vmul.f32 %v836_v62, %v383_v10 }
 0x136   : > { %v401_v14 = vadd.f32 %v837_v5, %v393_v11 }
 0x137   : > { %v399_v16 = vadd.f32 %v837_v5, %v391_v12 }
 0x138   : > { %v755_v17 = vpack.c.bf16 %v401_v14, %v400_v13 }
 0x139   : > { %v750_v18 = vpack.c.bf16 %v399_v16, %v398_v15 }
 0x13a   : > { %767 = vst [vmem:[#allocation2 + $0x8] sm:$0xff] %v755_v17  }
 0x13b   : > { %751 = vst [vmem:[#allocation2] sm:$0xff] %v750_v18  }
 0x13c PF: > { %v746_v19 = vld [vmem:[%s1030_s9 + $0x38] sm:$0xff]  ;;  %v745_v20 = vld [vmem:[%s1030_s9 + $0x30] sm:$0xff]  ;;  %v744_v21 = vld [vmem:[%s1030_s9 + $0x28] sm:$0xff] }
 0x13d   : > { %494 = vmatpush.bf16.msra.mxu0 %v746_v19  ;;  %769 = vmatpush.bf16.msra.mxu1 %v746_v19  ;;  %v743_v22 = vld [vmem:[%s1030_s9 + $0x20] sm:$0xff]  ;;  %v742_v23 = vld [vmem:[%s1030_s9 + $0x18] sm:$0xff]  ;;  %v741_v24 = vld [vmem:[%s1030_s9 + $0x10] sm:$0xff] }
 0x13e   : > { %v740_v25 = vld [vmem:[%s1030_s9 + $0x8] sm:$0xff]  ;;  %v739_v26 = vld [vmem:[%s1030_s9] sm:$0xff]  ;;  %v848_v31 = vld [vmem:[%s289_s12] ss:$0 sm:$0xff]  ;;  %s734_s9 = sshll.u32 (%p1015_p9), %s921_s21, 2 }
 0x13f   : > { %s532_s15 = scalar_lea.vmem (%p1015_p9), %s1133_s5, %s734_s9 }
 0x141   : > { %495 = vmatpush.bf16.msra.mxu0 %v745_v20  ;;  %770 = vmatpush.bf16.msra.mxu1 %v745_v20  ;;  %v738_v28 = vld [vmem:[#allocation2 + $0x8] sm:$0xff] }
 0x142   : > { %v737_v27 = vld [vmem:[#allocation2] sm:$0xff] }
 0x145   : > { %496 = vmatpush.bf16.msra.mxu0 %v744_v21  ;;  %771 = vmatpush.bf16.msra.mxu1 %v744_v21 }
 0x149   : > { %497 = vmatpush.bf16.msra.mxu0 %v743_v22  ;;  %772 = vmatpush.bf16.msra.mxu1 %v743_v22 }
 0x14d   : > { %498 = vmatpush.bf16.msra.mxu0 %v742_v23  ;;  %773 = vmatpush.bf16.msra.mxu1 %v742_v23 }
 0x151   : > { %499 = vmatpush.bf16.msra.mxu0 %v741_v24  ;;  %774 = vmatpush.bf16.msra.mxu1 %v741_v24 }
 0x155   : > { %500 = vmatpush.bf16.msra.mxu0 %v740_v25  ;;  %775 = vmatpush.bf16.msra.mxu1 %v740_v25 }
 0x159   : > { %501 = vmatpush.bf16.msra.mxu0 %v739_v26  ;;  %776 = vmatpush.bf16.msra.mxu1 %v739_v26 }
 0x15c   : > { %502 = vmatmul.bf16.vlgmr.msra.gmra.mxu0 %v737_v27  ;;  %507 = vmatmul.bf16.vlgmr.msra.gmra.mxu1 %v738_v28 }
 0x1d9   : > { %v503_v29 = vpop.f32.mrf.mxu0  ;;  %v508_v30 = vpop.f32.mrf.mxu1 }
 0x1da   : > { %v504_v34 = vadd.f32 %v848_v31, %v503_v29  ;;  %v509_v35 = vadd.f32 %v848_v31, %v508_v30 }
 0x1e1   : > { %v505_v32 = vpop.f32.mrf.mxu0  ;;  %v510_v33 = vpop.f32.mrf.mxu1 }
 0x1e2   : > { %v506_v36 = vadd.f32 %v848_v31, %v505_v32  ;;  %v511_v37 = vadd.f32 %v848_v31, %v510_v33 }
 0x1e3   : > { %527 = sbr.rel (!%p1015_p9) target bundleno = 498 (0x1f2), region = 52 }
 0x1e4   : > { %v760_v38 = vpack.c.bf16 %v506_v36, %v504_v34  ;;  %v765_v39 = vpack.c.bf16 %v511_v37, %v509_v35 }
 0x1e6   : > { %761 = vst [vmem:[%s1044_s13] sm:$0xff] %v760_v38  }
 0x1e7   : > { %768 = vst [vmem:[%s1044_s13 + $0x8] sm:$0xff] %v765_v39  }
 0x1ed   : > { %v549_v40 = vld [vmem:[%s1044_s13] sm:$0xf]  ;;  %v551_v41 = vld [vmem:[%s1044_s13 + $0x4] sm:$0xf] }
 0x1ee   : > { %v553_v42 = vld [vmem:[%s1044_s13 + $0x8] sm:$0xf]  ;;  %550 = vst [vmem:[%s532_s15] sm:$0xf] %v549_v40  ;;  %v555_v43 = vld [vmem:[%s1044_s13 + $0xc] sm:$0xf] }
 0x1ef   : > { %552 = vst [vmem:[%s532_s15 + $0xc] sm:$0xf] %v551_v41 }
 0x1f0   : > { %554 = vst [vmem:[%s532_s15 + $0x18] sm:$0xf] %v553_v42 }
 0x1f1   : > { %556 = vst [vmem:[%s532_s15 + $0x24] sm:$0xf] %v555_v43 }
 0x1f2 PF: > { %s18_s23 = sadd.s32 1, %s929_s23   ;;  %s1137_s18 = smov %s913_s19 }
 0x1f3   : > { %p15_p3 = scmp.ge.s32.totalorder %s18_s23, 5   ;;  %s1138_s19 = smov %s917_s20 }
 0x1f4   : > { %s1139_s20 = smov %s1013_s30  ;;  %s1140_s21 = smov %s925_s22 }
 0x1f5   : > { %s1141_s22 = smov %s1143_s25  ;;  %17 = sbr.rel (!%p15_p3) target bundleno = 4 (0x4), region = 131 }
 0x1fa   :  { %598 = vsyncpa [#allocation4], 1 }
 0x1fb   :  { %600 = vsyncpa [#allocation4 + $0x1], 1 }

// kernel: _lambda_.16
= control target key start
LH: loop header
LB: loop body
LE: loop exit
PB: predicated region body
PF: predicated region fallthrough
CT: control target
= control target key end

     0   :  { %s277_s1 = inlined_call_operand.vmem [shape: bf16[128,128], index: 1, kind: input, shape index: {}]   ;;  %s278_s2 = inlined_call_operand.vmem [shape: f32[1,128], index: 2, kind: input, shape index: {}]   ;;  %s279_s0 = inlined_call_operand.vmem [shape: bf16[32,128], index: 0, kind: input, shape index: {}]   ;;  %s280_s3 = inlined_call_operand.vmem [shape: f32[32,128], index: 3, kind: input, shape index: {}]   ;;  %s281_s4 = inlined_call_operand.vmem [shape: f32[32,128], index: 4, kind: output, shape index: {}]  }
   0x1   :  { %v185_v0 = vld [vmem:[%s277_s1 + $0x38] sm:$0xff]  ;;  %v184_v1 = vld [vmem:[%s277_s1 + $0x30] sm:$0xff]  ;;  %v183_v2 = vld [vmem:[%s277_s1 + $0x28] sm:$0xff] }
   0x2   :  { %101 = vmatpush.bf16.msra.mxu0 %v185_v0  ;;  %186 = vmatpush.bf16.msra.mxu1 %v185_v0  ;;  %v182_v3 = vld [vmem:[%s277_s1 + $0x20] sm:$0xff]  ;;  %v181_v4 = vld [vmem:[%s277_s1 + $0x18] sm:$0xff]  ;;  %v180_v5 = vld [vmem:[%s277_s1 + $0x10] sm:$0xff] }
   0x3   :  { %v179_v6 = vld [vmem:[%s277_s1 + $0x8] sm:$0xff]  ;;  %v178_v7 = vld [vmem:[%s277_s1] sm:$0xff]  ;;  %v122_v14 = vld [vmem:[%s280_s3 + $0x10] sm:$0xff] }
   0x4   :  { %v176_v8 = vld [vmem:[%s279_s0] sm:$0xff]  ;;  %v177_v9 = vld [vmem:[%s279_s0 + $0x8] sm:$0xff]  ;;  %v123_v22 = vld [vmem:[%s280_s3 + $0x18] sm:$0xff] }
   0x5   :  { %v194_v10 = vld [vmem:[%s278_s2] ss:$0 sm:$0xff]  ;;  %v121_v20 = vld [vmem:[%s280_s3 + $0x8] sm:$0xff] }
   0x6   :  { %102 = vmatpush.bf16.msra.mxu0 %v184_v1  ;;  %187 = vmatpush.bf16.msra.mxu1 %v184_v1  ;;  %v120_v12 = vld [vmem:[%s280_s3] sm:$0xff] }
   0xa   :  { %103 = vmatpush.bf16.msra.mxu0 %v183_v2  ;;  %188 = vmatpush.bf16.msra.mxu1 %v183_v2 }
   0xe   :  { %104 = vmatpush.bf16.msra.mxu0 %v182_v3  ;;  %189 = vmatpush.bf16.msra.mxu1 %v182_v3 }
  0x12   :  { %105 = vmatpush.bf16.msra.mxu0 %v181_v4  ;;  %190 = vmatpush.bf16.msra.mxu1 %v181_v4 }
  0x16   :  { %106 = vmatpush.bf16.msra.mxu0 %v180_v5  ;;  %191 = vmatpush.bf16.msra.mxu1 %v180_v5 }
  0x1a   :  { %107 = vmatpush.bf16.msra.mxu0 %v179_v6  ;;  %192 = vmatpush.bf16.msra.mxu1 %v179_v6 }
  0x1e   :  { %108 = vmatpush.bf16.msra.mxu0 %v178_v7  ;;  %193 = vmatpush.bf16.msra.mxu1 %v178_v7 }
  0x21   :  { %109 = vmatmul.bf16.vlgmr.msra.gmra.mxu0 %v176_v8  ;;  %114 = vmatmul.bf16.vlgmr.msra.gmra.mxu1 %v177_v9 }
  0x9e   :  { %v110_v11 = vpop.f32.mrf.mxu0  ;;  %v115_v13 = vpop.f32.mrf.mxu1 }
  0x9f   :  { %v111_v15 = vadd.f32 %v194_v10, %v110_v11  ;;  %v116_v16 = vadd.f32 %v194_v10, %v115_v13 }
  0xa1   :  { %v124_v17 = vadd.f32 %v120_v12, %v111_v15  ;;  %v126_v18 = vadd.f32 %v122_v14, %v116_v16 }
  0xa3   :  { %128 = vst [vmem:[%s281_s4] sm:$0xff] %v124_v17 }
  0xa4   :  { %130 = vst [vmem:[%s281_s4 + $0x10] sm:$0xff] %v126_v18 }
  0xa6   :  { %v112_v19 = vpop.f32.mrf.mxu0  ;;  %v117_v21 = vpop.f32.mrf.mxu1 }
  0xa7   :  { %v113_v23 = vadd.f32 %v194_v10, %v112_v19  ;;  %v118_v24 = vadd.f32 %v194_v10, %v117_v21 }
  0xa9   :  { %v125_v25 = vadd.f32 %v121_v20, %v113_v23  ;;  %v127_v26 = vadd.f32 %v123_v22, %v118_v24 }
  0xab   :  { %129 = vst [vmem:[%s281_s4 + $0x8] sm:$0xff] %v125_v25 }
  0xac   :  { %131 = vst [vmem:[%s281_s4 + $0x18] sm:$0xff] %v127_v26 }

// kernel: _lambda_.17
= control target key start
LH: loop header
LB: loop body
LE: loop exit
PB: predicated region body
PF: predicated region fallthrough
CT: control target
= control target key end

     0   :  { %s1155_s18 = smov 0   ;;  %s1157_s19 = smov 0   ;;  %s1361_s0 = inlined_call_operand.vmem [shape: f32[32,128], index: 0, kind: input, shape index: {}]   ;;  %s1362_s1 = inlined_call_operand.vmem [shape: f32[1,128], index: 1, kind: input, shape index: {}]   ;;  %s1363_s2 = inlined_call_operand.vmem [shape: f32[1,128], index: 2, kind: input, shape index: {}]   ;;  %s1364_s3 = inlined_call_operand.vmem [shape: bf16[128,512], index: 3, kind: input, shape index: {}]   ;;  %s1365_s4 = inlined_call_operand.vmem [shape: f32[1,512], index: 4, kind: input, shape index: {}]   ;;  %s1366_s5 = inlined_call_operand.vmem [shape: bf16[32,512], index: 5, kind: output, shape index: {}]  }
   0x1   :  { %s1159_s20 = smov 0   ;;  %s1161_s21 = smov 0  }
   0x2   :  { %s1163_s22 = smov 0  }
   0x3 LB: > { %s24_s23 = sadd.s32 1, %s1118_s21  ;;  %s878_s24 = sadd.s32 4294967295, %s1122_s22   ;;  %s1122_s22 = sphi %s1163_s22, %s15_s22   ;;  %s1118_s21 = sphi %s1161_s21, %s1371_s21   ;;  %s1114_s20 = sphi %s1159_s20, %s1370_s20   ;;  %s1110_s19 = sphi %s1157_s19, %s1369_s19   ;;  %s1106_s18 = sphi %s1155_s18, %s1368_s18  }
   0x4   : > { %p25_p0 = scmp.ge.s32.totalorder %s24_s23, 2  ;;  %p109_p1 = scmp.ne.s32.totalorder %s1110_s19, %s1106_s18 }
   0x5   : > { %p110_p2 = scmp.eq.s32.totalorder %s1122_s22, 0  ;;  %p167_p4 = scmp.eq.s32.totalorder %s878_s24, 1 }
   0x6   : > { %s1373_s23 = smov (%p25_p0, %s24_s23), 0  ;;  %s102_s26 = sadd.s32 1, %s1110_s19 }
   0x7   : > { %p111_p3 = por %p110_p2, %p109_p1  ;;  %s99_s25 = ssub.s32 %s1118_s21, %s1373_s23 }
   0x8   : > { %p100_p5 = scmp.eq.s32.totalorder %s99_s25, 0  ;;  %p1190_p6 = por %p167_p4, %p109_p1 }
   0x9   : > { %p882_p7 = scmp.ge.s32.totalorder %s1122_s22, 2 }
   0xa   : > { %s1195_s28 = scalar_select %p100_p5, %s1110_s19, %s102_s26  }
   0xb   : > { %204 = sbr.rel (%p882_p7) target bundleno = 36 (0x24), region = 28 }
  0x10   : > { %207 = sbr.rel (!%p111_p3) target bundleno = 36 (0x24), region = 32  ;;  %s209_s29 = sand.u32 (%p111_p3), 1, %s1110_s19  }
  0x11   : > { %s968_s30 = sshll.u32 (%p111_p3), %s1118_s21, 3  ;;  %s883_s6 = sshll.u32 (%p111_p3), %s209_s29, 7 }
  0x12   : > { %s1203_s9 = scalar_lea.vmem (%p111_p3), %s1364_s3, %s968_s30  ;;  %s211_s10 = scalar_lea.vmem (%p111_p3), [#allocation3], %s883_s6 }
  0x13   : > { %v273_v0 = vld [vmem:[%s1203_s9] sm:$0xff] (%p111_p3)  ;;  %v275_v1 = vld [vmem:[%s1203_s9 + $0x10] sm:$0xff] (%p111_p3) }
  0x14   : > { %v277_v2 = vld [vmem:[%s1203_s9 + $0x20] sm:$0xff] (%p111_p3)  ;;  %274 = vst [vmem:[%s211_s10] sm:$0xff] (%p111_p3), %v273_v0  ;;  %v279_v3 = vld [vmem:[%s1203_s9 + $0x30] sm:$0xff] (%p111_p3) }
  0x15   : > { %276 = vst [vmem:[%s211_s10 + $0x8] sm:$0xff] %v275_v1  ;;  %v281_v4 = vld [vmem:[%s1203_s9 + $0x40] sm:$0xff]  ;;  %v283_v5 = vld [vmem:[%s1203_s9 + $0x50] sm:$0xff] }
  0x16   : > { %278 = vst [vmem:[%s211_s10 + $0x10] sm:$0xff] %v277_v2  ;;  %v285_v6 = vld [vmem:[%s1203_s9 + $0x60] sm:$0xff]  ;;  %v287_v7 = vld [vmem:[%s1203_s9 + $0x70] sm:$0xff] }
  0x17   : > { %280 = vst [vmem:[%s211_s10 + $0x18] sm:$0xff] %v279_v3  ;;  %v289_v8 = vld [vmem:[%s1203_s9 + $0x80] sm:$0xff]  ;;  %v291_v9 = vld [vmem:[%s1203_s9 + $0x90] sm:$0xff] }
  0x18   : > { %282 = vst [vmem:[%s211_s10 + $0x20] sm:$0xff] %v281_v4  ;;  %v293_v10 = vld [vmem:[%s1203_s9 + $0xa0] sm:$0xff]  ;;  %v295_v11 = vld [vmem:[%s1203_s9 + $0xb0] sm:$0xff] }
  0x19   : > { %284 = vst [vmem:[%s211_s10 + $0x28] sm:$0xff] %v283_v5  ;;  %v297_v12 = vld [vmem:[%s1203_s9 + $0xc0] sm:$0xff]  ;;  %v299_v13 = vld [vmem:[%s1203_s9 + $0xd0] sm:$0xff] }
  0x1a   : > { %286 = vst [vmem:[%s211_s10 + $0x30] sm:$0xff] %v285_v6  ;;  %v301_v14 = vld [vmem:[%s1203_s9 + $0xe0] sm:$0xff]  ;;  %v303_v15 = vld [vmem:[%s1203_s9 + $0xf0] sm:$0xff] }
  0x1b   : > { %288 = vst [vmem:[%s211_s10 + $0x38] sm:$0xff] %v287_v7 }
  0x1c   : > { %290 = vst [vmem:[%s211_s10 + $0x40] sm:$0xff] %v289_v8 }
  0x1d   : > { %292 = vst [vmem:[%s211_s10 + $0x48] sm:$0xff] %v291_v9 }
  0x1e   : > { %294 = vst [vmem:[%s211_s10 + $0x50] sm:$0xff] %v293_v10 }
  0x1f   : > { %296 = vst [vmem:[%s211_s10 + $0x58] sm:$0xff] %v295_v11 }
  0x20   : > { %298 = vst [vmem:[%s211_s10 + $0x60] sm:$0xff] %v297_v12 }
  0x21   : > { %300 = vst [vmem:[%s211_s10 + $0x68] sm:$0xff] %v299_v13 }
  0x22   : > { %302 = vst [vmem:[%s211_s10 + $0x70] sm:$0xff] %v301_v14 }
  0x23   : > { %304 = vst [vmem:[%s211_s10 + $0x78] sm:$0xff] %v303_v15 }
  0x24 PF: > { %p886_p8 = scmp.ge.s32.totalorder %s1122_s22, 1  ;;  %p317_p9 = scmp.lt.s32.totalorder %s1122_s22, 3 }
  0x26   : > { %p318_p10 = pnand %p886_p8, %p317_p9 }
  0x27   : > { %s324_s11 = sand.u32 (!%p318_p10), 1, %s1106_s18   ;;  %s889_s12 = sshll.u32 (!%p318_p10), %s1114_s20, 1 }
  0x28   : > { %321 = sbr.rel (%p318_p10) target bundleno = 538 (0x21a), region = 74  ;;  %s887_s13 = sshll.u32 (!%p318_p10), %s324_s11, 7 }
  0x29   : > { %s888_s14 = sshll.u32 (!%p318_p10), %s324_s11, 5  ;;  %p367_p11 = scmp.lt.s32.totalorder (!%p318_p10), %s889_s12, 3 }
  0x2a   : > { %s1231_s24 = scalar_lea.vmem (!%p318_p10), [#allocation3], %s887_s13  ;;  %s1233_s25 = scalar_lea.vmem (!%p318_p10), [#allocation4], %s888_s14 }
  0x2b   : > { %p890_p12 = scmp.ne.s32.totalorder (!%p318_p10), %s1114_s20, 0 }
  0x2d   : > { %s1375_s12 = smov (!%p367_p11, %s889_s12), 3  ;;  %376 = sbr.rel (%p890_p12) target bundleno = 329 (0x149), region = 82 }
  0x2e   : > { %s369_s17 = scalar_lea.vmem %s1365_s4, %s1375_s12 }
  0x32   : > { %v379_v16 = vld [vmem:[%s1361_s0 + $0x10] sm:$0xff]  ;;  %v377_v17 = vld [vmem:[%s1361_s0] sm:$0xff]  ;;  %v380_v18 = vld [vmem:[%s1361_s0 + $0x18] sm:$0xff]  ;;  %v1124_v20 = vmov 128.0  }
  0x33   : > { %385 = vadd.xlane.f32.xlu1 %v379_v16  ;;  %381 = vadd.xlane.f32.xlu0 %v377_v17  ;;  %v378_v19 = vld [vmem:[%s1361_s0 + $0x8] sm:$0xff]  ;;  %1058 = vrcp.f32 %v1124_v20  ;;  %v1056_v14 = vld [vmem:[%s1362_s1] ss:$0 sm:$0xff] }
  0x39   : > { %v1059_v21 = vpop.eup %1058 }
  0x3a   : > { %v390_v22 = vmul.f32 128.0, %v1059_v21  ;;  %vm394_vm0 = vweird.f32 %v1059_v21 }
  0x3b   : > { %387 = vadd.xlane.f32.xlu1 %v380_v18  ;;  %383 = vadd.xlane.f32.xlu0 %v378_v19 }
  0x3c   : > { %v391_v23 = vsub.f32 1.0, %v390_v22 }
  0x3e   : > { %v392_v24 = vmul.f32 %v1059_v21, %v391_v23 }
  0x40   : > { %v393_v25 = vadd.f32 %v1059_v21, %v392_v24 }
  0x42   : > { %v395_v26 = vsel %vm394_vm0, %v1059_v21, %v393_v25  ;;  %v1057_v21 = vld [vmem:[%s1363_s2] ss:$0 sm:$0xff] }
  0xa6   : > { %v386_v27 = vpop.xlane.xlu1 %385  ;;  %v382_v28 = vpop.xlane.xlu0 %381 }
  0xa7   : > { %v398_v29 = vmul.f32 %v395_v26, %v386_v27  ;;  %v396_v30 = vmul.f32 %v395_v26, %v382_v28 }
  0xa9   : > { %v1248_v31 = vsub.f32 %v379_v16, %v398_v29  ;;  %v1250_v32 = vsub.f32 %v377_v17, %v396_v30 }
  0xab   : > { %v406_v33 = vmul.f32 %v1248_v31, %v1248_v31  ;;  %v404_v34 = vmul.f32 %v1250_v32, %v1250_v32 }
  0xad   : > { %412 = vadd.xlane.f32.xlu0 %v406_v33  ;;  %408 = vadd.xlane.f32.xlu2 %v404_v34 }
  0xae   : > { %v388_v35 = vpop.xlane.xlu1 %387  ;;  %v384_v36 = vpop.xlane.xlu0 %383 }
  0xaf   : > { %v399_v37 = vmul.f32 %v395_v26, %v388_v35  ;;  %v397_v38 = vmul.f32 %v395_v26, %v384_v36 }
  0xb1   : > { %v1256_v39 = vsub.f32 %v380_v18, %v399_v37  ;;  %v1258_v40 = vsub.f32 %v378_v19, %v397_v38 }
  0xb3   : > { %v407_v41 = vmul.f32 %v1256_v39, %v1256_v39  ;;  %v405_v42 = vmul.f32 %v1258_v40, %v1258_v40 }
  0xb5   : > { %414 = vadd.xlane.f32.xlu1 %v407_v41  ;;  %410 = vadd.xlane.f32.xlu2 %v405_v42 }
 0x120   : > { %v409_v43 = vpop.xlane.xlu2 %408  ;;  %v413_v44 = vpop.xlane.xlu0 %412 }
 0x121   : > { %v416_v45 = vmul.f32 %v409_v43, %v395_v26  ;;  %v418_v46 = vmul.f32 %v413_v44, %v395_v26 }
 0x123   : > { %v420_v47 = vadd.f32 1e-05, %v416_v45  ;;  %v422_v48 = vadd.f32 1e-05, %v418_v46 }
 0x125   : > { %1060 = vrsqrt.f32 %v420_v47  ;;  %vm450_vm3 = vweird.f32 %v422_v48  ;;  %vm430_vm4 = vweird.f32 %v420_v47 }
 0x126   : > { %1062 = vrsqrt.f32 %v422_v48 }
 0x128   : > { %v415_v49 = vpop.xlane.xlu1 %414  ;;  %v411_v50 = vpop.xlane.xlu2 %410 }
 0x129   : > { %v419_v51 = vmul.f32 %v415_v49, %v395_v26  ;;  %v417_v52 = vmul.f32 %v411_v50, %v395_v26 }
 0x12b   : > { %v1061_v53 = vpop.eup %1060  ;;  %v423_v54 = vadd.f32 1e-05, %v419_v51  ;;  %v421_v55 = vadd.f32 1e-05, %v417_v52 }
 0x12c   : > { %v1063_v56 = vpop.eup %1062  ;;  %v425_v57 = vmul.f32 %v1061_v53, %v420_v47  ;;  %vm431_vm2 = vweird.f32 %v1061_v53 }
 0x12d   : > { %v445_v58 = vmul.f32 %v1063_v56, %v422_v48  ;;  %1064 = vrsqrt.f32 %v423_v54  ;;  %vm451_vm1 = vweird.f32 %v1063_v56  ;;  %vm432_vm6 = vmor %vm430_vm4, %vm431_vm2  ;;  %vm460_vm9 = vweird.f32 %v423_v54 }
 0x12e   : > { %v426_v59 = vmul.f32 %v1061_v53, %v425_v57  ;;  %1066 = vrsqrt.f32 %v421_v55  ;;  %vm452_vm5 = vmor %vm450_vm3, %vm451_vm1  ;;  %vm440_vm11 = vweird.f32 %v421_v55 }
 0x12f   : > { %v446_v60 = vmul.f32 %v1063_v56, %v445_v58 }
 0x130   : > { %v427_v61 = vmul.f32 0.5, %v426_v59 }
 0x131   : > { %v447_v62 = vmul.f32 0.5, %v446_v60 }
 0x132   : > { %v428_v63 = vsub.f32 1.5, %v427_v61 }
 0x133   : > { %v1065_v0 = vpop.eup %1064  ;;  %v448_v1 = vsub.f32 1.5, %v447_v62 }
 0x134   : > { %v1067_v2 = vpop.eup %1066  ;;  %v455_v3 = vmul.f32 %v1065_v0, %v423_v54  ;;  %v429_v4 = vmul.f32 %v1061_v53, %v428_v63  ;;  %vm461_vm7 = vweird.f32 %v1065_v0 }
 0x135   : > { %v449_v5 = vmul.f32 %v1063_v56, %v448_v1  ;;  %v435_v6 = vmul.f32 %v1067_v2, %v421_v55  ;;  %vm441_vm8 = vweird.f32 %v1067_v2  ;;  %vm462_vm10 = vmor %vm460_vm9, %vm461_vm7 }
 0x136   : > { %v456_v7 = vmul.f32 %v1065_v0, %v455_v3  ;;  %v433_v11 = vsel %vm432_vm6, %v1061_v53, %v429_v4  ;;  %vm442_vm12 = vmor %vm440_vm11, %vm441_vm8 }
 0x137   : > { %v436_v8 = vmul.f32 %v1067_v2, %v435_v6  ;;  %v453_v9 = vsel %vm452_vm5, %v1063_v56, %v449_v5  ;;  %v464_v17 = vmul.f32 %v433_v11, %v1250_v32 }
 0x138   : > { %v457_v10 = vmul.f32 0.5, %v456_v7  ;;  %v466_v15 = vmul.f32 %v453_v9, %v1248_v31 }
 0x139   : > { %v437_v12 = vmul.f32 0.5, %v436_v8  ;;  %v472_v25 = vmul.f32 %v1056_v14, %v464_v17 }
 0x13a   : > { %v458_v13 = vsub.f32 1.5, %v457_v10  ;;  %v474_v22 = vmul.f32 %v1056_v14, %v466_v15 }
 0x13b   : > { %v438_v16 = vsub.f32 1.5, %v437_v12  ;;  %v480_v31 = vadd.f32 %v1057_v21, %v472_v25 }
 0x13c   : > { %v459_v18 = vmul.f32 %v1065_v0, %v458_v13  ;;  %v482_v29 = vadd.f32 %v1057_v21, %v474_v22 }
 0x13d   : > { %v439_v19 = vmul.f32 %v1067_v2, %v438_v16 }
 0x13e   : > { %v463_v20 = vsel %vm462_vm10, %v1065_v0, %v459_v18 }
 0x13f   : > { %v467_v23 = vmul.f32 %v463_v20, %v1256_v39  ;;  %v443_v24 = vsel %vm442_vm12, %v1067_v2, %v439_v19 }
 0x140   : > { %v465_v26 = vmul.f32 %v443_v24, %v1258_v40 }
 0x141   : > { %v475_v27 = vmul.f32 %v1056_v14, %v467_v23 }
 0x142   : > { %v473_v28 = vmul.f32 %v1056_v14, %v465_v26 }
 0x143   : > { %v483_v30 = vadd.f32 %v1057_v21, %v475_v27 }
 0x144   : > { %v481_v32 = vadd.f32 %v1057_v21, %v473_v28 }
 0x145   : > { %v996_v33 = vpack.c.bf16 %v483_v30, %v482_v29 }
 0x146   : > { %v991_v34 = vpack.c.bf16 %v481_v32, %v480_v31 }
 0x147   : > { %998 = vst [vmem:[#allocation2 + $0x8] sm:$0xff] %v996_v33  }
 0x148   : > { %992 = vst [vmem:[#allocation2] sm:$0xff] %v991_v34  }
 0x149 PF: > { %v957_v35 = vld [vmem:[%s1231_s24 + $0x70] sm:$0xf]  ;;  %v986_v36 = vld [vmem:[%s1231_s24 + $0x74] sm:$0xf0]  ;;  %v985_v37 = vld [vmem:[%s1231_s24 + $0x74] sm:$0xf] }
 0x14a   : > { %v958_v38 = vor.u32 %v986_v36, %v957_v35  ;;  %v959_v39 = vld [vmem:[%s1231_s24 + $0x78] sm:$0xf0]  ;;  %v949_v40 = vld [vmem:[%s1231_s24 + $0x60] sm:$0xf]  ;;  %v984_v41 = vld [vmem:[%s1231_s24 + $0x64] sm:$0xf0] }
 0x14b   : > { %v962_v42 = vor.u32 %v985_v37, %v959_v39  ;;  %v983_v43 = vld [vmem:[%s1231_s24 + $0x64] sm:$0xf]  ;;  %v951_v44 = vld [vmem:[%s1231_s24 + $0x68] sm:$0xf0]  ;;  %v950_v45 = vor.u32 %v984_v41, %v949_v40  ;;  %v941_v47 = vld [vmem:[%s1231_s24 + $0x50] sm:$0xf] }
 0x14c   : > { %610 = vmatpush.bf16.msra.mxu0 %v958_v38  ;;  %999 = vmatpush.bf16.msra.mxu2 %v958_v38  ;;  %v954_v46 = vor.u32 %v983_v43, %v951_v44  ;;  %v982_v48 = vld [vmem:[%s1231_s24 + $0x54] sm:$0xf0]  ;;  %v981_v49 = vld [vmem:[%s1231_s24 + $0x54] sm:$0xf]  ;;  %v943_v50 = vld [vmem:[%s1231_s24 + $0x58] sm:$0xf0] }
 0x14d   : > { %629 = vmatpush.bf16.msra.mxu1 %v962_v42  ;;  %1007 = vmatpush.bf16.msra.mxu3 %v962_v42  ;;  %v942_v51 = vor.u32 %v982_v48, %v941_v47  ;;  %v946_v52 = vor.u32 %v981_v49, %v943_v50  ;;  %v933_v53 = vld [vmem:[%s1231_s24 + $0x40] sm:$0xf]  ;;  %v980_v54 = vld [vmem:[%s1231_s24 + $0x44] sm:$0xf0]  ;;  %v979_v55 = vld [vmem:[%s1231_s24 + $0x44] sm:$0xf] }
 0x14e   : > { %v935_v56 = vld [vmem:[%s1231_s24 + $0x48] sm:$0xf0]  ;;  %v934_v57 = vor.u32 %v980_v54, %v933_v53  ;;  %v925_v59 = vld [vmem:[%s1231_s24 + $0x30] sm:$0xf]  ;;  %v978_v60 = vld [vmem:[%s1231_s24 + $0x34] sm:$0xf0] }
 0x14f   : > { %v938_v58 = vor.u32 %v979_v55, %v935_v56  ;;  %v977_v61 = vld [vmem:[%s1231_s24 + $0x34] sm:$0xf]  ;;  %v927_v62 = vld [vmem:[%s1231_s24 + $0x38] sm:$0xf0]  ;;  %v926_v63 = vor.u32 %v978_v60, %v925_v59  ;;  %v917_v1 = vld [vmem:[%s1231_s24 + $0x20] sm:$0xf] }
 0x150   : > { %611 = vmatpush.bf16.msra.mxu0 %v950_v45  ;;  %1000 = vmatpush.bf16.msra.mxu2 %v950_v45  ;;  %v930_v0 = vor.u32 %v977_v61, %v927_v62  ;;  %v976_v2 = vld [vmem:[%s1231_s24 + $0x24] sm:$0xf0]  ;;  %v975_v3 = vld [vmem:[%s1231_s24 + $0x24] sm:$0xf]  ;;  %v919_v4 = vld [vmem:[%s1231_s24 + $0x28] sm:$0xf0] }
 0x151   : > { %630 = vmatpush.bf16.msra.mxu1 %v954_v46  ;;  %1008 = vmatpush.bf16.msra.mxu3 %v954_v46  ;;  %v918_v5 = vor.u32 %v976_v2, %v917_v1  ;;  %v922_v6 = vor.u32 %v975_v3, %v919_v4  ;;  %v909_v7 = vld [vmem:[%s1231_s24 + $0x10] sm:$0xf]  ;;  %v974_v8 = vld [vmem:[%s1231_s24 + $0x14] sm:$0xf0]  ;;  %v973_v9 = vld [vmem:[%s1231_s24 + $0x14] sm:$0xf] }
 0x152   : > { %v911_v10 = vld [vmem:[%s1231_s24 + $0x18] sm:$0xf0]  ;;  %v910_v11 = vor.u32 %v974_v8, %v909_v7  ;;  %v901_v13 = vld [vmem:[%s1231_s24] sm:$0xf]  ;;  %v972_v14 = vld [vmem:[%s1231_s24 + $0x4] sm:$0xf0] }
 0x153   : > { %v914_v12 = vor.u32 %v973_v9, %v911_v10  ;;  %v971_v15 = vld [vmem:[%s1231_s24 + $0x4] sm:$0xf]  ;;  %v903_v16 = vld [vmem:[%s1231_s24 + $0x8] sm:$0xf0]  ;;  %v902_v17 = vor.u32 %v972_v14, %v901_v13  ;;  %v969_v19 = vld [vmem:[#allocation2] sm:$0xff]  ;;  %s987_s12 = sshll.u32 (%p1190_p6), %s1114_s20, 3 }
 0x154   : > { %612 = vmatpush.bf16.msra.mxu0 %v942_v51  ;;  %1001 = vmatpush.bf16.msra.mxu2 %v942_v51  ;;  %v906_v18 = vor.u32 %v971_v15, %v903_v16  ;;  %v970_v20 = vld [vmem:[#allocation2 + $0x8] sm:$0xff]  ;;  %v512_v21 = vld [vmem:[%s369_s17] sm:$0x3]  ;;  %s740_s26 = scalar_lea.vmem (%p1190_p6), %s1366_s5, %s987_s12 }
 0x155   : > { %631 = vmatpush.bf16.msra.mxu1 %v946_v52  ;;  %1009 = vmatpush.bf16.msra.mxu3 %v946_v52  ;;  %v514_v22 = vperm.slane %v512_v21, 0  ;;  %v515_v23 = vperm.slane %v512_v21, 1 }
 0x158   : > { %613 = vmatpush.bf16.msra.mxu0 %v934_v57  ;;  %1002 = vmatpush.bf16.msra.mxu2 %v934_v57 }
 0x159   : > { %632 = vmatpush.bf16.msra.mxu1 %v938_v58  ;;  %1010 = vmatpush.bf16.msra.mxu3 %v938_v58 }
 0x15c   : > { %614 = vmatpush.bf16.msra.mxu0 %v926_v63  ;;  %1003 = vmatpush.bf16.msra.mxu2 %v926_v63 }
 0x15d   : > { %633 = vmatpush.bf16.msra.mxu1 %v930_v0  ;;  %1011 = vmatpush.bf16.msra.mxu3 %v930_v0 }
 0x160   : > { %615 = vmatpush.bf16.msra.mxu0 %v918_v5  ;;  %1004 = vmatpush.bf16.msra.mxu2 %v918_v5 }
 0x161   : > { %634 = vmatpush.bf16.msra.mxu1 %v922_v6  ;;  %1012 = vmatpush.bf16.msra.mxu3 %v922_v6 }
 0x164   : > { %616 = vmatpush.bf16.msra.mxu0 %v910_v11  ;;  %1005 = vmatpush.bf16.msra.mxu2 %v910_v11 }
 0x165   : > { %635 = vmatpush.bf16.msra.mxu1 %v914_v12  ;;  %1013 = vmatpush.bf16.msra.mxu3 %v914_v12 }
 0x168   : > { %617 = vmatpush.bf16.msra.mxu0 %v902_v17  ;;  %1006 = vmatpush.bf16.msra.mxu2 %v902_v17 }
 0x169   : > { %636 = vmatpush.bf16.msra.mxu1 %v906_v18  ;;  %1014 = vmatpush.bf16.msra.mxu3 %v906_v18 }
 0x16b   : > { %618 = vmatmul.bf16.vlgmr.msra.gmra.mxu0 %v969_v19  ;;  %623 = vmatmul.bf16.vlgmr.msra.gmra.mxu2 %v970_v20 }
 0x16c   : > { %637 = vmatmul.bf16.vlgmr.msra.gmra.mxu1 %v969_v19  ;;  %642 = vmatmul.bf16.vlgmr.msra.gmra.mxu3 %v970_v20 }
 0x1e8   : > { %v619_v24 = vpop.f32.mrf.mxu0 }
 0x1e9   : > { %v620_v25 = vadd.f32 %v619_v24, %v514_v22  ;;  %v638_v26 = vpop.f32.mrf.mxu1 }
 0x1ea   : > { %v639_v27 = vadd.f32 %v638_v26, %v515_v23 }
 0x1eb   : > { %v656_v28 = vmul.f32 0.044715, %v620_v25  ;;  %v648_v7 = vmul.f32 0.5, %v620_v25 }
 0x1ec   : > { %v657_v29 = vmul.f32 0.044715, %v639_v27  ;;  %v649_v14 = vmul.f32 0.5, %v639_v27 }
 0x1ed   : > { %v664_v30 = vmul.f32 %v656_v28, %v620_v25 }
 0x1ee   : > { %v665_v31 = vmul.f32 %v657_v29, %v639_v27  ;;  %v624_v32 = vpop.f32.mrf.mxu2 }
 0x1ef   : > { %v672_v33 = vmul.f32 %v664_v30, %v620_v25  ;;  %v625_v34 = vadd.f32 %v624_v32, %v514_v22  ;;  %v643_v35 = vpop.f32.mrf.mxu3 }
 0x1f0   : > { %v673_v36 = vmul.f32 %v665_v31, %v639_v27  ;;  %v1311_v37 = vadd.f32 %v643_v35, %v515_v23  ;;  %v621_v38 = vpop.f32.mrf.mxu0 }
 0x1f1   : > { %v680_v39 = vadd.f32 %v672_v33, %v620_v25  ;;  %v660_v40 = vmul.f32 0.044715, %v625_v34  ;;  %v1313_v41 = vadd.f32 %v621_v38, %v514_v22  ;;  %v640_v42 = vpop.f32.mrf.mxu1  ;;  %v652_v26 = vmul.f32 0.5, %v625_v34 }
 0x1f2   : > { %v681_v43 = vadd.f32 %v673_v36, %v639_v27  ;;  %v661_v44 = vmul.f32 0.044715, %v1311_v37  ;;  %v1316_v45 = vadd.f32 %v640_v42, %v515_v23  ;;  %v653_v27 = vmul.f32 0.5, %v1311_v37 }
 0x1f3   : > { %v688_v46 = vmul.f32 0.7978846, %v680_v39  ;;  %v668_v47 = vmul.f32 %v660_v40, %v625_v34  ;;  %v658_v48 = vmul.f32 0.044715, %v1313_v41  ;;  %v650_v35 = vmul.f32 0.5, %v1313_v41 }
 0x1f4   : > { %v689_v49 = vmul.f32 0.7978846, %v681_v43  ;;  %v669_v50 = vmul.f32 %v661_v44, %v1311_v37  ;;  %v659_v51 = vmul.f32 0.044715, %v1316_v45  ;;  %v651_v39 = vmul.f32 0.5, %v1316_v45 }
 0x1f5   : > { %1068 = vtanh.f32 %v688_v46  ;;  %v676_v52 = vmul.f32 %v668_v47, %v625_v34  ;;  %v666_v53 = vmul.f32 %v658_v48, %v1313_v41 }
 0x1f6   : > { %1070 = vtanh.f32 %v689_v49  ;;  %v677_v54 = vmul.f32 %v669_v50, %v1311_v37  ;;  %v667_v55 = vmul.f32 %v659_v51, %v1316_v45  ;;  %v626_v56 = vpop.f32.mrf.mxu2 }
 0x1f7   : > { %v684_v57 = vadd.f32 %v676_v52, %v625_v34  ;;  %v674_v58 = vmul.f32 %v666_v53, %v1313_v41  ;;  %v627_v59 = vadd.f32 %v626_v56, %v514_v22  ;;  %v645_v60 = vpop.f32.mrf.mxu3 }
 0x1f8   : > { %v685_v61 = vadd.f32 %v677_v54, %v1311_v37  ;;  %v675_v62 = vmul.f32 %v667_v55, %v1316_v45  ;;  %v646_v63 = vadd.f32 %v645_v60, %v515_v23 }
 0x1f9   : > { %v692_v0 = vmul.f32 0.7978846, %v684_v57  ;;  %v682_v1 = vadd.f32 %v674_v58, %v1313_v41  ;;  %v662_v2 = vmul.f32 0.044715, %v627_v59  ;;  %v654_v47 = vmul.f32 0.5, %v627_v59 }
 0x1fa   : > { %v693_v3 = vmul.f32 0.7978846, %v685_v61  ;;  %v683_v4 = vadd.f32 %v675_v62, %v1316_v45  ;;  %v663_v5 = vmul.f32 0.044715, %v646_v63  ;;  %v655_v49 = vmul.f32 0.5, %v646_v63 }
 0x1fb   : > { %v1069_v6 = vpop.eup %1068  ;;  %1072 = vtanh.f32 %v692_v0  ;;  %v690_v8 = vmul.f32 0.7978846, %v682_v1  ;;  %v670_v9 = vmul.f32 %v662_v2, %v627_v59 }
 0x1fc   : > { %v1071_v10 = vpop.eup %1070  ;;  %v704_v11 = vadd.f32 1.0, %v1069_v6  ;;  %1074 = vtanh.f32 %v693_v3  ;;  %v691_v12 = vmul.f32 0.7978846, %v683_v4  ;;  %v671_v13 = vmul.f32 %v663_v5, %v646_v63 }
 0x1fd   : > { %v705_v15 = vadd.f32 1.0, %v1071_v10  ;;  %1076 = vtanh.f32 %v690_v8  ;;  %v678_v16 = vmul.f32 %v670_v9, %v627_v59 }
 0x1fe   : > { %v712_v17 = vmul.f32 %v704_v11, %v648_v7  ;;  %1078 = vtanh.f32 %v691_v12  ;;  %v679_v18 = vmul.f32 %v671_v13, %v646_v63 }
 0x1ff   : > { %v713_v19 = vmul.f32 %v705_v15, %v649_v14  ;;  %v686_v20 = vadd.f32 %v678_v16, %v627_v59 }
 0x200   : > { %v687_v21 = vadd.f32 %v679_v18, %v646_v63 }
 0x201   : > { %v1073_v22 = vpop.eup %1072  ;;  %v720_v23 = vpack.c.bf16 %v713_v19, %v712_v17  ;;  %v694_v24 = vmul.f32 0.7978846, %v686_v20 }
 0x202   : > { %v1075_v25 = vpop.eup %1074  ;;  %v708_v28 = vadd.f32 1.0, %v1073_v22  ;;  %v695_v29 = vmul.f32 0.7978846, %v687_v21 }
 0x203   : > { %v1077_v30 = vpop.eup %1076  ;;  %724 = vst [vmem:[%s1233_s25] sm:$0xff] %v720_v23  ;;  %v709_v31 = vadd.f32 1.0, %v1075_v25  ;;  %1080 = vtanh.f32 %v694_v24 }
 0x204   : > { %v1079_v32 = vpop.eup %1078  ;;  %v716_v33 = vmul.f32 %v708_v28, %v652_v26  ;;  %v706_v36 = vadd.f32 1.0, %v1077_v30  ;;  %1082 = vtanh.f32 %v695_v29 }
 0x205   : > { %v717_v38 = vmul.f32 %v709_v31, %v653_v27  ;;  %v707_v34 = vadd.f32 1.0, %v1079_v32 }
 0x206   : > { %v714_v40 = vmul.f32 %v706_v36, %v650_v35 }
 0x207   : > { %v722_v42 = vpack.c.bf16 %v717_v38, %v716_v33  ;;  %v715_v43 = vmul.f32 %v707_v34, %v651_v39 }
 0x209   : > { %v1081_v44 = vpop.eup %1080  ;;  %726 = vst [vmem:[%s1233_s25 + $0x10] sm:$0xff] %v722_v42  ;;  %v721_v37 = vpack.c.bf16 %v715_v43, %v714_v40 }
 0x20a   : > { %v1083_v46 = vpop.eup %1082  ;;  %v710_v48 = vadd.f32 1.0, %v1081_v44  ;;  %v775_v45 = vld [vmem:[%s1233_s25] sm:$0xff] (%p1190_p6) }
 0x20b   : > { %725 = vst [vmem:[%s1233_s25 + $0x8] sm:$0xff] %v721_v37  ;;  %v711_v50 = vadd.f32 1.0, %v1083_v46 }
 0x20c   : > { %v718_v41 = vmul.f32 %v710_v48, %v654_v47  ;;  %776 = vst [vmem:[%s740_s26] sm:$0xff] (%p1190_p6), %v775_v45 }
 0x20d   : > { %v719_v51 = vmul.f32 %v711_v50, %v655_v49  ;;  %734 = sbr.rel (!%p1190_p6) target bundleno = 538 (0x21a), region = 86 }
 0x20f   : > { %v723_v52 = vpack.c.bf16 %v719_v51, %v718_v41 }
 0x210   : > { %v779_v54 = vld [vmem:[%s1233_s25 + $0x10] sm:$0xff] (%p1190_p6) }
 0x211   : > { %727 = vst [vmem:[%s1233_s25 + $0x18] sm:$0xff] %v723_v52 }
 0x212   : > { %v777_v53 = vld [vmem:[%s1233_s25 + $0x8] sm:$0xff]  ;;  %780 = vst [vmem:[%s740_s26 + $0x20] sm:$0xff] %v779_v54 }
 0x213   : > { %778 = vst [vmem:[%s740_s26 + $0x10] sm:$0xff] %v777_v53 }
 0x218   : > { %v781_v55 = vld [vmem:[%s1233_s25 + $0x18] sm:$0xff] }
 0x219   : > { %782 = vst [vmem:[%s740_s26 + $0x30] sm:$0xff] %v781_v55 }
 0x21a PF: > { %s15_s22 = sadd.s32 1, %s1122_s22   ;;  %s1368_s18 = smov %s1110_s19 }
 0x21b   : > { %p12_p13 = scmp.ge.s32.totalorder %s15_s22, 4   ;;  %s1369_s19 = smov %s1195_s28 }
 0x21c   : > { %s1370_s20 = smov %s1118_s21  ;;  %s1371_s21 = smov %s1373_s23 }
 0x21d   :  { %14 = sbr.rel (!%p12_p13) target bundleno = 3 (0x3), region = 161 }

// kernel: _lambda_.21
= control target key start
LH: loop header
LB: loop body
LE: loop exit
PB: predicated region body
PF: predicated region fallthrough
CT: control target
= control target key end

     0   :  { %9 = vsyncpa [#allocation3], 0  ;;  %s241_s18 = smov [#allocation2]   ;;  %s242_s20 = smov 64   ;;  %s305_s0 = inlined_call_operand.vmem [shape: bf16[32,128], index: 0, kind: input, shape index: {}]   ;;  %s306_s1 = inlined_call_operand.hbm [shape: bf16[128,128], index: 1, kind: input, shape index: {}]   ;;  %s307_s2 = inlined_call_operand.vmem [shape: f32[1,128], index: 2, kind: input, shape index: {}]   ;;  %s308_s3 = inlined_call_operand.vmem [shape: f32[32,128], index: 3, kind: input, shape index: {}]   ;;  %s309_s4 = inlined_call_operand.vmem [shape: f32[32,128], index: 4, kind: output, shape index: {}]  }
   0x1   :  { %s16_s17 = sshll.u32 %s306_s1, 4  ;;  %s18_s19 = sshll.u32 %s241_s18, 4  ;;  %s17_s17 = int_to_ptr.hbm [resolvable:$true] %s16_s17  ;;  %s19_s19 = int_to_ptr.vmem [resolvable:$true] %s18_s19 }
   0x2   :  { %s243_s21 = smov 4  }
   0x3   :  { %24 = dma.hbm_to_vmem [thread:$0]  %s17_s17, 1024, %s19_s19, [#allocation3], %s242_s20, %s242_s20, %s243_s21  }
   0x4   :  { %239 = dma.done.wait [#allocation3], 1024  }
   0x5   :  { %240 = vsyncadd [#allocation3], 4294966272  ;;  %v202_v0 = vld [vmem:[#allocation2 + $0x38] sm:$0xff]  ;;  %v201_v1 = vld [vmem:[#allocation2 + $0x30] sm:$0xff] }
   0x6   :  { %117 = vmatpush.bf16.msra.mxu0 %v202_v0  ;;  %203 = vmatpush.bf16.msra.mxu1 %v202_v0  ;;  %v200_v2 = vld [vmem:[#allocation2 + $0x28] sm:$0xff]  ;;  %v199_v3 = vld [vmem:[#allocation2 + $0x20] sm:$0xff]  ;;  %v198_v4 = vld [vmem:[#allocation2 + $0x18] sm:$0xff] }
   0x7   :  { %v197_v5 = vld [vmem:[#allocation2 + $0x10] sm:$0xff]  ;;  %v196_v6 = vld [vmem:[#allocation2 + $0x8] sm:$0xff]  ;;  %v195_v7 = vld [vmem:[#allocation2] sm:$0xff] }
   0x8   :  { %v193_v8 = vld [vmem:[%s305_s0] sm:$0xff]  ;;  %v194_v9 = vld [vmem:[%s305_s0 + $0x8] sm:$0xff]  ;;  %v138_v14 = vld [vmem:[%s308_s3 + $0x10] sm:$0xff] }
   0x9   :  { %v214_v10 = vld [vmem:[%s307_s2] ss:$0 sm:$0xff]  ;;  %v137_v20 = vld [vmem:[%s308_s3 + $0x8] sm:$0xff]  ;;  %v139_v22 = vld [vmem:[%s308_s3 + $0x18] sm:$0xff] }
   0xa   :  { %118 = vmatpush.bf16.msra.mxu0 %v201_v1  ;;  %204 = vmatpush.bf16.msra.mxu1 %v201_v1  ;;  %v136_v12 = vld [vmem:[%s308_s3] sm:$0xff] }
   0xe   :  { %119 = vmatpush.bf16.msra.mxu0 %v200_v2  ;;  %205 = vmatpush.bf16.msra.mxu1 %v200_v2 }
  0x12   :  { %120 = vmatpush.bf16.msra.mxu0 %v199_v3  ;;  %206 = vmatpush.bf16.msra.mxu1 %v199_v3 }
  0x16   :  { %121 = vmatpush.bf16.msra.mxu0 %v198_v4  ;;  %207 = vmatpush.bf16.msra.mxu1 %v198_v4 }
  0x1a   :  { %122 = vmatpush.bf16.msra.mxu0 %v197_v5  ;;  %208 = vmatpush.bf16.msra.mxu1 %v197_v5 }
  0x1e   :  { %123 = vmatpush.bf16.msra.mxu0 %v196_v6  ;;  %209 = vmatpush.bf16.msra.mxu1 %v196_v6 }
  0x22   :  { %124 = vmatpush.bf16.msra.mxu0 %v195_v7  ;;  %210 = vmatpush.bf16.msra.mxu1 %v195_v7 }
  0x25   :  { %125 = vmatmul.bf16.vlgmr.msra.gmra.mxu0 %v193_v8  ;;  %130 = vmatmul.bf16.vlgmr.msra.gmra.mxu1 %v194_v9 }
  0xa2   :  { %v126_v11 = vpop.f32.mrf.mxu0  ;;  %v131_v13 = vpop.f32.mrf.mxu1 }
  0xa3   :  { %v127_v15 = vadd.f32 %v214_v10, %v126_v11  ;;  %v132_v16 = vadd.f32 %v214_v10, %v131_v13 }
  0xa5   :  { %v140_v17 = vadd.f32 %v136_v12, %v127_v15  ;;  %v142_v18 = vadd.f32 %v138_v14, %v132_v16 }
  0xa7   :  { %144 = vst [vmem:[%s309_s4] sm:$0xff] %v140_v17 }
  0xa8   :  { %146 = vst [vmem:[%s309_s4 + $0x10] sm:$0xff] %v142_v18 }
  0xaa   :  { %v128_v19 = vpop.f32.mrf.mxu0  ;;  %v133_v21 = vpop.f32.mrf.mxu1 }
  0xab   :  { %v129_v23 = vadd.f32 %v214_v10, %v128_v19  ;;  %v134_v24 = vadd.f32 %v214_v10, %v133_v21 }
  0xad   :  { %v141_v25 = vadd.f32 %v137_v20, %v129_v23  ;;  %v143_v26 = vadd.f32 %v139_v22, %v134_v24 }
  0xaf   :  { %145 = vst [vmem:[%s309_s4 + $0x8] sm:$0xff] %v141_v25 }
  0xb0   :  { %147 = vst [vmem:[%s309_s4 + $0x18] sm:$0xff] %v143_v26 }
  0xb1   :  { %152 = vsyncpa [#allocation3], 1 }

// kernel: _lambda_.18
= control target key start
LH: loop header
LB: loop body
LE: loop exit
PB: predicated region body
PF: predicated region fallthrough
CT: control target
= control target key end

     0   :  { %s814_s1 = inlined_call_operand.vmem [shape: bf16[512,128], index: 1, kind: input, shape index: {}]   ;;  %s815_s2 = inlined_call_operand.vmem [shape: f32[1,128], index: 2, kind: input, shape index: {}]   ;;  %s816_s0 = inlined_call_operand.vmem [shape: bf16[32,512], index: 0, kind: input, shape index: {}]   ;;  %s817_s3 = inlined_call_operand.vmem [shape: f32[32,128], index: 3, kind: input, shape index: {}]   ;;  %s818_s4 = inlined_call_operand.vmem [shape: f32[32,128], index: 4, kind: output, shape index: {}]  }
   0x1   :  { %v592_v0 = vld [vmem:[%s814_s1 + $0x38] sm:$0xff]  ;;  %v591_v4 = vld [vmem:[%s814_s1 + $0x30] sm:$0xff]  ;;  %v590_v8 = vld [vmem:[%s814_s1 + $0x28] sm:$0xff] }
   0x2   :  { %v600_v1 = vld [vmem:[%s814_s1 + $0x78] sm:$0xff]  ;;  %325 = vmatpush.bf16.msra.mxu0 %v592_v0  ;;  %v599_v5 = vld [vmem:[%s814_s1 + $0x70] sm:$0xff]  ;;  %v598_v9 = vld [vmem:[%s814_s1 + $0x68] sm:$0xff] }
   0x3   :  { %v608_v2 = vld [vmem:[%s814_s1 + $0xb8] sm:$0xff]  ;;  %344 = vmatpush.bf16.msra.mxu1 %v600_v1  ;;  %v607_v6 = vld [vmem:[%s814_s1 + $0xb0] sm:$0xff]  ;;  %v606_v10 = vld [vmem:[%s814_s1 + $0xa8] sm:$0xff] }
   0x4   :  { %v616_v3 = vld [vmem:[%s814_s1 + $0xf8] sm:$0xff]  ;;  %363 = vmatpush.bf16.msra.mxu2 %v608_v2  ;;  %v615_v7 = vld [vmem:[%s814_s1 + $0xf0] sm:$0xff]  ;;  %v614_v11 = vld [vmem:[%s814_s1 + $0xe8] sm:$0xff] }
   0x5   :  { %382 = vmatpush.bf16.msra.mxu3 %v616_v3  ;;  %v589_v12 = vld [vmem:[%s814_s1 + $0x20] sm:$0xff]  ;;  %v588_v16 = vld [vmem:[%s814_s1 + $0x18] sm:$0xff]  ;;  %v587_v20 = vld [vmem:[%s814_s1 + $0x10] sm:$0xff] }
   0x6   :  { %326 = vmatpush.bf16.msra.mxu0 %v591_v4  ;;  %v597_v13 = vld [vmem:[%s814_s1 + $0x60] sm:$0xff]  ;;  %v596_v17 = vld [vmem:[%s814_s1 + $0x58] sm:$0xff]  ;;  %v595_v21 = vld [vmem:[%s814_s1 + $0x50] sm:$0xff] }
   0x7   :  { %345 = vmatpush.bf16.msra.mxu1 %v599_v5  ;;  %v605_v14 = vld [vmem:[%s814_s1 + $0xa0] sm:$0xff]  ;;  %v604_v18 = vld [vmem:[%s814_s1 + $0x98] sm:$0xff]  ;;  %v603_v22 = vld [vmem:[%s814_s1 + $0x90] sm:$0xff] }
   0x8   :  { %364 = vmatpush.bf16.msra.mxu2 %v607_v6  ;;  %v613_v15 = vld [vmem:[%s814_s1 + $0xe0] sm:$0xff]  ;;  %v612_v19 = vld [vmem:[%s814_s1 + $0xd8] sm:$0xff]  ;;  %v611_v23 = vld [vmem:[%s814_s1 + $0xd0] sm:$0xff] }
   0x9   :  { %383 = vmatpush.bf16.msra.mxu3 %v615_v7  ;;  %v586_v24 = vld [vmem:[%s814_s1 + $0x8] sm:$0xff]  ;;  %v585_v28 = vld [vmem:[%s814_s1] sm:$0xff]  ;;  %v579_v33 = vld [vmem:[%s816_s0 + $0xc] sm:$0xf0] }
   0xa   :  { %327 = vmatpush.bf16.msra.mxu0 %v590_v8  ;;  %v594_v25 = vld [vmem:[%s814_s1 + $0x48] sm:$0xff]  ;;  %v593_v29 = vld [vmem:[%s814_s1 + $0x40] sm:$0xff]  ;;  %v421_v35 = vld [vmem:[%s816_s0 + $0x10] sm:$0xf0] }
   0xb   :  { %346 = vmatpush.bf16.msra.mxu1 %v598_v9  ;;  %v602_v26 = vld [vmem:[%s814_s1 + $0x88] sm:$0xff]  ;;  %v601_v30 = vld [vmem:[%s814_s1 + $0x80] sm:$0xff]  ;;  %v580_v37 = vld [vmem:[%s816_s0 + $0x14] sm:$0xf0] }
   0xc   :  { %365 = vmatpush.bf16.msra.mxu2 %v606_v10  ;;  %v610_v27 = vld [vmem:[%s814_s1 + $0xc8] sm:$0xff]  ;;  %v609_v31 = vld [vmem:[%s814_s1 + $0xc0] sm:$0xff]  ;;  %v429_v39 = vld [vmem:[%s816_s0 + $0x18] sm:$0xf0] }
   0xd   :  { %384 = vmatpush.bf16.msra.mxu3 %v614_v11  ;;  %v419_v32 = vld [vmem:[%s816_s0] sm:$0xf]  ;;  %v577_v34 = vld [vmem:[%s816_s0 + $0x4] sm:$0xf]  ;;  %v427_v36 = vld [vmem:[%s816_s0 + $0x8] sm:$0xf] }
   0xe   :  { %328 = vmatpush.bf16.msra.mxu0 %v589_v12  ;;  %v578_v38 = vld [vmem:[%s816_s0 + $0xc] sm:$0xf]  ;;  %v420_v40 = vor.u32 %v579_v33, %v419_v32  ;;  %v424_v41 = vor.u32 %v577_v34, %v421_v35  ;;  %v428_v42 = vor.u32 %v580_v37, %v427_v36  ;;  %v435_v44 = vld [vmem:[%s816_s0 + $0x20] sm:$0xf]  ;;  %v583_v45 = vld [vmem:[%s816_s0 + $0x2c] sm:$0xf0] }
   0xf   :  { %347 = vmatpush.bf16.msra.mxu1 %v597_v13  ;;  %v432_v43 = vor.u32 %v578_v38, %v429_v39  ;;  %v581_v46 = vld [vmem:[%s816_s0 + $0x24] sm:$0xf]  ;;  %v437_v47 = vld [vmem:[%s816_s0 + $0x30] sm:$0xf0]  ;;  %v443_v48 = vld [vmem:[%s816_s0 + $0x28] sm:$0xf]  ;;  %v436_v52 = vor.u32 %v583_v45, %v435_v44 }
  0x10   :  { %366 = vmatpush.bf16.msra.mxu2 %v605_v14  ;;  %v584_v49 = vld [vmem:[%s816_s0 + $0x34] sm:$0xf0]  ;;  %v582_v50 = vld [vmem:[%s816_s0 + $0x2c] sm:$0xf]  ;;  %v445_v51 = vld [vmem:[%s816_s0 + $0x38] sm:$0xf0]  ;;  %v440_v53 = vor.u32 %v581_v46, %v437_v47 }
  0x11   :  { %385 = vmatpush.bf16.msra.mxu3 %v613_v15  ;;  %v444_v54 = vor.u32 %v584_v49, %v443_v48  ;;  %v448_v55 = vor.u32 %v582_v50, %v445_v51  ;;  %v617_v56 = vld [vmem:[%s815_s2] ss:$0 sm:$0xff]  ;;  %v402_v11 = vld [vmem:[%s817_s3 + $0x8] sm:$0xff] }
  0x12   :  { %329 = vmatpush.bf16.msra.mxu0 %v588_v16  ;;  %v401_v1 = vld [vmem:[%s817_s3] sm:$0xff] }
  0x13   :  { %348 = vmatpush.bf16.msra.mxu1 %v596_v17 }
  0x14   :  { %367 = vmatpush.bf16.msra.mxu2 %v604_v18 }
  0x15   :  { %386 = vmatpush.bf16.msra.mxu3 %v612_v19 }
  0x16   :  { %330 = vmatpush.bf16.msra.mxu0 %v587_v20 }
  0x17   :  { %349 = vmatpush.bf16.msra.mxu1 %v595_v21  ;;  %v403_v21 = vld [vmem:[%s817_s3 + $0x10] sm:$0xff] }
  0x18   :  { %368 = vmatpush.bf16.msra.mxu2 %v603_v22 }
  0x19   :  { %387 = vmatpush.bf16.msra.mxu3 %v611_v23 }
  0x1a   :  { %331 = vmatpush.bf16.msra.mxu0 %v586_v24 }
  0x1b   :  { %350 = vmatpush.bf16.msra.mxu1 %v594_v25 }
  0x1c   :  { %369 = vmatpush.bf16.msra.mxu2 %v602_v26 }
  0x1d   :  { %388 = vmatpush.bf16.msra.mxu3 %v610_v27 }
  0x1e   :  { %332 = vmatpush.bf16.msra.mxu0 %v585_v28 }
  0x1f   :  { %351 = vmatpush.bf16.msra.mxu1 %v593_v29 }
  0x20   :  { %370 = vmatpush.bf16.msra.mxu2 %v601_v30  ;;  %v404_v30 = vld [vmem:[%s817_s3 + $0x18] sm:$0xff] }
  0x21   :  { %389 = vmatpush.bf16.msra.mxu3 %v609_v31  ;;  %333 = vmatmul.bf16.vlgmr.msra.gmra.mxu0 %v420_v40 }
  0x22   :  { %352 = vmatmul.bf16.vlgmr.msra.gmra.mxu1 %v424_v41 }
  0x23   :  { %371 = vmatmul.bf16.vlgmr.msra.gmra.mxu2 %v428_v42 }
  0x24   :  { %390 = vmatmul.bf16.vlgmr.msra.gmra.mxu3 %v432_v43 }
  0x31   :  { %338 = vmatmul.bf16.gmra.mxu0 %v436_v52 }
  0x32   :  { %357 = vmatmul.bf16.gmra.mxu1 %v440_v53 }
  0x33   :  { %376 = vmatmul.bf16.gmra.mxu2 %v444_v54 }
  0x34   :  { %395 = vmatmul.bf16.gmra.mxu3 %v448_v55 }
  0x9e   :  { %v334_v57 = vpop.f32.mrf.mxu0 }
  0x9f   :  { %v353_v58 = vpop.f32.mrf.mxu1  ;;  %v335_v59 = vadd.f32 %v617_v56, %v334_v57 }
  0xa1   :  { %v354_v60 = vadd.f32 %v353_v58, %v335_v59 }
  0xa6   :  { %v372_v61 = vpop.f32.mrf.mxu2  ;;  %v336_v0 = vpop.f32.mrf.mxu0 }
  0xa7   :  { %v391_v62 = vpop.f32.mrf.mxu3  ;;  %v373_v63 = vadd.f32 %v372_v61, %v354_v60  ;;  %v355_v2 = vpop.f32.mrf.mxu1  ;;  %v337_v4 = vadd.f32 %v617_v56, %v336_v0 }
  0xa9   :  { %v392_v3 = vadd.f32 %v391_v62, %v373_v63  ;;  %v356_v6 = vadd.f32 %v355_v2, %v337_v4 }
  0xab   :  { %v405_v5 = vadd.f32 %v401_v1, %v392_v3 }
  0xad   :  { %409 = vst [vmem:[%s818_s4] sm:$0xff] %v405_v5 }
  0xae   :  { %v374_v7 = vpop.f32.mrf.mxu2  ;;  %v339_v10 = vpop.f32.mrf.mxu0 }
  0xaf   :  { %v393_v8 = vpop.f32.mrf.mxu3  ;;  %v375_v9 = vadd.f32 %v374_v7, %v356_v6  ;;  %v340_v12 = vadd.f32 %v617_v56, %v339_v10  ;;  %v358_v14 = vpop.f32.mrf.mxu1 }
  0xb1   :  { %v394_v13 = vadd.f32 %v393_v8, %v375_v9  ;;  %v359_v16 = vadd.f32 %v358_v14, %v340_v12 }
  0xb3   :  { %v406_v15 = vadd.f32 %v402_v11, %v394_v13 }
  0xb5   :  { %410 = vst [vmem:[%s818_s4 + $0x8] sm:$0xff] %v406_v15 }
  0xb6   :  { %v377_v17 = vpop.f32.mrf.mxu2  ;;  %v341_v20 = vpop.f32.mrf.mxu0 }
  0xb7   :  { %v396_v18 = vpop.f32.mrf.mxu3  ;;  %v378_v19 = vadd.f32 %v377_v17, %v359_v16  ;;  %v342_v23 = vadd.f32 %v617_v56, %v341_v20  ;;  %v360_v25 = vpop.f32.mrf.mxu1 }
  0xb9   :  { %v397_v22 = vadd.f32 %v396_v18, %v378_v19  ;;  %v361_v26 = vadd.f32 %v360_v25, %v342_v23 }
  0xbb   :  { %v407_v24 = vadd.f32 %v403_v21, %v397_v22 }
  0xbd   :  { %411 = vst [vmem:[%s818_s4 + $0x10] sm:$0xff] %v407_v24 }
  0xbe   :  { %v379_v27 = vpop.f32.mrf.mxu2 }
  0xbf   :  { %v380_v28 = vadd.f32 %v379_v27, %v361_v26  ;;  %v398_v29 = vpop.f32.mrf.mxu3 }
  0xc1   :  { %v399_v31 = vadd.f32 %v398_v29, %v380_v28 }
  0xc3   :  { %v408_v32 = vadd.f32 %v404_v30, %v399_v31 }
  0xc5   :  { %412 = vst [vmem:[%s818_s4 + $0x18] sm:$0xff] %v408_v32 }

// kernel: _lambda_.25
= control target key start
LH: loop header
LB: loop body
LE: loop exit
PB: predicated region body
PF: predicated region fallthrough
CT: control target
= control target key end

     0   :  { %7 = vsyncpa [#allocation3], 0  ;;  %s594_s0 = inlined_call_operand.vmem [shape: f32[32,128], index: 0, kind: input, shape index: {}]   ;;  %s595_s1 = inlined_call_operand.hbm [shape: bf16[128,512], index: 1, kind: input, shape index: {}]   ;;  %s596_s2 = inlined_call_operand.hbm [shape: f32[32,512], index: 2, kind: output, shape index: {}]  }
   0x1   :  { %8 = vsyncpa [#allocation4], 0  ;;  %s15_s11 = sshll.u32 %s595_s1, 4  ;;  %s555_s12 = smov [#allocation2]   ;;  %s16_s11 = int_to_ptr.hbm [resolvable:$true] %s15_s11 }
   0x2   :  { %s17_s13 = sshll.u32 %s555_s12, 4  ;;  %s556_s14 = smov 256   ;;  %s18_s13 = int_to_ptr.vmem [resolvable:$true] %s17_s13 }
   0x3   :  { %s557_s15 = smov 16  }
   0x4   :  { %23 = dma.hbm_to_vmem [thread:$0]  %s16_s11, 4096, %s18_s13, [#allocation3], %s556_s14, %s556_s14, %s557_s15  }
   0x5   :  { %551 = dma.done.wait [#allocation3], 4096  }
   0x6   :  { %552 = vsyncadd [#allocation3], 4294963200  ;;  %v451_v0 = vld [vmem:[#allocation2 + $0xe0] sm:$0xf]  ;;  %v495_v1 = vld [vmem:[#allocation2 + $0xec] sm:$0xf0] }
   0x7   :  { %v493_v2 = vld [vmem:[#allocation2 + $0xe4] sm:$0xf]  ;;  %v452_v3 = vor.u32 %v495_v1, %v451_v0  ;;  %v453_v4 = vld [vmem:[#allocation2 + $0xf0] sm:$0xf0]  ;;  %v459_v5 = vld [vmem:[#allocation2 + $0xe8] sm:$0xf] }
   0x8   :  { %v496_v6 = vld [vmem:[#allocation2 + $0xf4] sm:$0xf0]  ;;  %v456_v7 = vor.u32 %v493_v2, %v453_v4  ;;  %v494_v9 = vld [vmem:[#allocation2 + $0xec] sm:$0xf]  ;;  %v461_v10 = vld [vmem:[#allocation2 + $0xf8] sm:$0xf0] }
   0x9   :  { %v460_v8 = vor.u32 %v496_v6, %v459_v5  ;;  %v435_v11 = vld [vmem:[#allocation2 + $0xc0] sm:$0xf]  ;;  %226 = vmatpush.bf16.msra.mxu0 %v452_v3  ;;  %v464_v12 = vor.u32 %v494_v9, %v461_v10  ;;  %v491_v13 = vld [vmem:[#allocation2 + $0xcc] sm:$0xf0]  ;;  %v489_v14 = vld [vmem:[#allocation2 + $0xc4] sm:$0xf] }
   0xa   :  { %v437_v15 = vld [vmem:[#allocation2 + $0xd0] sm:$0xf0]  ;;  %245 = vmatpush.bf16.msra.mxu1 %v456_v7  ;;  %v436_v16 = vor.u32 %v491_v13, %v435_v11  ;;  %v443_v18 = vld [vmem:[#allocation2 + $0xc8] sm:$0xf]  ;;  %v492_v19 = vld [vmem:[#allocation2 + $0xd4] sm:$0xf0] }
   0xb   :  { %264 = vmatpush.bf16.msra.mxu2 %v460_v8  ;;  %v440_v17 = vor.u32 %v489_v14, %v437_v15  ;;  %v490_v20 = vld [vmem:[#allocation2 + $0xcc] sm:$0xf]  ;;  %283 = vmatpush.bf16.msra.mxu3 %v464_v12  ;;  %v444_v21 = vor.u32 %v492_v19, %v443_v18  ;;  %v445_v22 = vld [vmem:[#allocation2 + $0xd8] sm:$0xf0]  ;;  %v419_v23 = vld [vmem:[#allocation2 + $0xa0] sm:$0xf] }
   0xc   :  { %v487_v24 = vld [vmem:[#allocation2 + $0xac] sm:$0xf0]  ;;  %v448_v25 = vor.u32 %v490_v20, %v445_v22  ;;  %v485_v26 = vld [vmem:[#allocation2 + $0xa4] sm:$0xf]  ;;  %v421_v27 = vld [vmem:[#allocation2 + $0xb0] sm:$0xf0] }
   0xd   :  { %v427_v28 = vld [vmem:[#allocation2 + $0xa8] sm:$0xf]  ;;  %227 = vmatpush.bf16.msra.mxu0 %v436_v16  ;;  %v420_v29 = vor.u32 %v487_v24, %v419_v23  ;;  %v488_v30 = vld [vmem:[#allocation2 + $0xb4] sm:$0xf0]  ;;  %v486_v31 = vld [vmem:[#allocation2 + $0xac] sm:$0xf]  ;;  %v424_v33 = vor.u32 %v485_v26, %v421_v27 }
   0xe   :  { %v429_v32 = vld [vmem:[#allocation2 + $0xb8] sm:$0xf0]  ;;  %246 = vmatpush.bf16.msra.mxu1 %v440_v17  ;;  %v428_v34 = vor.u32 %v488_v30, %v427_v28  ;;  %v403_v35 = vld [vmem:[#allocation2 + $0x80] sm:$0xf]  ;;  %v483_v36 = vld [vmem:[#allocation2 + $0x8c] sm:$0xf0] }
   0xf   :  { %265 = vmatpush.bf16.msra.mxu2 %v444_v21  ;;  %v481_v37 = vld [vmem:[#allocation2 + $0x84] sm:$0xf]  ;;  %284 = vmatpush.bf16.msra.mxu3 %v448_v25  ;;  %v432_v38 = vor.u32 %v486_v31, %v429_v32  ;;  %v405_v39 = vld [vmem:[#allocation2 + $0x90] sm:$0xf0]  ;;  %v411_v40 = vld [vmem:[#allocation2 + $0x88] sm:$0xf]  ;;  %v404_v44 = vor.u32 %v483_v36, %v403_v35 }
  0x10   :  { %v484_v41 = vld [vmem:[#allocation2 + $0x94] sm:$0xf0]  ;;  %v482_v42 = vld [vmem:[#allocation2 + $0x8c] sm:$0xf]  ;;  %v413_v43 = vld [vmem:[#allocation2 + $0x98] sm:$0xf0]  ;;  %v408_v45 = vor.u32 %v481_v37, %v405_v39 }
  0x11   :  { %228 = vmatpush.bf16.msra.mxu0 %v420_v29  ;;  %v412_v46 = vor.u32 %v484_v41, %v411_v40  ;;  %v387_v47 = vld [vmem:[#allocation2 + $0x60] sm:$0xf]  ;;  %v479_v48 = vld [vmem:[#allocation2 + $0x6c] sm:$0xf0]  ;;  %v477_v49 = vld [vmem:[#allocation2 + $0x64] sm:$0xf]  ;;  %v416_v50 = vor.u32 %v482_v42, %v413_v43 }
  0x12   :  { %247 = vmatpush.bf16.msra.mxu1 %v424_v33  ;;  %v389_v51 = vld [vmem:[#allocation2 + $0x70] sm:$0xf0]  ;;  %v395_v52 = vld [vmem:[#allocation2 + $0x68] sm:$0xf]  ;;  %v480_v53 = vld [vmem:[#allocation2 + $0x74] sm:$0xf0]  ;;  %v388_v56 = vor.u32 %v479_v48, %v387_v47 }
  0x13   :  { %266 = vmatpush.bf16.msra.mxu2 %v428_v34  ;;  %285 = vmatpush.bf16.msra.mxu3 %v432_v38  ;;  %v478_v54 = vld [vmem:[#allocation2 + $0x6c] sm:$0xf]  ;;  %v397_v55 = vld [vmem:[#allocation2 + $0x78] sm:$0xf0]  ;;  %v392_v57 = vor.u32 %v477_v49, %v389_v51  ;;  %v396_v58 = vor.u32 %v480_v53, %v395_v52  ;;  %v371_v59 = vld [vmem:[#allocation2 + $0x40] sm:$0xf] }
  0x14   :  { %v475_v60 = vld [vmem:[#allocation2 + $0x4c] sm:$0xf0]  ;;  %v473_v61 = vld [vmem:[#allocation2 + $0x44] sm:$0xf]  ;;  %v400_v62 = vor.u32 %v478_v54, %v397_v55  ;;  %v373_v63 = vld [vmem:[#allocation2 + $0x50] sm:$0xf0] }
  0x15   :  { %229 = vmatpush.bf16.msra.mxu0 %v404_v44  ;;  %v379_v0 = vld [vmem:[#allocation2 + $0x48] sm:$0xf]  ;;  %v476_v1 = vld [vmem:[#allocation2 + $0x54] sm:$0xf0]  ;;  %v474_v2 = vld [vmem:[#allocation2 + $0x4c] sm:$0xf]  ;;  %v372_v4 = vor.u32 %v475_v60, %v371_v59  ;;  %v376_v5 = vor.u32 %v473_v61, %v373_v63 }
  0x16   :  { %248 = vmatpush.bf16.msra.mxu1 %v408_v45  ;;  %v381_v3 = vld [vmem:[#allocation2 + $0x58] sm:$0xf0]  ;;  %v380_v6 = vor.u32 %v476_v1, %v379_v0  ;;  %v355_v7 = vld [vmem:[#allocation2 + $0x20] sm:$0xf]  ;;  %v471_v8 = vld [vmem:[#allocation2 + $0x2c] sm:$0xf0] }
  0x17   :  { %267 = vmatpush.bf16.msra.mxu2 %v412_v46  ;;  %286 = vmatpush.bf16.msra.mxu3 %v416_v50  ;;  %v469_v9 = vld [vmem:[#allocation2 + $0x24] sm:$0xf]  ;;  %v384_v10 = vor.u32 %v474_v2, %v381_v3  ;;  %v357_v11 = vld [vmem:[#allocation2 + $0x30] sm:$0xf0]  ;;  %v363_v12 = vld [vmem:[#allocation2 + $0x28] sm:$0xf]  ;;  %v356_v16 = vor.u32 %v471_v8, %v355_v7 }
  0x18   :  { %v472_v13 = vld [vmem:[#allocation2 + $0x34] sm:$0xf0]  ;;  %v470_v14 = vld [vmem:[#allocation2 + $0x2c] sm:$0xf]  ;;  %v365_v15 = vld [vmem:[#allocation2 + $0x38] sm:$0xf0]  ;;  %v360_v17 = vor.u32 %v469_v9, %v357_v11 }
  0x19   :  { %230 = vmatpush.bf16.msra.mxu0 %v388_v56  ;;  %v364_v18 = vor.u32 %v472_v13, %v363_v12  ;;  %v339_v19 = vld [vmem:[#allocation2] sm:$0xf]  ;;  %v467_v20 = vld [vmem:[#allocation2 + $0xc] sm:$0xf0]  ;;  %v465_v21 = vld [vmem:[#allocation2 + $0x4] sm:$0xf]  ;;  %v368_v22 = vor.u32 %v470_v14, %v365_v15 }
  0x1a   :  { %249 = vmatpush.bf16.msra.mxu1 %v392_v57  ;;  %v341_v23 = vld [vmem:[#allocation2 + $0x10] sm:$0xf0]  ;;  %v347_v24 = vld [vmem:[#allocation2 + $0x8] sm:$0xf]  ;;  %v468_v25 = vld [vmem:[#allocation2 + $0x14] sm:$0xf0]  ;;  %v340_v28 = vor.u32 %v467_v20, %v339_v19 }
  0x1b   :  { %268 = vmatpush.bf16.msra.mxu2 %v396_v58  ;;  %287 = vmatpush.bf16.msra.mxu3 %v400_v62  ;;  %v466_v26 = vld [vmem:[#allocation2 + $0xc] sm:$0xf]  ;;  %v349_v27 = vld [vmem:[#allocation2 + $0x18] sm:$0xf0]  ;;  %v28_v29 = vld [vmem:[%s594_s0] sm:$0xff]  ;;  %v344_v31 = vor.u32 %v465_v21, %v341_v23  ;;  %v348_v32 = vor.u32 %v468_v25, %v347_v24  ;;  %s324_s26 = sshll.u32 %s596_s2, 4  ;;  %s325_s26 = int_to_ptr.hbm [resolvable:$true] %s324_s26 }
  0x1c   :  { %v29_v30 = vld [vmem:[%s594_s0 + $0x8] sm:$0xff]  ;;  %v352_v33 = vor.u32 %v466_v26, %v349_v27  ;;  %v30_v35 = vld [vmem:[%s594_s0 + $0x10] sm:$0xff]  ;;  %v31_v36 = vld [vmem:[%s594_s0 + $0x18] sm:$0xff]  ;;  %s558_s0 = smov [#allocation5]   ;;  %s559_s27 = smov 512  }
  0x1d   :  { %231 = vmatpush.bf16.msra.mxu0 %v372_v4  ;;  %v32_v34 = vpack.c.bf16 %v29_v30, %v28_v29  ;;  %v33_v37 = vpack.c.bf16 %v31_v36, %v30_v35  ;;  %s322_s23 = sshll.u32 %s558_s0, 4  ;;  %s560_s28 = smov 32   ;;  %s323_s23 = int_to_ptr.vmem [resolvable:$true] %s322_s23 }
  0x1e   :  { %250 = vmatpush.bf16.msra.mxu1 %v376_v5 }
  0x1f   :  { %269 = vmatpush.bf16.msra.mxu2 %v380_v6  ;;  %288 = vmatpush.bf16.msra.mxu3 %v384_v10 }
  0x21   :  { %232 = vmatpush.bf16.msra.mxu0 %v356_v16 }
  0x22   :  { %251 = vmatpush.bf16.msra.mxu1 %v360_v17 }
  0x23   :  { %270 = vmatpush.bf16.msra.mxu2 %v364_v18  ;;  %289 = vmatpush.bf16.msra.mxu3 %v368_v22 }
  0x25   :  { %233 = vmatpush.bf16.msra.mxu0 %v340_v28 }
  0x26   :  { %252 = vmatpush.bf16.msra.mxu1 %v344_v31 }
  0x27   :  { %271 = vmatpush.bf16.msra.mxu2 %v348_v32  ;;  %290 = vmatpush.bf16.msra.mxu3 %v352_v33 }
  0x28   :  { %234 = vmatmul.bf16.vlgmr.msra.gmra.mxu0 %v32_v34 }
  0x29   :  { %253 = vmatmul.bf16.vlgmr.msra.gmra.mxu1 %v32_v34 }
  0x2a   :  { %272 = vmatmul.bf16.vlgmr.msra.gmra.mxu2 %v32_v34  ;;  %291 = vmatmul.bf16.vlgmr.msra.gmra.mxu3 %v32_v34 }
  0x38   :  { %239 = vmatmul.bf16.gmra.mxu0 %v33_v37 }
  0x39   :  { %258 = vmatmul.bf16.gmra.mxu1 %v33_v37 }
  0x3a   :  { %277 = vmatmul.bf16.gmra.mxu2 %v33_v37  ;;  %296 = vmatmul.bf16.gmra.mxu3 %v33_v37 }
  0xa5   :  { %v235_v38 = vpop.f32.mrf.mxu0 }
  0xa6   :  { %302 = vst [vmem:[#allocation5] sm:$0xff] %v235_v38  ;;  %v254_v39 = vpop.f32.mrf.mxu1 }
  0xa7   :  { %303 = vst [vmem:[#allocation5 + $0x8] sm:$0xff] %v254_v39 }
  0xad   :  { %v273_v40 = vpop.f32.mrf.mxu2  ;;  %v292_v41 = vpop.f32.mrf.mxu3 }
  0xae   :  { %304 = vst [vmem:[#allocation5 + $0x10] sm:$0xff] %v273_v40  ;;  %v237_v42 = vpop.f32.mrf.mxu0  ;;  %v256_v43 = vpop.f32.mrf.mxu1 }
  0xaf   :  { %305 = vst [vmem:[#allocation5 + $0x18] sm:$0xff] %v292_v41 }
  0xb0   :  { %306 = vst [vmem:[#allocation5 + $0x20] sm:$0xff] %v237_v42 }
  0xb1   :  { %307 = vst [vmem:[#allocation5 + $0x28] sm:$0xff] %v256_v43 }
  0xb5   :  { %v275_v44 = vpop.f32.mrf.mxu2  ;;  %v294_v45 = vpop.f32.mrf.mxu3 }
  0xb6   :  { %308 = vst [vmem:[#allocation5 + $0x30] sm:$0xff] %v275_v44  ;;  %v240_v46 = vpop.f32.mrf.mxu0  ;;  %v259_v47 = vpop.f32.mrf.mxu1 }
  0xb7   :  { %309 = vst [vmem:[#allocation5 + $0x38] sm:$0xff] %v294_v45 }
  0xb8   :  { %310 = vst [vmem:[#allocation5 + $0x40] sm:$0xff] %v240_v46 }
  0xb9   :  { %311 = vst [vmem:[#allocation5 + $0x48] sm:$0xff] %v259_v47 }
  0xbd   :  { %v278_v48 = vpop.f32.mrf.mxu2  ;;  %v297_v49 = vpop.f32.mrf.mxu3 }
  0xbe   :  { %312 = vst [vmem:[#allocation5 + $0x50] sm:$0xff] %v278_v48  ;;  %v242_v50 = vpop.f32.mrf.mxu0  ;;  %v261_v51 = vpop.f32.mrf.mxu1 }
  0xbf   :  { %313 = vst [vmem:[#allocation5 + $0x58] sm:$0xff] %v297_v49 }
  0xc0   :  { %314 = vst [vmem:[#allocation5 + $0x60] sm:$0xff] %v242_v50 }
  0xc1   :  { %315 = vst [vmem:[#allocation5 + $0x68] sm:$0xff] %v261_v51 }
  0xc5   :  { %v280_v52 = vpop.f32.mrf.mxu2  ;;  %v299_v53 = vpop.f32.mrf.mxu3 }
  0xc6   :  { %316 = vst [vmem:[#allocation5 + $0x70] sm:$0xff] %v280_v52 }
  0xc7   :  { %317 = vst [vmem:[#allocation5 + $0x78] sm:$0xff] %v299_v53 }
  0xc8   :  { %330 = dma.vmem_to_hbm [thread:$0]  %s323_s23, 2048, %s325_s26, [#allocation4], %s559_s27, %s559_s27, %s560_s28  }
  0xc9   :  { %553 = dma.done.wait [#allocation4], 2048  }
  0xca   :  { %554 = vsyncadd [#allocation4], 4294965248 }
  0xcb   :  { %335 = vsyncpa [#allocation3], 1 }
  0xcc   :  { %336 = vsyncpa [#allocation4], 1 }

// kernel: _lambda_.15
= control target key start
LH: loop header
LB: loop body
LE: loop exit
PB: predicated region body
PF: predicated region fallthrough
CT: control target
= control target key end

     0   :  { %s3965_s0 = inlined_call_operand.<no memory space> [shape: s32[1], index: 0, kind: input, shape index: {}, may-alias: {0,1}]   ;;  %s3966_s1 = inlined_call_operand.<no memory space> [shape: s32[1], index: 1, kind: input, shape index: {}, may-alias: {0,1}]   ;;  %s3967_s2 = inlined_call_operand.vmem [shape: bf16[2,16,3,4,32], index: 2, kind: input, shape index: {}, may-alias: {2,3,4}]   ;;  %s3968_s3 = inlined_call_operand.vmem [shape: bf16[2,16,3,4,32], index: 3, kind: input, shape index: {}, may-alias: {2,3,4}]   ;;  %s3969_s4 = inlined_call_operand.vmem [shape: bf16[2,16,3,4,32], index: 4, kind: input, shape index: {}, may-alias: {2,3,4}]   ;;  %s3970_s5 = inlined_call_operand.vmem [shape: bf16[2,16,128], index: 5, kind: output, shape index: {}]  }
   0x1   :  { %10 = sst [smem:[#allocation7]] %s3965_s0 }
   0x2   :  { %11 = sst [smem:[#allocation8]] %s3966_s1 }
   0x3   :  { %s2763_s22 = smov 0   ;;  %s2765_s23 = smov 0  }
   0x4   :  { %s2767_s24 = smov 0   ;;  %s2769_s25 = smov 0  }
   0x5   :  { %s2771_s26 = smov 0   ;;  %s2773_s27 = smov 0  }
   0x6   :  { %s2775_s28 = smov 0   ;;  %s2777_s29 = smov 0  }
   0x7   :  { %s2779_s0 = smov 0  }
   0x8 LB: > { %s29_s1 = sadd.s32 1, %s2714_s29  ;;  %p47_p1 = scmp.ne.s32.totalorder %s2706_s27, %s2702_s26  ;;  %s2718_s0 = sphi %s2779_s0, %s17_s0   ;;  %s2714_s29 = sphi %s2777_s29, %s4130_s29   ;;  %s2710_s28 = sphi %s2775_s28, %s4129_s28   ;;  %s2706_s27 = sphi %s2773_s27, %s4128_s27   ;;  %s2702_s26 = sphi %s2771_s26, %s4127_s26   ;;  %s2698_s25 = sphi %s2769_s25, %s4126_s25   ;;  %s2694_s24 = sphi %s2767_s24, %s4125_s24   ;;  %s2690_s23 = sphi %s2765_s23, %s4124_s23   ;;  %s2686_s22 = sphi %s2763_s22, %s4123_s22  }
   0x9   : > { %p31_p0 = scmp.ge.s32.totalorder %s29_s1, 2  ;;  %p48_p2 = scmp.eq.s32.totalorder %s2718_s0, 0 }
   0xa   : > { %p77_p4 = scmp.ne.s32.totalorder %s2698_s25, %s2694_s24  ;;  %s40_s7 = sadd.s32 1, %s2706_s27 }
   0xb   : > { %s4132_s1 = smov (%p31_p0, %s29_s1), 0  ;;  %p2814_p3 = por %p48_p2, %p47_p1 }
   0xc   : > { %s35_s6 = ssub.s32 %s2714_s29, %s4132_s1  ;;  %p2823_p6 = por %p77_p4, %p48_p2 }
   0xd   : > { %p38_p5 = scmp.eq.s32.totalorder %s35_s6, 0  ;;  %p107_p7 = scmp.ne.s32.totalorder %s2690_s23, %s2686_s22 }
   0xe   : > { %s70_s11 = sadd.s32 1, %s2698_s25  ;;  %s100_s12 = sadd.s32 1, %s2690_s23 }
   0xf   : > { %s2830_s9 = scalar_select %p38_p5, %s2706_s27, %s40_s7  }
  0x10   : > { %p2832_p8 = por %p107_p7, %p48_p2  ;;  %p2431_p9 = scmp.ge.s32.totalorder %s2718_s0, 2 }
  0x11   : > { %s2839_s13 = scalar_select %p38_p5, %s2698_s25, %s70_s11  }
  0x12   : > { %s2842_s14 = scalar_select %p38_p5, %s2690_s23, %s100_s12  }
  0x13   : > { %163 = sbr.rel (%p2431_p9) target bundleno = 108 (0x6c), region = 16 }
  0x18   : > { %166 = sbr.rel (!%p2814_p3) target bundleno = 52 (0x34), region = 20  ;;  %s171_s15 = sld [smem:[#allocation7]] (%p2814_p3) }
  0x19   : > { %s168_s16 = sand.u32 (%p2814_p3), 1, %s2706_s27   ;;  %s2514_s17 = smul.u32 (%p2814_p3), 48, %s2714_s29 }
  0x1a   : > { %s2432_s18 = sshll.u32 (%p2814_p3), %s168_s16, 5 }
  0x1b   : > { %s170_s30 = scalar_lea.vmem (%p2814_p3), [#allocation9], %s2432_s18 }
  0x1e   : > { %s2513_s19 = smul.u32 48, %s171_s15 }
  0x20   : > { %s175_s20 = sadd.s32 %s2514_s17, %s2513_s19 }
  0x21   : > { %s2435_s21 = sshll.u32 %s175_s20, 1 }
  0x22   : > { %s2852_s11 = scalar_lea.vmem %s3967_s2, %s2435_s21 }
  0x23   : > { %v194_v0 = vld [vmem:[%s2852_s11] sm:$0x3]  ;;  %v196_v1 = vld [vmem:[%s2852_s11 + $0x6] sm:$0x3]  ;;  %v198_v2 = vld [vmem:[%s2852_s11 + $0xc] sm:$0x3] }
  0x24   : > { %195 = vst [vmem:[%s170_s30] sm:$0x3] %v194_v0  ;;  %v200_v3 = vld [vmem:[%s2852_s11 + $0x12] sm:$0x3]  ;;  %v202_v4 = vld [vmem:[%s2852_s11 + $0x18] sm:$0x3] }
  0x25   : > { %197 = vst [vmem:[%s170_s30 + $0x2] sm:$0x3] %v196_v1  ;;  %v204_v5 = vld [vmem:[%s2852_s11 + $0x1e] sm:$0x3]  ;;  %v206_v6 = vld [vmem:[%s2852_s11 + $0x24] sm:$0x3] }
  0x26   : > { %199 = vst [vmem:[%s170_s30 + $0x4] sm:$0x3] %v198_v2  ;;  %v208_v7 = vld [vmem:[%s2852_s11 + $0x2a] sm:$0x3]  ;;  %v210_v8 = vld [vmem:[%s2852_s11 + $0x30] sm:$0x3] }
  0x27   : > { %201 = vst [vmem:[%s170_s30 + $0x6] sm:$0x3] %v200_v3  ;;  %v212_v9 = vld [vmem:[%s2852_s11 + $0x36] sm:$0x3]  ;;  %v214_v10 = vld [vmem:[%s2852_s11 + $0x3c] sm:$0x3] }
  0x28   : > { %203 = vst [vmem:[%s170_s30 + $0x8] sm:$0x3] %v202_v4  ;;  %v216_v11 = vld [vmem:[%s2852_s11 + $0x42] sm:$0x3]  ;;  %v218_v12 = vld [vmem:[%s2852_s11 + $0x48] sm:$0x3] }
  0x29   : > { %205 = vst [vmem:[%s170_s30 + $0xa] sm:$0x3] %v204_v5  ;;  %v220_v13 = vld [vmem:[%s2852_s11 + $0x4e] sm:$0x3]  ;;  %v222_v14 = vld [vmem:[%s2852_s11 + $0x54] sm:$0x3] }
  0x2a   : > { %207 = vst [vmem:[%s170_s30 + $0xc] sm:$0x3] %v206_v6  ;;  %v224_v15 = vld [vmem:[%s2852_s11 + $0x5a] sm:$0x3] }
  0x2b   : > { %209 = vst [vmem:[%s170_s30 + $0xe] sm:$0x3] %v208_v7 }
  0x2c   : > { %211 = vst [vmem:[%s170_s30 + $0x10] sm:$0x3] %v210_v8 }
  0x2d   : > { %213 = vst [vmem:[%s170_s30 + $0x12] sm:$0x3] %v212_v9 }
  0x2e   : > { %215 = vst [vmem:[%s170_s30 + $0x14] sm:$0x3] %v214_v10 }
  0x2f   : > { %217 = vst [vmem:[%s170_s30 + $0x16] sm:$0x3] %v216_v11 }
  0x30   : > { %219 = vst [vmem:[%s170_s30 + $0x18] sm:$0x3] %v218_v12 }
  0x31   : > { %221 = vst [vmem:[%s170_s30 + $0x1a] sm:$0x3] %v220_v13 }
  0x32   : > { %223 = vst [vmem:[%s170_s30 + $0x1c] sm:$0x3] %v222_v14 }
  0x33   : > { %225 = vst [vmem:[%s170_s30 + $0x1e] sm:$0x3] %v224_v15 }
  0x34 PF: > { %281 = sbr.rel (!%p2823_p6) target bundleno = 80 (0x50), region = 61  ;;  %s286_s12 = sld [smem:[#allocation8]] (%p2823_p6) }
  0x35   : > { %s283_s15 = sand.u32 (%p2823_p6), 1, %s2698_s25   ;;  %s2334_s16 = smul.u32 (%p2823_p6), 48, %s2714_s29 }
  0x36   : > { %s2436_s17 = sshll.u32 (%p2823_p6), %s283_s15, 5 }
  0x37   : > { %s285_s8 = scalar_lea.vmem (%p2823_p6), [#allocation10], %s2436_s17 }
  0x3a   : > { %s2333_s18 = smul.u32 48, %s286_s12 }
  0x3c   : > { %s2335_s19 = sadd.s32 %s2334_s16, %s2333_s18 }
  0x3d   : > { %s2437_s20 = sshll.u32 %s2335_s19, 1 }
  0x3e   : > { %s2877_s7 = scalar_lea.vmem %s3968_s3, %s2437_s20 }
  0x3f   : > { %v2438_v16 = vld [vmem:[%s2877_s7 + $0x2] sm:$0x3]  ;;  %v2439_v17 = vld [vmem:[%s2877_s7 + $0x8] sm:$0x3]  ;;  %v2440_v18 = vld [vmem:[%s2877_s7 + $0xe] sm:$0x3] }
  0x40   : > { %311 = vst [vmem:[%s285_s8] sm:$0x3] %v2438_v16  ;;  %v2441_v19 = vld [vmem:[%s2877_s7 + $0x14] sm:$0x3]  ;;  %v2442_v20 = vld [vmem:[%s2877_s7 + $0x1a] sm:$0x3] }
  0x41   : > { %313 = vst [vmem:[%s285_s8 + $0x2] sm:$0x3] %v2439_v17  ;;  %v2443_v21 = vld [vmem:[%s2877_s7 + $0x20] sm:$0x3]  ;;  %v2444_v22 = vld [vmem:[%s2877_s7 + $0x26] sm:$0x3] }
  0x42   : > { %315 = vst [vmem:[%s285_s8 + $0x4] sm:$0x3] %v2440_v18  ;;  %v2445_v23 = vld [vmem:[%s2877_s7 + $0x2c] sm:$0x3]  ;;  %v2446_v24 = vld [vmem:[%s2877_s7 + $0x32] sm:$0x3] }
  0x43   : > { %317 = vst [vmem:[%s285_s8 + $0x6] sm:$0x3] %v2441_v19  ;;  %v2447_v25 = vld [vmem:[%s2877_s7 + $0x38] sm:$0x3]  ;;  %v2448_v26 = vld [vmem:[%s2877_s7 + $0x3e] sm:$0x3] }
  0x44   : > { %319 = vst [vmem:[%s285_s8 + $0x8] sm:$0x3] %v2442_v20  ;;  %v2449_v27 = vld [vmem:[%s2877_s7 + $0x44] sm:$0x3]  ;;  %v2450_v28 = vld [vmem:[%s2877_s7 + $0x4a] sm:$0x3] }
  0x45   : > { %321 = vst [vmem:[%s285_s8 + $0xa] sm:$0x3] %v2443_v21  ;;  %v2451_v29 = vld [vmem:[%s2877_s7 + $0x50] sm:$0x3]  ;;  %v2452_v30 = vld [vmem:[%s2877_s7 + $0x56] sm:$0x3] }
  0x46   : > { %323 = vst [vmem:[%s285_s8 + $0xc] sm:$0x3] %v2444_v22  ;;  %v2453_v31 = vld [vmem:[%s2877_s7 + $0x5c] sm:$0x3] }
  0x47   : > { %325 = vst [vmem:[%s285_s8 + $0xe] sm:$0x3] %v2445_v23 }
  0x48   : > { %327 = vst [vmem:[%s285_s8 + $0x10] sm:$0x3] %v2446_v24 }
  0x49   : > { %329 = vst [vmem:[%s285_s8 + $0x12] sm:$0x3] %v2447_v25 }
  0x4a   : > { %331 = vst [vmem:[%s285_s8 + $0x14] sm:$0x3] %v2448_v26 }
  0x4b   : > { %333 = vst [vmem:[%s285_s8 + $0x16] sm:$0x3] %v2449_v27 }
  0x4c   : > { %335 = vst [vmem:[%s285_s8 + $0x18] sm:$0x3] %v2450_v28 }
  0x4d   : > { %337 = vst [vmem:[%s285_s8 + $0x1a] sm:$0x3] %v2451_v29 }
  0x4e   : > { %339 = vst [vmem:[%s285_s8 + $0x1c] sm:$0x3] %v2452_v30 }
  0x4f   : > { %341 = vst [vmem:[%s285_s8 + $0x1e] sm:$0x3] %v2453_v31 }
  0x50 PF: > { %397 = sbr.rel (!%p2832_p8) target bundleno = 108 (0x6c), region = 102  ;;  %s402_s11 = sld [smem:[#allocation8]] (%p2832_p8) }
  0x51   : > { %s399_s30 = sand.u32 (%p2832_p8), 1, %s2690_s23   ;;  %s2342_s12 = smul.u32 (%p2832_p8), 48, %s2714_s29 }
  0x52   : > { %s2454_s15 = sshll.u32 (%p2832_p8), %s399_s30, 5 }
  0x53   : > { %s401_s10 = scalar_lea.vmem (%p2832_p8), [#allocation11], %s2454_s15 }
  0x56   : > { %s2341_s16 = smul.u32 48, %s402_s11 }
  0x58   : > { %s2343_s17 = sadd.s32 %s2342_s12, %s2341_s16 }
  0x59   : > { %s2455_s18 = sshll.u32 %s2343_s17, 1 }
  0x5a   : > { %s2902_s21 = scalar_lea.vmem %s3969_s4, %s2455_s18 }
  0x5b   : > { %v2456_v32 = vld [vmem:[%s2902_s21 + $0x4] sm:$0x3]  ;;  %v2457_v33 = vld [vmem:[%s2902_s21 + $0xa] sm:$0x3]  ;;  %v2458_v34 = vld [vmem:[%s2902_s21 + $0x10] sm:$0x3] }
  0x5c   : > { %427 = vst [vmem:[%s401_s10] sm:$0x3] %v2456_v32  ;;  %v2459_v35 = vld [vmem:[%s2902_s21 + $0x16] sm:$0x3]  ;;  %v2460_v36 = vld [vmem:[%s2902_s21 + $0x1c] sm:$0x3] }
  0x5d   : > { %429 = vst [vmem:[%s401_s10 + $0x2] sm:$0x3] %v2457_v33  ;;  %v2461_v37 = vld [vmem:[%s2902_s21 + $0x22] sm:$0x3]  ;;  %v2462_v38 = vld [vmem:[%s2902_s21 + $0x28] sm:$0x3] }
  0x5e   : > { %431 = vst [vmem:[%s401_s10 + $0x4] sm:$0x3] %v2458_v34  ;;  %v2463_v39 = vld [vmem:[%s2902_s21 + $0x2e] sm:$0x3]  ;;  %v2464_v40 = vld [vmem:[%s2902_s21 + $0x34] sm:$0x3] }
  0x5f   : > { %433 = vst [vmem:[%s401_s10 + $0x6] sm:$0x3] %v2459_v35  ;;  %v2465_v41 = vld [vmem:[%s2902_s21 + $0x3a] sm:$0x3]  ;;  %v2466_v42 = vld [vmem:[%s2902_s21 + $0x40] sm:$0x3] }
  0x60   : > { %435 = vst [vmem:[%s401_s10 + $0x8] sm:$0x3] %v2460_v36  ;;  %v2467_v43 = vld [vmem:[%s2902_s21 + $0x46] sm:$0x3]  ;;  %v2468_v44 = vld [vmem:[%s2902_s21 + $0x4c] sm:$0x3] }
  0x61   : > { %437 = vst [vmem:[%s401_s10 + $0xa] sm:$0x3] %v2461_v37  ;;  %v2469_v45 = vld [vmem:[%s2902_s21 + $0x52] sm:$0x3]  ;;  %v2470_v46 = vld [vmem:[%s2902_s21 + $0x58] sm:$0x3] }
  0x62   : > { %439 = vst [vmem:[%s401_s10 + $0xc] sm:$0x3] %v2462_v38  ;;  %v2471_v47 = vld [vmem:[%s2902_s21 + $0x5e] sm:$0x3] }
  0x63   : > { %441 = vst [vmem:[%s401_s10 + $0xe] sm:$0x3] %v2463_v39 }
  0x64   : > { %443 = vst [vmem:[%s401_s10 + $0x10] sm:$0x3] %v2464_v40 }
  0x65   : > { %445 = vst [vmem:[%s401_s10 + $0x12] sm:$0x3] %v2465_v41 }
  0x66   : > { %447 = vst [vmem:[%s401_s10 + $0x14] sm:$0x3] %v2466_v42 }
  0x67   : > { %449 = vst [vmem:[%s401_s10 + $0x16] sm:$0x3] %v2467_v43 }
  0x68   : > { %451 = vst [vmem:[%s401_s10 + $0x18] sm:$0x3] %v2468_v44 }
  0x69   : > { %453 = vst [vmem:[%s401_s10 + $0x1a] sm:$0x3] %v2469_v45 }
  0x6a   : > { %455 = vst [vmem:[%s401_s10 + $0x1c] sm:$0x3] %v2470_v46 }
  0x6b   : > { %457 = vst [vmem:[%s401_s10 + $0x1e] sm:$0x3] %v2471_v47 }
  0x6c PF: > { %p2472_p10 = scmp.ge.s32.totalorder %s2718_s0, 1  ;;  %p512_p11 = scmp.lt.s32.totalorder %s2718_s0, 3 }
  0x6e   : > { %p513_p12 = pnand %p2472_p10, %p512_p11 }
  0x70   : > { %516 = sbr.rel (%p513_p12) target bundleno = 1492 (0x5d4), region = 143 }
  0x75   : > { %s519_s6 = sand.u32 1, %s2702_s26   ;;  %s526_s7 = sand.u32 1, %s2694_s24  }
  0x76   : > { %s2473_s8 = sshll.u32 %s519_s6, 5  ;;  %s2474_s11 = sshll.u32 %s526_s7, 5 }
  0x77   : > { %s533_s30 = sand.u32 1, %s2686_s22   ;;  %s2925_s12 = sld [smem:[#allocation7]] }
  0x78   : > { %s2475_s15 = sshll.u32 %s533_s30, 5  ;;  %p577_p13 = scmp.lt.s32.totalorder %s2710_s28, 1 }
  0x79   : > { %s2928_s16 = sld [smem:[#allocation8]]  ;;  %s2937_s22 = scalar_lea.vmem [#allocation9], %s2473_s8 }
  0x7a   : > { %s4134_s28 = smov (!%p577_p13, %s2710_s28), 1  ;;  %s2939_s10 = scalar_lea.vmem [#allocation10], %s2474_s11 }
  0x7b   : > { %s2477_s18 = sshll.u32 %s4134_s28, 1  ;;  %s2941_s6 = scalar_lea.vmem [#allocation11], %s2475_s15 }
  0x7d   : > { %s2476_s17 = sshll.u32 %s2925_s12, 1 }
  0x7e   : > { %p579_p0 = scmp.lt.s32.totalorder %s2476_s17, 1 }
  0x7f   : > { %p2479_p1 = scmp.ne.s32.totalorder %s2928_s16, 0 }
  0x80   : > { %s4136_s17 = smov (!%p579_p0, %s2476_s17), 1 }
  0x81   : > { %s582_s19 = sadd.s32 %s2477_s18, %s4136_s17  ;;  %593 = sbr.rel (%p2479_p1) target bundleno = 208 (0xd0), region = 159 }
  0x82   : > { %s2478_s20 = sshll.u32 %s582_s19, 2 }
  0x83   : > { %s2935_s24 = scalar_lea.vmem %s3970_s5, %s2478_s20 }
  0x86   : > { %v594_v48 = vld [vmem:[%s2937_s22] sm:$0x3]  ;;  %v595_v49 = vld [vmem:[%s2937_s22 + $0x2] sm:$0x3]  ;;  %v596_v50 = vld [vmem:[%s2937_s22 + $0x4] sm:$0x3] }
  0x87   : > { %v597_v51 = vld [vmem:[%s2937_s22 + $0x6] sm:$0x3]  ;;  %v598_v52 = vld [vmem:[%s2937_s22 + $0x8] sm:$0x3]  ;;  %v599_v53 = vld [vmem:[%s2937_s22 + $0xa] sm:$0x3]  ;;  %v610_v54 = vunpack.c.l.bf16 %v594_v48  ;;  %v611_v55 = vunpack.c.l.bf16 %v595_v49  ;;  %v612_v56 = vunpack.c.l.bf16 %v596_v50 }
  0x88   : > { %v600_v57 = vld [vmem:[%s2937_s22 + $0xc] sm:$0x3]  ;;  %v601_v58 = vld [vmem:[%s2937_s22 + $0xe] sm:$0x3]  ;;  %v613_v59 = vunpack.c.l.bf16 %v597_v51  ;;  %v614_v60 = vunpack.c.l.bf16 %v598_v52  ;;  %v615_v61 = vunpack.c.l.bf16 %v599_v53  ;;  %vm691_vm0 = vcmask 1041409  }
  0x89   : > { %v616_v62 = vunpack.c.l.bf16 %v600_v57  ;;  %v617_v63 = vunpack.c.l.bf16 %v601_v58  ;;  %v626_v0 = vmul.f32 0.17677669, %v610_v54  ;;  %v627_v1 = vmul.f32 0.17677669, %v611_v55  ;;  %v602_v2 = vld [vmem:[%s2937_s22 + $0x10] sm:$0x3] }
  0x8a   : > { %v628_v3 = vmul.f32 0.17677669, %v612_v56  ;;  %v629_v4 = vmul.f32 0.17677669, %v613_v59  ;;  %v630_v5 = vmul.f32 0.17677669, %v614_v60  ;;  %v618_v6 = vunpack.c.l.bf16 %v602_v2 }
  0x8b   : > { %v631_v7 = vmul.f32 0.17677669, %v615_v61  ;;  %v632_v8 = vmul.f32 0.17677669, %v616_v62  ;;  %v633_v9 = vmul.f32 0.17677669, %v617_v63  ;;  %v642_v10 = vpack.c.bf16 %v626_v0, %v626_v0 }
  0x8c   : > { %v643_v11 = vpack.c.bf16 %v627_v1, %v627_v1  ;;  %v644_v12 = vpack.c.bf16 %v628_v3, %v628_v3  ;;  %v645_v13 = vpack.c.bf16 %v629_v4, %v629_v4  ;;  %v646_v14 = vpack.c.bf16 %v630_v5, %v630_v5  ;;  %v603_v23 = vld [vmem:[%s2937_s22 + $0x12] sm:$0x3]  ;;  %v604_v27 = vld [vmem:[%s2937_s22 + $0x14] sm:$0x3]  ;;  %v605_v28 = vld [vmem:[%s2937_s22 + $0x16] sm:$0x3] }
  0x8d   : > { %v647_v15 = vpack.c.bf16 %v631_v7, %v631_v7  ;;  %v648_v16 = vpack.c.bf16 %v632_v8, %v632_v8  ;;  %v649_v17 = vpack.c.bf16 %v633_v9, %v633_v9  ;;  %v2953_v18 = vunpack.c.l.b16 %v642_v10  ;;  %v606_v29 = vld [vmem:[%s2937_s22 + $0x18] sm:$0x3]  ;;  %v607_v33 = vld [vmem:[%s2937_s22 + $0x1a] sm:$0x3]  ;;  %v608_v36 = vld [vmem:[%s2937_s22 + $0x1c] sm:$0x3] }
  0x8e   : > { %v2955_v19 = vunpack.c.l.b16 %v643_v11  ;;  %v2957_v20 = vunpack.c.l.b16 %v644_v12  ;;  %v2959_v21 = vunpack.c.l.b16 %v645_v13  ;;  %v2961_v22 = vunpack.c.l.b16 %v646_v14  ;;  %v609_v40 = vld [vmem:[%s2937_s22 + $0x1e] sm:$0x3] }
  0x8f   : > { %v2964_v24 = vunpack.c.l.b16 %v647_v15  ;;  %v2966_v25 = vunpack.c.l.b16 %v648_v16  ;;  %v2968_v26 = vunpack.c.l.b16 %v649_v17  ;;  %vm694_vm1 = vcmask 1042434  }
  0x90   : > { %v690_v30 = vrot.slane %v2955_v19, 7  ;;  %v693_v31 = vrot.slane %v2957_v20, 6  ;;  %v696_v32 = vrot.slane %v2959_v21, 5  ;;  %vm697_vm2 = vcmask 1043459  }
  0x91   : > { %v699_v34 = vrot.slane %v2961_v22, 4  ;;  %vm700_vm3 = vcmask 1044484   ;;  %v702_v35 = vrot.slane %v2964_v24, 3  ;;  %vm703_vm4 = vcmask 1045509  }
  0x92   : > { %v692_v37 = vsel %vm691_vm0, %v690_v30, %v2953_v18  ;;  %v705_v38 = vrot.slane %v2966_v25, 2  ;;  %vm706_vm5 = vcmask 1046534   ;;  %v708_v39 = vrot.slane %v2968_v26, 1 }
  0x93   : > { %v695_v41 = vsel %vm694_vm1, %v693_v31, %v692_v37  ;;  %vm709_vm6 = vcmask 1047559   ;;  %vm729_vm7 = vcmask 257024   ;;  %v619_v42 = vunpack.c.l.bf16 %v603_v23 }
  0x94   : > { %v698_v43 = vsel %vm697_vm2, %v696_v32, %v695_v41  ;;  %v620_v44 = vunpack.c.l.bf16 %v604_v27  ;;  %v621_v45 = vunpack.c.l.bf16 %v605_v28  ;;  %v622_v46 = vunpack.c.l.bf16 %v606_v29 }
  0x95   : > { %v701_v47 = vsel %vm700_vm3, %v699_v34, %v698_v43  ;;  %v623_v48 = vunpack.c.l.bf16 %v607_v33  ;;  %v624_v49 = vunpack.c.l.bf16 %v608_v36  ;;  %v625_v50 = vunpack.c.l.bf16 %v609_v40 }
  0x96   : > { %v704_v51 = vsel %vm703_vm4, %v702_v35, %v701_v47  ;;  %v634_v52 = vmul.f32 0.17677669, %v618_v6  ;;  %v635_v53 = vmul.f32 0.17677669, %v619_v42  ;;  %v636_v54 = vmul.f32 0.17677669, %v620_v44 }
  0x97   : > { %v707_v55 = vsel %vm706_vm5, %v705_v38, %v704_v51  ;;  %v637_v56 = vmul.f32 0.17677669, %v621_v45  ;;  %v638_v57 = vmul.f32 0.17677669, %v622_v46  ;;  %v639_v58 = vmul.f32 0.17677669, %v623_v48 }
  0x98   : > { %v710_v59 = vsel %vm709_vm6, %v708_v39, %v707_v55  ;;  %v640_v60 = vmul.f32 0.17677669, %v624_v49  ;;  %v641_v61 = vmul.f32 0.17677669, %v625_v50  ;;  %v650_v62 = vpack.c.bf16 %v634_v52, %v634_v52 }
  0x99   : > { %v725_v63 = vpack.c.b16 %v710_v59, %v710_v59  ;;  %v651_v0 = vpack.c.bf16 %v635_v53, %v635_v53  ;;  %v652_v1 = vpack.c.bf16 %v636_v54, %v636_v54  ;;  %v653_v2 = vpack.c.bf16 %v637_v56, %v637_v56 }
  0x9a   : > { %v654_v3 = vpack.c.bf16 %v638_v57, %v638_v57  ;;  %v655_v4 = vpack.c.bf16 %v639_v58, %v639_v58  ;;  %v656_v5 = vpack.c.bf16 %v640_v60, %v640_v60  ;;  %v657_v6 = vpack.c.bf16 %v641_v61, %v641_v61 }
  0x9b   : > { %730 = vst.msk [vmem:[#allocation2] sm:$0xf] %vm729_vm7, %v725_v63  ;;  %v2992_v7 = vunpack.c.l.b16 %v650_v62  ;;  %v2994_v8 = vunpack.c.l.b16 %v651_v0  ;;  %v2996_v9 = vunpack.c.l.b16 %v652_v1  ;;  %v2998_v10 = vunpack.c.l.b16 %v653_v2 }
  0x9c   : > { %v3000_v11 = vunpack.c.l.b16 %v654_v3  ;;  %v3002_v12 = vunpack.c.l.b16 %v655_v4  ;;  %v3004_v13 = vunpack.c.l.b16 %v656_v5  ;;  %v3006_v14 = vunpack.c.l.b16 %v657_v6 }
  0x9d   : > { %v711_v15 = vrot.slane %v2994_v8, 7  ;;  %v713_v16 = vrot.slane %v2996_v9, 6  ;;  %v715_v17 = vrot.slane %v2998_v10, 5  ;;  %v732_v23 = vrot.slane %v2953_v18, 1 }
  0x9e   : > { %v717_v27 = vrot.slane %v3000_v11, 4  ;;  %v719_v28 = vrot.slane %v3002_v12, 3  ;;  %v721_v29 = vrot.slane %v3004_v13, 2  ;;  %v723_v30 = vrot.slane %v3006_v14, 1 }
  0x9f   : > { %v712_v31 = vsel %vm691_vm0, %v711_v15, %v2992_v7  ;;  %v733_v32 = vsel %vm691_vm0, %v2955_v19, %v732_v23  ;;  %v734_v33 = vrot.slane %v2957_v20, 7  ;;  %v736_v34 = vrot.slane %v2959_v21, 6 }
  0xa0   : > { %v714_v35 = vsel %vm694_vm1, %v713_v16, %v712_v31  ;;  %v738_v36 = vrot.slane %v2961_v22, 5  ;;  %v740_v37 = vrot.slane %v2964_v24, 4  ;;  %v742_v38 = vrot.slane %v2966_v25, 3 }
  0xa1   : > { %v716_v39 = vsel %vm697_vm2, %v715_v17, %v714_v35  ;;  %v735_v40 = vsel %vm694_vm1, %v734_v33, %v733_v32  ;;  %v744_v41 = vrot.slane %v2968_v26, 2  ;;  %v746_v42 = vrot.slane %v2992_v7, 1 }
  0xa2   : > { %v718_v43 = vsel %vm700_vm3, %v717_v27, %v716_v39  ;;  %v737_v44 = vsel %vm697_vm2, %v736_v34, %v735_v40  ;;  %v748_v45 = vrot.slane %v2996_v9, 7  ;;  %v750_v46 = vrot.slane %v2998_v10, 6 }
  0xa3   : > { %v720_v47 = vsel %vm703_vm4, %v719_v28, %v718_v43  ;;  %v739_v48 = vsel %vm700_vm3, %v738_v36, %v737_v44  ;;  %v747_v49 = vsel %vm691_vm0, %v2994_v8, %v746_v42  ;;  %v752_v50 = vrot.slane %v3000_v11, 5 }
  0xa4   : > { %v722_v51 = vsel %vm706_vm5, %v721_v29, %v720_v47  ;;  %v741_v52 = vsel %vm703_vm4, %v740_v37, %v739_v48  ;;  %v749_v53 = vsel %vm694_vm1, %v748_v45, %v747_v49  ;;  %v754_v54 = vrot.slane %v3002_v12, 4 }
  0xa5   : > { %v724_v55 = vsel %vm709_vm6, %v723_v30, %v722_v51  ;;  %v743_v56 = vsel %vm706_vm5, %v742_v38, %v741_v52  ;;  %v751_v57 = vsel %vm697_vm2, %v750_v46, %v749_v53  ;;  %v756_v58 = vrot.slane %v3004_v13, 3 }
  0xa6   : > { %v726_v59 = vpack.c.b16 %v724_v55, %v724_v55  ;;  %v745_v60 = vsel %vm709_vm6, %v744_v41, %v743_v56  ;;  %v753_v61 = vsel %vm700_vm3, %v752_v50, %v751_v57  ;;  %v758_v62 = vrot.slane %v3006_v14, 2 }
  0xa7   : > { %v760_v63 = vpack.c.b16 %v745_v60, %v745_v60  ;;  %v755_v0 = vsel %vm703_vm4, %v754_v54, %v753_v61  ;;  %v767_v1 = vrot.slane %v2953_v18, 2  ;;  %v768_v2 = vrot.slane %v2955_v19, 1 }
  0xa8   : > { %731 = vst.msk [vmem:[#allocation2 + $0x4] sm:$0xf] %vm729_vm7, %v726_v59  ;;  %v757_v3 = vsel %vm706_vm5, %v756_v58, %v755_v0  ;;  %v771_v4 = vrot.slane %v2959_v21, 7  ;;  %v773_v5 = vrot.slane %v2961_v22, 6  ;;  %v775_v6 = vrot.slane %v2964_v24, 5 }
  0xa9   : > { %765 = vst.msk [vmem:[#allocation2 + $0x8] sm:$0xf] %vm729_vm7, %v760_v63  ;;  %v759_v15 = vsel %vm709_vm6, %v758_v62, %v757_v3  ;;  %v769_v16 = vsel %vm691_vm0, %v768_v2, %v767_v1  ;;  %v777_v17 = vrot.slane %v2966_v25, 4  ;;  %v779_v23 = vrot.slane %v2968_v26, 3 }
  0xaa   : > { %v761_v27 = vpack.c.b16 %v759_v15, %v759_v15  ;;  %v770_v28 = vsel %vm694_vm1, %v2957_v20, %v769_v16  ;;  %v781_v29 = vrot.slane %v2992_v7, 2  ;;  %v782_v30 = vrot.slane %v2994_v8, 1 }
  0xab   : > { %v772_v31 = vsel %vm697_vm2, %v771_v4, %v770_v28  ;;  %v785_v32 = vrot.slane %v2998_v10, 7  ;;  %v787_v33 = vrot.slane %v3000_v11, 6  ;;  %v789_v34 = vrot.slane %v3002_v12, 5 }
  0xac   : > { %766 = vst.msk [vmem:[#allocation2 + $0xc] sm:$0xf] %vm729_vm7, %v761_v27  ;;  %v774_v35 = vsel %vm700_vm3, %v773_v5, %v772_v31  ;;  %v783_v36 = vsel %vm691_vm0, %v782_v30, %v781_v29  ;;  %v791_v37 = vrot.slane %v3004_v13, 4  ;;  %v793_v38 = vrot.slane %v3006_v14, 3 }
  0xad   : > { %v776_v39 = vsel %vm703_vm4, %v775_v6, %v774_v35  ;;  %v784_v40 = vsel %vm694_vm1, %v2996_v9, %v783_v36  ;;  %v802_v41 = vrot.slane %v2953_v18, 3  ;;  %v803_v42 = vrot.slane %v2955_v19, 2 }
  0xae   : > { %v778_v43 = vsel %vm706_vm5, %v777_v17, %v776_v39  ;;  %v786_v44 = vsel %vm697_vm2, %v785_v32, %v784_v40  ;;  %v805_v45 = vrot.slane %v2957_v20, 1  ;;  %v808_v46 = vrot.slane %v2961_v22, 7 }
  0xaf   : > { %v780_v47 = vsel %vm709_vm6, %v779_v23, %v778_v43  ;;  %v788_v48 = vsel %vm700_vm3, %v787_v33, %v786_v44  ;;  %v804_v49 = vsel %vm691_vm0, %v803_v42, %v802_v41  ;;  %v810_v50 = vrot.slane %v2964_v24, 6 }
  0xb0   : > { %v795_v51 = vpack.c.b16 %v780_v47, %v780_v47  ;;  %v790_v18 = vsel %vm703_vm4, %v789_v34, %v788_v48  ;;  %v806_v19 = vsel %vm694_vm1, %v805_v45, %v804_v49  ;;  %v812_v52 = vrot.slane %v2966_v25, 5 }
  0xb1   : > { %v792_v53 = vsel %vm706_vm5, %v791_v37, %v790_v18  ;;  %v807_v20 = vsel %vm697_vm2, %v2959_v21, %v806_v19  ;;  %v814_v22 = vrot.slane %v2968_v26, 4  ;;  %v816_v54 = vrot.slane %v2992_v7, 3 }
  0xb2   : > { %800 = vst.msk [vmem:[#allocation2 + $0x10] sm:$0xf] %vm729_vm7, %v795_v51  ;;  %v794_v24 = vsel %vm709_vm6, %v793_v38, %v792_v53  ;;  %v809_v55 = vsel %vm700_vm3, %v808_v46, %v807_v20  ;;  %v817_v56 = vrot.slane %v2994_v8, 2  ;;  %v819_v57 = vrot.slane %v2996_v9, 1 }
  0xb3   : > { %v796_v25 = vpack.c.b16 %v794_v24, %v794_v24  ;;  %v811_v58 = vsel %vm703_vm4, %v810_v50, %v809_v55  ;;  %v822_v59 = vrot.slane %v3000_v11, 7  ;;  %v824_v7 = vrot.slane %v3002_v12, 6 }
  0xb4   : > { %v813_v21 = vsel %vm706_vm5, %v812_v52, %v811_v58  ;;  %v818_v26 = vsel %vm691_vm0, %v817_v56, %v816_v54  ;;  %v826_v60 = vrot.slane %v3004_v13, 5  ;;  %vm837_vm8 = vcmask 7168  }
  0xb5   : > { %801 = vst.msk [vmem:[#allocation2 + $0x14] sm:$0xf] %vm729_vm7, %v796_v25  ;;  %v815_v61 = vsel %vm709_vm6, %v814_v22, %v813_v21  ;;  %v820_v8 = vsel %vm694_vm1, %v819_v57, %v818_v26  ;;  %v828_v11 = vrot.slane %v3006_v14, 4  ;;  %v2720_v63 = vmov -1e+30  }
  0xb6   : > { %v830_v9 = vpack.c.b16 %v815_v61, %v815_v61  ;;  %v821_v62 = vsel %vm697_vm2, %v2998_v10, %v820_v8  ;;  %838 = vst.msk [vmem:[#allocation3] sm:$0xff] %vm837_vm8, %v2720_v63  ;;  %v2721_v14 = vmov 0.0   ;;  %vm854_vm9 = vcmask 261120  }
  0xb7   : > { %v823_v12 = vsel %vm700_vm3, %v822_v59, %v821_v62  ;;  %839 = vst.msk [vmem:[#allocation3 + $0x8] sm:$0xff] %vm837_vm8, %v2720_v63 }
  0xb8   : > { %835 = vst.msk [vmem:[#allocation2 + $0x18] sm:$0xf] %vm729_vm7, %v830_v9  ;;  %v825_v13 = vsel %vm703_vm4, %v824_v7, %v823_v12 }
  0xb9   : > { %v827_v0 = vsel %vm706_vm5, %v826_v60, %v825_v13  ;;  %840 = vst.msk [vmem:[#allocation3 + $0x10] sm:$0xff] %vm837_vm8, %v2720_v63 }
  0xba   : > { %v829_v1 = vsel %vm709_vm6, %v828_v11, %v827_v0  ;;  %841 = vst.msk [vmem:[#allocation3 + $0x18] sm:$0xff] %vm837_vm8, %v2720_v63 }
  0xbb   : > { %v831_v10 = vpack.c.b16 %v829_v1, %v829_v1  ;;  %842 = vst.msk [vmem:[#allocation3 + $0x20] sm:$0xff] %vm837_vm8, %v2720_v63 }
  0xbc   : > { %843 = vst.msk [vmem:[#allocation3 + $0x28] sm:$0xff] %vm837_vm8, %v2720_v63 }
  0xbd   : > { %836 = vst.msk [vmem:[#allocation2 + $0x1c] sm:$0xf] %vm729_vm7, %v831_v10 }
  0xbe   : > { %844 = vst.msk [vmem:[#allocation3 + $0x30] sm:$0xff] %vm837_vm8, %v2720_v63 }
  0xbf   : > { %845 = vst.msk [vmem:[#allocation3 + $0x38] sm:$0xff] %vm837_vm8, %v2720_v63 }
  0xc0   : > { %846 = vst.msk [vmem:[#allocation4] sm:$0xff] %vm837_vm8, %v2721_v14 }
  0xc1   : > { %847 = vst.msk [vmem:[#allocation4 + $0x8] sm:$0xff] %vm837_vm8, %v2721_v14 }
  0xc2   : > { %848 = vst.msk [vmem:[#allocation4 + $0x10] sm:$0xff] %vm837_vm8, %v2721_v14 }
  0xc3   : > { %849 = vst.msk [vmem:[#allocation4 + $0x18] sm:$0xff] %vm837_vm8, %v2721_v14 }
  0xc4   : > { %850 = vst.msk [vmem:[#allocation4 + $0x20] sm:$0xff] %vm837_vm8, %v2721_v14 }
  0xc5   : > { %851 = vst.msk [vmem:[#allocation4 + $0x28] sm:$0xff] %vm837_vm8, %v2721_v14 }
  0xc6   : > { %852 = vst.msk [vmem:[#allocation4 + $0x30] sm:$0xff] %vm837_vm8, %v2721_v14 }
  0xc7   : > { %853 = vst.msk [vmem:[#allocation4 + $0x38] sm:$0xff] %vm837_vm8, %v2721_v14 }
  0xc8   : > { %855 = vst.msk [vmem:[#allocation5] sm:$0xff] %vm854_vm9, %v2721_v14 }
  0xc9   : > { %856 = vst.msk [vmem:[#allocation5 + $0x8] sm:$0xff] %vm854_vm9, %v2721_v14 }
  0xca   : > { %857 = vst.msk [vmem:[#allocation5 + $0x10] sm:$0xff] %vm854_vm9, %v2721_v14 }
  0xcb   : > { %858 = vst.msk [vmem:[#allocation5 + $0x18] sm:$0xff] %vm854_vm9, %v2721_v14 }
  0xcc   : > { %859 = vst.msk [vmem:[#allocation5 + $0x20] sm:$0xff] %vm854_vm9, %v2721_v14 }
  0xcd   : > { %860 = vst.msk [vmem:[#allocation5 + $0x28] sm:$0xff] %vm854_vm9, %v2721_v14 }
  0xce   : > { %861 = vst.msk [vmem:[#allocation5 + $0x30] sm:$0xff] %vm854_vm9, %v2721_v14 }
  0xcf   : > { %862 = vst.msk [vmem:[#allocation5 + $0x38] sm:$0xff] %vm854_vm9, %v2721_v14 }
  0xd0 PF: > { %v3137_v2 = vld [vmem:[%s2939_s10] sm:$0x3]  ;;  %v3140_v3 = vld [vmem:[%s2939_s10 + $0x2] sm:$0x3]  ;;  %v3145_v4 = vld [vmem:[%s2939_s10 + $0x4] sm:$0x3]  ;;  %p2506_p2 = scmp.ne.s32.totalorder %s2928_s16, %s2925_s12 }
  0xd1   : > { %917 = vst [vmem:[#allocation1] ss:$4 sm:$0xff] %v3137_v2  ;;  %v3148_v5 = vld [vmem:[%s2939_s10 + $0x6] sm:$0x3]  ;;  %v3153_v16 = vld [vmem:[%s2939_s10 + $0x8] sm:$0x3] }
  0xd2   : > { %922 = vst [vmem:[#allocation1 + $0x20] ss:$4 sm:$0xff] %v3140_v3  ;;  %v3156_v17 = vld [vmem:[%s2939_s10 + $0xa] sm:$0x3]  ;;  %v3161_v28 = vld [vmem:[%s2939_s10 + $0xc] sm:$0x3] }
  0xd3   : > { %v3164_v29 = vld [vmem:[%s2939_s10 + $0xe] sm:$0x3]  ;;  %v3169_v32 = vld [vmem:[%s2939_s10 + $0x10] sm:$0x3]  ;;  %v3172_v33 = vld [vmem:[%s2939_s10 + $0x12] sm:$0x3] }
  0xd4   : > { %v3179_v36 = vld [vmem:[%s2939_s10 + $0x14] sm:$0x3]  ;;  %v3182_v37 = vld [vmem:[%s2939_s10 + $0x16] sm:$0x3]  ;;  %v3187_v42 = vld [vmem:[%s2939_s10 + $0x18] sm:$0x3] }
  0xd5   : > { %v3190_v46 = vld [vmem:[%s2939_s10 + $0x1a] sm:$0x3]  ;;  %vm998_vm10 = vcmask 1041409   ;;  %vm1001_vm11 = vcmask 1042434   ;;  %vm1004_vm12 = vcmask 1043459   ;;  %vm1007_vm13 = vcmask 1044484  }
  0xd6   : > { %v3197_v55 = vld [vmem:[%s2939_s10 + $0x1c] sm:$0x3]  ;;  %v3201_v25 = vld [vmem:[%s2939_s10 + $0x1e] sm:$0x3]  ;;  %vm1010_vm14 = vcmask 1045509   ;;  %vm1013_vm15 = vcmask 1046534  }
  0xd7   : > { %3994 = vst [vmem:[#allocation12_spill] sm:$0xff] %v3201_v25  ;;  %vm1016_vm0 = vcmask 1047559   ;;  %vm1033_vm1 = vcmask 261120   ;;  %s2480_s28 = sshll.u32 %s2925_s12, 4  ;;  %s2481_s7 = sshll.u32 %s2928_s16, 4  ;;  %vm1058_vm3 = vcmask 130048  }
  0xd8   : > { %v918_v6 = vld.sshfl [vmem:[#allocation1] sm:$0xff pattern:$0x73625140]  ;;  %vm1101_vm5 = vcmask 7168   ;;  %s2724_s8 = smov (!%p2506_p2), 64   ;;  %s2725_s11 = smov (!%p2506_p2), 32  }
  0xd9   : > { %v923_v15 = vld.sshfl [vmem:[#allocation1 + $0x20] sm:$0xff pattern:$0x73625140]  ;;  %926 = vst [vmem:[#allocation1] ss:$4 sm:$0xff] %v3145_v4  ;;  %v981_v43 = vunpack.c.l.b16 %v918_v6  ;;  %s2726_s30 = smov (!%p2506_p2), 96  }
  0xda   : > { %930 = vst [vmem:[#allocation1 + $0x20] ss:$4 sm:$0xff] %v3148_v5  ;;  %v982_v40 = vunpack.c.l.b16 %v923_v15  ;;  %v3213_v6 = vld [vmem:[%s2941_s6] sm:$0x3] }
  0xdb   : > { %3995 = vst [vmem:[#allocation13_spill] sm:$0xff] %v3213_v6 }
  0xdc   : > { %v997_v45 = vrot.slane %v982_v40, 7 }
  0xde   : > { %v999_v19 = vsel %vm998_vm10, %v997_v45, %v981_v43 }
  0xe0   : > { %v927_v23 = vld.sshfl [vmem:[#allocation1] sm:$0xff pattern:$0x73625140] }
  0xe1   : > { %v931_v27 = vld.sshfl [vmem:[#allocation1 + $0x20] sm:$0xff pattern:$0x73625140]  ;;  %934 = vst [vmem:[#allocation1] ss:$4 sm:$0xff] %v3153_v16  ;;  %v983_v41 = vunpack.c.l.b16 %v927_v23 }
  0xe2   : > { %938 = vst [vmem:[#allocation1 + $0x20] ss:$4 sm:$0xff] %v3156_v17  ;;  %v984_v48 = vunpack.c.l.b16 %v931_v27  ;;  %v3216_v27 = vld [vmem:[%s2941_s6 + $0x2] sm:$0x3] }
  0xe3   : > { %v1000_v51 = vrot.slane %v983_v41, 6  ;;  %3996 = vst [vmem:[#allocation14_spill] sm:$0xff] %v3216_v27 }
  0xe4   : > { %v1003_v22 = vrot.slane %v984_v48, 5  ;;  %v3229_v48 = vld [vmem:[%s2941_s6 + $0x6] sm:$0x3] }
  0xe5   : > { %v1002_v54 = vsel %vm1001_vm11, %v1000_v51, %v999_v19  ;;  %3998 = vst [vmem:[#allocation16_spill] sm:$0xff] %v3229_v48  ;;  %v3239_v19 = vld [vmem:[%s2941_s6 + $0x8] sm:$0x3] }
  0xe6   : > { %v1005_v21 = vsel %vm1004_vm12, %v1003_v22, %v1002_v54  ;;  %4000 = vst [vmem:[#allocation18_spill] sm:$0xff] %v3239_v19  ;;  %v3252_v22 = vld [vmem:[%s2941_s6 + $0xc] sm:$0x3]  ;;  %v3255_v54 = vld [vmem:[%s2941_s6 + $0xe] sm:$0x3] }
  0xe7   : > { %4002 = vst [vmem:[#allocation20_spill] sm:$0xff] %v3252_v22 }
  0xe8   : > { %v935_v30 = vld.sshfl [vmem:[#allocation1] sm:$0xff pattern:$0x73625140]  ;;  %4003 = vst [vmem:[#allocation21_spill] sm:$0xff] %v3255_v54 }
  0xe9   : > { %v939_v31 = vld.sshfl [vmem:[#allocation1 + $0x20] sm:$0xff pattern:$0x73625140]  ;;  %942 = vst [vmem:[#allocation1] ss:$4 sm:$0xff] %v3161_v28  ;;  %v985_v53 = vunpack.c.l.b16 %v935_v30 }
  0xea   : > { %946 = vst [vmem:[#allocation1 + $0x20] ss:$4 sm:$0xff] %v3164_v29  ;;  %v986_v56 = vunpack.c.l.b16 %v939_v31 }
  0xeb   : > { %v1006_v58 = vrot.slane %v985_v53, 4 }
  0xec   : > { %v1009_v62 = vrot.slane %v986_v56, 3 }
  0xed   : > { %v1008_v11 = vsel %vm1007_vm13, %v1006_v58, %v1005_v21  ;;  %v3267_v58 = vld [vmem:[%s2941_s6 + $0x12] sm:$0x3] }
  0xee   : > { %v1011_v1 = vsel %vm1010_vm14, %v1009_v62, %v1008_v11  ;;  %4006 = vst [vmem:[#allocation24_spill] sm:$0xff] %v3267_v58 }
  0xf0   : > { %v943_v34 = vld.sshfl [vmem:[#allocation1] sm:$0xff pattern:$0x73625140] }
  0xf1   : > { %v3174_v35 = vld.sshfl [vmem:[#allocation1 + $0x20] sm:$0xff pattern:$0x73625140]  ;;  %950 = vst [vmem:[#allocation1] ss:$4 sm:$0xff] %v3169_v32  ;;  %v987_v60 = vunpack.c.l.b16 %v943_v34 }
  0xf2   : > { %954 = vst [vmem:[#allocation1 + $0x20] ss:$4 sm:$0xff] %v3172_v33  ;;  %v988_v12 = vunpack.c.l.b16 %v3174_v35 }
  0xf3   : > { %v1012_v0 = vrot.slane %v987_v60, 2 }
  0xf4   : > { %v1015_v23 = vrot.slane %v988_v12, 1  ;;  %v3303_v12 = vld [vmem:[%s2941_s6 + $0x1e] sm:$0x3] }
  0xf5   : > { %v1014_v34 = vsel %vm1013_vm15, %v1012_v0, %v1011_v1  ;;  %4017 = vst [vmem:[#allocation35_spill] sm:$0xff] %v3303_v12 }
  0xf6   : > { %v1017_v40 = vsel %vm1016_vm0, %v1015_v23, %v1014_v34 }
  0xf8   : > { %v951_v38 = vld.sshfl [vmem:[#allocation1] sm:$0xff pattern:$0x73625140] }
  0xf9   : > { %v955_v39 = vld.sshfl [vmem:[#allocation1 + $0x20] sm:$0xff pattern:$0x73625140]  ;;  %958 = vst [vmem:[#allocation1] ss:$4 sm:$0xff] %v3179_v36  ;;  %v989_v18 = vunpack.c.l.b16 %v951_v38 }
  0xfa   : > { %962 = vst [vmem:[#allocation1 + $0x20] ss:$4 sm:$0xff] %v3182_v37  ;;  %v990_v44 = vunpack.c.l.b16 %v955_v39 }
  0xfc   : > { %v1018_v52 = vrot.slane %v990_v44, 7 }
  0xfe   : > { %v1019_v57 = vsel %vm998_vm10, %v1018_v52, %v989_v18  ;;  %v2509_v18 = vld [vmem:[#allocation2] sm:$0xff]  ;;  %v3242_v52 = vld [vmem:[%s2941_s6 + $0xa] sm:$0x3] }
  0xff   : > { %4001 = vst [vmem:[#allocation19_spill] sm:$0xff] %v3242_v52 }
 0x100   : > { %v959_v47 = vld.sshfl [vmem:[#allocation1] sm:$0xff pattern:$0x73625140] }
 0x101   : > { %v963_v49 = vld.sshfl [vmem:[#allocation1 + $0x20] sm:$0xff pattern:$0x73625140]  ;;  %966 = vst [vmem:[#allocation1] ss:$4 sm:$0xff] %v3187_v42  ;;  %v991_v50 = vunpack.c.l.b16 %v959_v47 }
 0x102   : > { %970 = vst [vmem:[#allocation1 + $0x20] ss:$4 sm:$0xff] %v3190_v46  ;;  %v992_v20 = vunpack.c.l.b16 %v963_v49  ;;  %v3226_v47 = vld [vmem:[%s2941_s6 + $0x4] sm:$0x3] }
 0x103   : > { %v1020_v24 = vrot.slane %v991_v50, 6  ;;  %3997 = vst [vmem:[#allocation15_spill] sm:$0xff] %v3226_v47 }
 0x104   : > { %v1022_v26 = vrot.slane %v992_v20, 5 }
 0x105   : > { %v1021_v8 = vsel %vm1001_vm11, %v1020_v24, %v1019_v57  ;;  %v3264_v57 = vld [vmem:[%s2941_s6 + $0x10] sm:$0x3] }
 0x106   : > { %v1023_v13 = vsel %vm1004_vm12, %v1022_v26, %v1021_v8  ;;  %4005 = vst [vmem:[#allocation23_spill] sm:$0xff] %v3264_v57  ;;  %v3276_v26 = vld [vmem:[%s2941_s6 + $0x14] sm:$0x3]  ;;  %v3288_v8 = vld [vmem:[%s2941_s6 + $0x18] sm:$0x3] }
 0x107   : > { %4009 = vst [vmem:[#allocation27_spill] sm:$0xff] %v3276_v26 }
 0x108   : > { %v967_v59 = vld.sshfl [vmem:[#allocation1] sm:$0xff pattern:$0x73625140]  ;;  %4012 = vst [vmem:[#allocation30_spill] sm:$0xff] %v3288_v8 }
 0x109   : > { %v971_v7 = vld.sshfl [vmem:[#allocation1 + $0x20] sm:$0xff pattern:$0x73625140]  ;;  %974 = vst [vmem:[#allocation1] ss:$4 sm:$0xff] %v3197_v55  ;;  %v993_v61 = vunpack.c.l.b16 %v967_v59 }
 0x10a   : > { %978 = vst [vmem:[#allocation1 + $0x20] ss:$4 sm:$0xff] %v3201_v25  ;;  %v994_v9 = vunpack.c.l.b16 %v971_v7  ;;  %v3279_v7 = vld [vmem:[%s2941_s6 + $0x16] sm:$0x3] }
 0x10b   : > { %v1024_v63 = vrot.slane %v993_v61, 4  ;;  %4010 = vst [vmem:[#allocation28_spill] sm:$0xff] %v3279_v7 }
 0x10c   : > { %v1026_v10 = vrot.slane %v994_v9, 3  ;;  %v3291_v9 = vld [vmem:[%s2941_s6 + $0x1a] sm:$0x3] }
 0x10d   : > { %v1025_v14 = vsel %vm1007_vm13, %v1024_v63, %v1023_v13  ;;  %4013 = vst [vmem:[#allocation31_spill] sm:$0xff] %v3291_v9  ;;  %v3300_v63 = vld [vmem:[%s2941_s6 + $0x1c] sm:$0x3] }
 0x10e   : > { %v1027_v38 = vsel %vm1010_vm14, %v1026_v10, %v1025_v14  ;;  %4016 = vst [vmem:[#allocation34_spill] sm:$0xff] %v3300_v63 }
 0x110   : > { %v975_v15 = vld.sshfl [vmem:[#allocation1] sm:$0xff pattern:$0x73625140] }
 0x111   : > { %v979_v30 = vld.sshfl [vmem:[#allocation1 + $0x20] sm:$0xff pattern:$0x73625140]  ;;  %v995_v31 = vunpack.c.l.b16 %v975_v15  ;;  %1120 = vst [vmem:[#allocation1] ss:$4 sm:$0xff] %v3213_v6 }
 0x112   : > { %v996_v35 = vunpack.c.l.b16 %v979_v30  ;;  %1125 = vst [vmem:[#allocation1 + $0x20] ss:$4 sm:$0xff] %v3216_v27 }
 0x113   : > { %v1028_v39 = vrot.slane %v995_v31, 2 }
 0x114   : > { %v1030_v41 = vrot.slane %v996_v35, 1 }
 0x115   : > { %v1029_v43 = vsel %vm1013_vm15, %v1028_v39, %v1027_v38 }
 0x116   : > { %v1031_v44 = vsel %vm1016_vm0, %v1030_v41, %v1029_v43 }
 0x117   : > { %v1032_v45 = vpack.c.b16 %v1031_v44, %v1017_v40 }
 0x118   : > { %v3232_v50 = vld.sshfl [vmem:[#allocation1] sm:$0xff pattern:$0x73625140] }
 0x119   : > { %v1038_v49 = vsel %vm1033_vm1, %v1032_v45, 0  ;;  %3999 = vst [vmem:[#allocation17_spill] sm:$0xff] %v3232_v50  ;;  %v3234_v51 = vld.sshfl [vmem:[#allocation1 + $0x20] sm:$0xff pattern:$0x73625140] }
 0x11a   : > { %1047 = vmatpush.bf16.xpose.msra.mxu0 %v1038_v49  ;;  %1129 = vst [vmem:[#allocation1] ss:$4 sm:$0xff] %v3226_v47 }
 0x11b   : > { %1133 = vst [vmem:[#allocation1 + $0x20] ss:$4 sm:$0xff] %v3229_v48 }
 0x121   : > { %2486 = vmatmul.msk.bf16.vlgmr.msra.gmra.mxu0 %vm1033_vm1, %v2509_v18  ;;  %v3245_v53 = vld.sshfl [vmem:[#allocation1] sm:$0xff pattern:$0x73625140] }
 0x122   : > { %v3247_v20 = vld.sshfl [vmem:[#allocation1 + $0x20] sm:$0xff pattern:$0x73625140]  ;;  %1137 = vst [vmem:[#allocation1] ss:$4 sm:$0xff] %v3239_v19 }
 0x123   : > { %1141 = vst [vmem:[#allocation1 + $0x20] ss:$4 sm:$0xff] %v3242_v52 }
 0x129   : > { %v3257_v24 = vld.sshfl [vmem:[#allocation1] sm:$0xff pattern:$0x73625140] }
 0x12a   : > { %v3259_v56 = vld.sshfl [vmem:[#allocation1 + $0x20] sm:$0xff pattern:$0x73625140]  ;;  %1145 = vst [vmem:[#allocation1] ss:$4 sm:$0xff] %v3252_v22 }
 0x12b   : > { %4004 = vst [vmem:[#allocation22_spill] sm:$0xff] %v3259_v56 }
 0x12c   : > { %1149 = vst [vmem:[#allocation1 + $0x20] ss:$4 sm:$0xff] %v3255_v54 }
 0x131   : > { %v3269_v59 = vld.sshfl [vmem:[#allocation1] sm:$0xff pattern:$0x73625140] }
 0x132   : > { %4007 = vst [vmem:[#allocation25_spill] sm:$0xff] %v3269_v59 }
 0x133   : > { %v3271_v21 = vld.sshfl [vmem:[#allocation1 + $0x20] sm:$0xff pattern:$0x73625140]  ;;  %1153 = vst [vmem:[#allocation1] ss:$4 sm:$0xff] %v3264_v57 }
 0x134   : > { %4008 = vst [vmem:[#allocation26_spill] sm:$0xff] %v3271_v21 }
 0x135   : > { %1157 = vst [vmem:[#allocation1 + $0x20] ss:$4 sm:$0xff] %v3267_v58 }
 0x13a   : > { %v3281_v60 = vld.sshfl [vmem:[#allocation1] sm:$0xff pattern:$0x73625140] }
 0x13b   : > { %4011 = vst [vmem:[#allocation29_spill] sm:$0xff] %v3281_v60 }
 0x13c   : > { %v3283_v61 = vld.sshfl [vmem:[#allocation1 + $0x20] sm:$0xff pattern:$0x73625140]  ;;  %1161 = vst [vmem:[#allocation1] ss:$4 sm:$0xff] %v3276_v26 }
 0x13d   : > { %1165 = vst [vmem:[#allocation1 + $0x20] ss:$4 sm:$0xff] %v3279_v7 }
 0x143   : > { %v3293_v62 = vld.sshfl [vmem:[#allocation1] sm:$0xff pattern:$0x73625140] }
 0x144   : > { %4014 = vst [vmem:[#allocation32_spill] sm:$0xff] %v3293_v62  ;;  %v3295_v11 = vld.sshfl [vmem:[#allocation1 + $0x20] sm:$0xff pattern:$0x73625140] }
 0x145   : > { %4015 = vst [vmem:[#allocation33_spill] sm:$0xff] %v3295_v11 }
 0x146   : > { %1169 = vst [vmem:[#allocation1] ss:$4 sm:$0xff] %v3288_v8 }
 0x147   : > { %1173 = vst [vmem:[#allocation1 + $0x20] ss:$4 sm:$0xff] %v3291_v9 }
 0x14d   : > { %v3305_v13 = vld.sshfl [vmem:[#allocation1] sm:$0xff pattern:$0x73625140] }
 0x14e   : > { %4018 = vst [vmem:[#allocation36_spill] sm:$0xff] %v3305_v13  ;;  %v3307_v0 = vld.sshfl [vmem:[#allocation1 + $0x20] sm:$0xff pattern:$0x73625140] }
 0x14f   : > { %4019 = vst [vmem:[#allocation37_spill] sm:$0xff] %v3307_v0 }
 0x150   : > { %1177 = vst [vmem:[#allocation1] ss:$4 sm:$0xff] %v3300_v63 }
 0x151   : > { %1181 = vst [vmem:[#allocation1 + $0x20] ss:$4 sm:$0xff] %v3303_v12 }
 0x157   : > { %v3311_v1 = vld.sshfl [vmem:[#allocation1] sm:$0xff pattern:$0x73625140] }
 0x158   : > { %4020 = vst [vmem:[#allocation38_spill] sm:$0xff] %v3311_v1  ;;  %v3313_v10 = vld.sshfl [vmem:[#allocation1 + $0x20] sm:$0xff pattern:$0x73625140] }
 0x159   : > { %4021 = vst [vmem:[#allocation39_spill] sm:$0xff] %v3313_v10 }
 0x15a   : > { %1261 = vst [vmem:[#allocation1] ss:$4 sm:$0xff] %v3137_v2 }
 0x15b   : > { %1265 = vst [vmem:[#allocation1 + $0x20] ss:$4 sm:$0xff] %v3140_v3 }
 0x161   : > { %v1262_v14 = vld.sshfl [vmem:[#allocation1] sm:$0xff pattern:$0x73625140] }
 0x162   : > { %v1266_v15 = vld.sshfl [vmem:[#allocation1 + $0x20] sm:$0xff pattern:$0x73625140]  ;;  %1268 = vst [vmem:[#allocation1] ss:$4 sm:$0xff] %v3145_v4  ;;  %v1310_v41 = vunpack.c.l.b16 %v1262_v14 }
 0x163   : > { %1271 = vst [vmem:[#allocation1 + $0x20] ss:$4 sm:$0xff] %v3148_v5  ;;  %v1311_v44 = vunpack.c.l.b16 %v1266_v15 }
 0x164   : > { %v1326_v49 = vrot.slane %v1310_v41, 1 }
 0x166   : > { %v1327_v62 = vsel %vm998_vm10, %v1311_v44, %v1326_v49 }
 0x169   : > { %v1269_v23 = vld.sshfl [vmem:[#allocation1] sm:$0xff pattern:$0x73625140] }
 0x16a   : > { %v1272_v30 = vld.sshfl [vmem:[#allocation1 + $0x20] sm:$0xff pattern:$0x73625140]  ;;  %1274 = vst [vmem:[#allocation1] ss:$4 sm:$0xff] %v3153_v16  ;;  %v1312_v43 = vunpack.c.l.b16 %v1269_v23 }
 0x16b   : > { %1277 = vst [vmem:[#allocation1 + $0x20] ss:$4 sm:$0xff] %v3156_v17  ;;  %v1313_v10 = vunpack.c.l.b16 %v1272_v30 }
 0x16c   : > { %v1328_v13 = vrot.slane %v1312_v43, 7 }
 0x16d   : > { %v1330_v14 = vrot.slane %v1313_v10, 6 }
 0x16e   : > { %v1329_v15 = vsel %vm1001_vm11, %v1328_v13, %v1327_v62 }
 0x171   : > { %v1275_v31 = vld.sshfl [vmem:[#allocation1] sm:$0xff pattern:$0x73625140] }
 0x172   : > { %v1278_v34 = vld.sshfl [vmem:[#allocation1 + $0x20] sm:$0xff pattern:$0x73625140]  ;;  %1280 = vst [vmem:[#allocation1] ss:$4 sm:$0xff] %v3161_v28  ;;  %v1314_v21 = vunpack.c.l.b16 %v1275_v31 }
 0x173   : > { %1283 = vst [vmem:[#allocation1 + $0x20] ss:$4 sm:$0xff] %v3164_v29 }
 0x174   : > { %v1332_v41 = vrot.slane %v1314_v21, 5 }
 0x179   : > { %v1281_v35 = vld.sshfl [vmem:[#allocation1] sm:$0xff pattern:$0x73625140] }
 0x17a   : > { %v1284_v38 = vld.sshfl [vmem:[#allocation1 + $0x20] sm:$0xff pattern:$0x73625140]  ;;  %1286 = vst [vmem:[#allocation1] ss:$4 sm:$0xff] %v3169_v32 }
 0x17b   : > { %1289 = vst [vmem:[#allocation1 + $0x20] ss:$4 sm:$0xff] %v3172_v33 }
 0x181   : > { %v1287_v39 = vld.sshfl [vmem:[#allocation1] sm:$0xff pattern:$0x73625140] }
 0x182   : > { %v1290_v40 = vld.sshfl [vmem:[#allocation1 + $0x20] sm:$0xff pattern:$0x73625140]  ;;  %1292 = vst [vmem:[#allocation1] ss:$4 sm:$0xff] %v3179_v36  ;;  %v1318_v45 = vunpack.c.l.b16 %v1287_v39  ;;  %v1315_v39 = vunpack.c.l.b16 %v1278_v34  ;;  %v864_v34 = vlaneseq }
 0x183   : > { %1295 = vst [vmem:[#allocation1 + $0x20] ss:$4 sm:$0xff] %v3182_v37  ;;  %v1319_v11 = vunpack.c.l.b16 %v1290_v40  ;;  %v1316_v40 = vunpack.c.l.b16 %v1281_v35 }
 0x184   : > { %v1340_v60 = vrot.slane %v1318_v45, 1  ;;  %v1334_v13 = vrot.slane %v1315_v39, 4  ;;  %v872_v39 = vand.u32 127, %v864_v34 }
 0x186   : > { %v1341_v30 = vsel %vm998_vm10, %v1319_v11, %v1340_v60  ;;  %v1317_v11 = vunpack.c.l.b16 %v1284_v38 }
 0x188   : > { %v1338_v45 = vrot.slane %v1317_v11, 2 }
 0x189   : > { %v1293_v18 = vld.sshfl [vmem:[#allocation1] sm:$0xff pattern:$0x73625140] }
 0x18a   : > { %v1296_v1 = vld.sshfl [vmem:[#allocation1 + $0x20] sm:$0xff pattern:$0x73625140]  ;;  %1298 = vst [vmem:[#allocation1] ss:$4 sm:$0xff] %v3187_v42  ;;  %v1320_v0 = vunpack.c.l.b16 %v1293_v18  ;;  %v1331_v18 = vsel %vm1004_vm12, %v1330_v14, %v1329_v15 }
 0x18b   : > { %1301 = vst [vmem:[#allocation1 + $0x20] ss:$4 sm:$0xff] %v3190_v46  ;;  %v1321_v50 = vunpack.c.l.b16 %v1296_v1  ;;  %v1333_v60 = vsel %vm1007_vm13, %v1332_v41, %v1331_v18  ;;  %v867_v41 = vstv %s2480_s28  ;;  %v873_v18 = vstv %s2481_s7 }
 0x18c   : > { %v1342_v23 = vrot.slane %v1320_v0, 7  ;;  %v1335_v10 = vsel %vm1010_vm14, %v1334_v13, %v1333_v60  ;;  %v3351_v13 = vadd.s32 %v873_v18, %v872_v39 }
 0x18d   : > { %v1344_v43 = vrot.slane %v1321_v50, 6  ;;  %v1336_v50 = vrot.slane %v1316_v40, 3 }
 0x18e   : > { %v1343_v1 = vsel %vm1001_vm11, %v1342_v23, %v1341_v30  ;;  %v865_v23 = vshrl.u32 %v864_v34, 7 }
 0x18f   : > { %v1345_v0 = vsel %vm1004_vm12, %v1344_v43, %v1343_v1  ;;  %v1337_v14 = vsel %vm1013_vm15, %v1336_v50, %v1335_v10 }
 0x190   : > { %v1339_v43 = vsel %vm1016_vm0, %v1338_v45, %v1337_v14  ;;  %v866_v50 = vadd.s32 8, %v865_v23 }
 0x191   : > { %v1299_v59 = vld.sshfl [vmem:[#allocation1] sm:$0xff pattern:$0x73625140] }
 0x192   : > { %v1302_v56 = vld.sshfl [vmem:[#allocation1 + $0x20] sm:$0xff pattern:$0x73625140]  ;;  %1304 = vst [vmem:[#allocation1] ss:$4 sm:$0xff] %v3197_v55  ;;  %v1322_v44 = vunpack.c.l.b16 %v1299_v59 }
 0x193   : > { %1307 = vst [vmem:[#allocation1 + $0x20] ss:$4 sm:$0xff] %v3201_v25  ;;  %v1323_v62 = vunpack.c.l.b16 %v1302_v56 }
 0x194   : > { %v1346_v21 = vrot.slane %v1322_v44, 5 }
 0x195   : > { %v1348_v31 = vrot.slane %v1323_v62, 4  ;;  %v3349_v62 = vadd.s32 %v867_v41, %v865_v23 }
 0x196   : > { %v1347_v59 = vsel %vm1007_vm13, %v1346_v21, %v1345_v0 }
 0x197   : > { %v1349_v15 = vsel %vm1010_vm14, %v1348_v31, %v1347_v59  ;;  %vm875_vm2 = vcmp.le.s32.totalorder %v3351_v13, %v3349_v62  ;;  %v2510_v31 = vld [vmem:[#allocation2 + $0x8] sm:$0xff] }
 0x199   : > { %v1305_v35 = vld.sshfl [vmem:[#allocation1] sm:$0xff pattern:$0x73625140] }
 0x19a   : > { %v1308_v49 = vld.sshfl [vmem:[#allocation1 + $0x20] sm:$0xff pattern:$0x73625140]  ;;  %v1324_v56 = vunpack.c.l.b16 %v1305_v35  ;;  %1441 = vst [vmem:[#allocation1] ss:$4 sm:$0xff] %v3213_v6  ;;  %v3369_v35 = vadd.s32 %v867_v41, %v866_v50 }
 0x19b   : > { %v1325_v38 = vunpack.c.l.b16 %v1308_v49  ;;  %1445 = vst [vmem:[#allocation1 + $0x20] ss:$4 sm:$0xff] %v3216_v27 }
 0x19c   : > { %v1350_v30 = vrot.slane %v1324_v56, 3  ;;  %vm876_vm4 = vcmp.le.s32.totalorder %v3351_v13, %v3369_v35  ;;  %v3757_v13 = vld [vmem:[#allocation3 + $0x30] sm:$0xff] }
 0x19d   : > { %v1352_v40 = vrot.slane %v1325_v38, 2 }
 0x19e   : > { %v1351_v44 = vsel %vm1013_vm15, %v1350_v30, %v1349_v15  ;;  %v1049_v10 = vpop.f32.mrf.mxu0 }
 0x19f   : > { %v1353_v1 = vsel %vm1016_vm0, %v1352_v40, %v1351_v44  ;;  %v3365_v34 = vsel %vm875_vm2, %v1049_v10, -1e+30 }
 0x1a0   : > { %v1354_v60 = vpack.c.b16 %v1353_v1, %v1339_v43  ;;  %v1059_v59 = vsel %vm1058_vm3, %v3365_v34, -inf }
 0x1a1   : > { %v3353_v21 = vld.sshfl [vmem:[#allocation1] sm:$0xff pattern:$0x73625140]  ;;  %1060 = vmax.xlane.f32.xlu0 %v1059_v59 }
 0x1a2   : > { %4022 = vst [vmem:[#allocation40_spill] sm:$0xff] %v3353_v21  ;;  %v1359_v11 = vsel %vm1033_vm1, %v1354_v60, 0  ;;  %v3356_v0 = vld.sshfl [vmem:[#allocation1 + $0x20] sm:$0xff pattern:$0x73625140] }
 0x1a3   : > { %4023 = vst [vmem:[#allocation41_spill] sm:$0xff] %v3356_v0  ;;  %1368 = vmatpush.bf16.xpose.msra.mxu2 %v1359_v11 }
 0x1a4   : > { %1448 = vst [vmem:[#allocation1] ss:$4 sm:$0xff] %v3226_v47 }
 0x1a5   : > { %1451 = vst [vmem:[#allocation1 + $0x20] ss:$4 sm:$0xff] %v3229_v48 }
 0x1a6   : > { %v1051_v56 = vpop.f32.mrf.mxu0 }
 0x1a7   : > { %v3383_v14 = vsel %vm876_vm4, %v1051_v56, -1e+30 }
 0x1a8   : > { %4026 = vst [vmem:[#allocation44_spill] sm:$0xff] %v3383_v14  ;;  %v1062_v38 = vsel %vm1058_vm3, %v3383_v14, -inf  ;;  %v3474_v14 = vld [vmem:[#allocation3 + $0x8] sm:$0xff] }
 0x1a9   : > { %1063 = vmax.xlane.f32.xlu0 %v1062_v38 }
 0x1aa   : > { %2492 = vmatmul.msk.bf16.vlgmr.msra.gmra.mxu2 %vm1033_vm1, %v2510_v31 }
 0x1ab   : > { %v3371_v45 = vld.sshfl [vmem:[#allocation1] sm:$0xff pattern:$0x73625140] }
 0x1ac   : > { %4024 = vst [vmem:[#allocation42_spill] sm:$0xff] %v3371_v45  ;;  %v3374_v49 = vld.sshfl [vmem:[#allocation1 + $0x20] sm:$0xff pattern:$0x73625140] }
 0x1ad   : > { %4025 = vst [vmem:[#allocation43_spill] sm:$0xff] %v3374_v49 }
 0x1ae   : > { %1454 = vst [vmem:[#allocation1] ss:$4 sm:$0xff] %v3239_v19 }
 0x1af   : > { %1457 = vst [vmem:[#allocation1 + $0x20] ss:$4 sm:$0xff] %v3242_v52 }
 0x1b5   : > { %v3387_v15 = vld.sshfl [vmem:[#allocation1] sm:$0xff pattern:$0x73625140] }
 0x1b6   : > { %4027 = vst [vmem:[#allocation45_spill] sm:$0xff] %v3387_v15  ;;  %v3389_v23 = vld.sshfl [vmem:[#allocation1 + $0x20] sm:$0xff pattern:$0x73625140]  ;;  %v1056_v15 = vld [vmem:[#allocation3] sm:$0xff] }
 0x1b7   : > { %4028 = vst [vmem:[#allocation46_spill] sm:$0xff] %v3389_v23 }
 0x1b8   : > { %1460 = vst [vmem:[#allocation1] ss:$4 sm:$0xff] %v3252_v22 }
 0x1b9   : > { %1463 = vst [vmem:[#allocation1 + $0x20] ss:$4 sm:$0xff] %v3255_v54 }
 0x1bf   : > { %v3393_v39 = vld.sshfl [vmem:[#allocation1] sm:$0xff pattern:$0x73625140] }
 0x1c0   : > { %4029 = vst [vmem:[#allocation47_spill] sm:$0xff] %v3393_v39  ;;  %v3395_v30 = vld.sshfl [vmem:[#allocation1 + $0x20] sm:$0xff pattern:$0x73625140] }
 0x1c1   : > { %4030 = vst [vmem:[#allocation48_spill] sm:$0xff] %v3395_v30 }
 0x1c2   : > { %1466 = vst [vmem:[#allocation1] ss:$4 sm:$0xff] %v3264_v57 }
 0x1c3   : > { %1469 = vst [vmem:[#allocation1 + $0x20] ss:$4 sm:$0xff] %v3267_v58 }
 0x1c9   : > { %v3399_v41 = vld.sshfl [vmem:[#allocation1] sm:$0xff pattern:$0x73625140] }
 0x1ca   : > { %4031 = vst [vmem:[#allocation49_spill] sm:$0xff] %v3399_v41  ;;  %v3401_v18 = vld.sshfl [vmem:[#allocation1 + $0x20] sm:$0xff pattern:$0x73625140] }
 0x1cb   : > { %4032 = vst [vmem:[#allocation50_spill] sm:$0xff] %v3401_v18 }
 0x1cc   : > { %1472 = vst [vmem:[#allocation1] ss:$4 sm:$0xff] %v3276_v26 }
 0x1cd   : > { %1475 = vst [vmem:[#allocation1 + $0x20] ss:$4 sm:$0xff] %v3279_v7 }
 0x1d3   : > { %v3405_v43 = vld.sshfl [vmem:[#allocation1] sm:$0xff pattern:$0x73625140] }
 0x1d4   : > { %4033 = vst [vmem:[#allocation51_spill] sm:$0xff] %v3405_v43  ;;  %v3407_v40 = vld.sshfl [vmem:[#allocation1 + $0x20] sm:$0xff pattern:$0x73625140] }
 0x1d5   : > { %4034 = vst [vmem:[#allocation52_spill] sm:$0xff] %v3407_v40 }
 0x1d6   : > { %1478 = vst [vmem:[#allocation1] ss:$4 sm:$0xff] %v3288_v8 }
 0x1d7   : > { %1481 = vst [vmem:[#allocation1 + $0x20] ss:$4 sm:$0xff] %v3291_v9 }
 0x1dd   : > { %v3411_v44 = vld.sshfl [vmem:[#allocation1] sm:$0xff pattern:$0x73625140] }
 0x1de   : > { %4035 = vst [vmem:[#allocation53_spill] sm:$0xff] %v3411_v44  ;;  %v3413_v1 = vld.sshfl [vmem:[#allocation1 + $0x20] sm:$0xff pattern:$0x73625140] }
 0x1df   : > { %4036 = vst [vmem:[#allocation54_spill] sm:$0xff] %v3413_v1 }
 0x1e0   : > { %1484 = vst [vmem:[#allocation1] ss:$4 sm:$0xff] %v3300_v63 }
 0x1e1   : > { %1487 = vst [vmem:[#allocation1 + $0x20] ss:$4 sm:$0xff] %v3303_v12 }
 0x1e7   : > { %v3417_v60 = vld.sshfl [vmem:[#allocation1] sm:$0xff pattern:$0x73625140] }
 0x1e8   : > { %4037 = vst [vmem:[#allocation55_spill] sm:$0xff] %v3417_v60  ;;  %v3419_v11 = vld.sshfl [vmem:[#allocation1 + $0x20] sm:$0xff pattern:$0x73625140]  ;;  %v2722_v60 = vmov 0  }
 0x1e9   : > { %4038 = vst [vmem:[#allocation56_spill] sm:$0xff] %v3419_v11  ;;  %2594 = vset.pattern.permute.xlu1 %v2722_v60  ;;  %2595 = vset.pattern.permute.xlu2 %v2722_v60 }
 0x1ea   : > { %1567 = vst [vmem:[#allocation1] ss:$4 sm:$0xff] %v3137_v2  ;;  %2596 = vset.pattern.permute.xlu0 %v2722_v60 }
 0x1eb   : > { %1571 = vst [vmem:[#allocation1 + $0x20] ss:$4 sm:$0xff] %v3140_v3 }
 0x1f1   : > { %v3423_v50 = vld.sshfl [vmem:[#allocation1] sm:$0xff pattern:$0x73625140] }
 0x1f2   : > { %v3425_v10 = vld.sshfl [vmem:[#allocation1 + $0x20] sm:$0xff pattern:$0x73625140]  ;;  %1574 = vst [vmem:[#allocation1] ss:$4 sm:$0xff] %v3145_v4 }
 0x1f3   : > { %1577 = vst [vmem:[#allocation1 + $0x20] ss:$4 sm:$0xff] %v3148_v5 }
 0x1f9   : > { %v3429_v31 = vld.sshfl [vmem:[#allocation1] sm:$0xff pattern:$0x73625140] }
 0x1fa   : > { %v3431_v59 = vld.sshfl [vmem:[#allocation1 + $0x20] sm:$0xff pattern:$0x73625140]  ;;  %1580 = vst [vmem:[#allocation1] ss:$4 sm:$0xff] %v3153_v16 }
 0x1fb   : > { %1583 = vst [vmem:[#allocation1 + $0x20] ss:$4 sm:$0xff] %v3156_v17 }
 0x201   : > { %v3435_v56 = vld.sshfl [vmem:[#allocation1] sm:$0xff pattern:$0x73625140] }
 0x202   : > { %v3437_v38 = vld.sshfl [vmem:[#allocation1 + $0x20] sm:$0xff pattern:$0x73625140]  ;;  %1586 = vst [vmem:[#allocation1] ss:$4 sm:$0xff] %v3161_v28 }
 0x203   : > { %1589 = vst [vmem:[#allocation1 + $0x20] ss:$4 sm:$0xff] %v3164_v29 }
 0x209   : > { %v3441_v11 = vld.sshfl [vmem:[#allocation1] sm:$0xff pattern:$0x73625140] }
 0x20a   : > { %v3443_v30 = vld.sshfl [vmem:[#allocation1 + $0x20] sm:$0xff pattern:$0x73625140]  ;;  %1592 = vst [vmem:[#allocation1] ss:$4 sm:$0xff] %v3169_v32 }
 0x20b   : > { %1595 = vst [vmem:[#allocation1 + $0x20] ss:$4 sm:$0xff] %v3172_v33 }
 0x211   : > { %v3447_v39 = vld.sshfl [vmem:[#allocation1] sm:$0xff pattern:$0x73625140] }
 0x212   : > { %v3449_v1 = vld.sshfl [vmem:[#allocation1 + $0x20] sm:$0xff pattern:$0x73625140]  ;;  %1598 = vst [vmem:[#allocation1] ss:$4 sm:$0xff] %v3179_v36 }
 0x213   : > { %1601 = vst [vmem:[#allocation1 + $0x20] ss:$4 sm:$0xff] %v3182_v37 }
 0x214   : > { %v1061_v41 = vpop.xlane.xlu0 %1060 }
 0x215   : > { %v1065_v49 = vmax.f32 %v1056_v15, %v1061_v41 }
 0x217   : > { %v1067_v0 = vsub.f32 %v1056_v15, %v1065_v49  ;;  %1251 = vst.msk [vmem:[#allocation3] sm:$0xff] %vm1101_vm5, %v1065_v49  ;;  %1075 = vperm.xlu1 %2594, %v1065_v49  }
 0x219   : > { %v3453_v44 = vld.sshfl [vmem:[#allocation1] sm:$0xff pattern:$0x73625140]  ;;  %v1069_v45 = vmul.f32 1.442695, %v1067_v0 }
 0x21a   : > { %v3455_v23 = vld.sshfl [vmem:[#allocation1 + $0x20] sm:$0xff pattern:$0x73625140]  ;;  %1604 = vst [vmem:[#allocation1] ss:$4 sm:$0xff] %v3187_v42 }
 0x21b   : > { %1607 = vst [vmem:[#allocation1 + $0x20] ss:$4 sm:$0xff] %v3190_v46  ;;  %2597 = vpow2.f32 %v1069_v45 }
 0x221   : > { %v3459_v40 = vld.sshfl [vmem:[#allocation1] sm:$0xff pattern:$0x73625140]  ;;  %v3488_v0 = vpop.eup %2597 }
 0x222   : > { %v3461_v18 = vld.sshfl [vmem:[#allocation1 + $0x20] sm:$0xff pattern:$0x73625140]  ;;  %1610 = vst [vmem:[#allocation1] ss:$4 sm:$0xff] %v3197_v55  ;;  %1108 = vperm.xlu2 %2595, %v3488_v0  }
 0x223   : > { %1613 = vst [vmem:[#allocation1 + $0x20] ss:$4 sm:$0xff] %v3201_v25 }
 0x229   : > { %v3465_v60 = vld.sshfl [vmem:[#allocation1] sm:$0xff pattern:$0x73625140] }
 0x22a   : > { %v3467_v43 = vld.sshfl [vmem:[#allocation1 + $0x20] sm:$0xff pattern:$0x73625140]  ;;  %1747 = vst [vmem:[#allocation1] ss:$4 sm:$0xff] %v3213_v6 }
 0x22b   : > { %1751 = vst [vmem:[#allocation1 + $0x20] ss:$4 sm:$0xff] %v3216_v27  ;;  %v1064_v27 = vpop.xlane.xlu0 %1063 }
 0x22c   : > { %v3481_v6 = vmax.f32 %v3474_v14, %v1064_v27 }
 0x22d   : > { %v1370_v27 = vpop.f32.mrf.mxu2 }
 0x22e   : > { %1252 = vst.msk [vmem:[#allocation3 + $0x8] sm:$0xff] %vm1101_vm5, %v3481_v6  ;;  %1080 = vperm.xlu1 %2594, %v3481_v6  }
 0x231   : > { %v3472_v21 = vld.sshfl [vmem:[#allocation1] sm:$0xff pattern:$0x73625140] }
 0x232   : > { %4039 = vst [vmem:[#allocation57_spill] sm:$0xff] %v3472_v21  ;;  %v3476_v25 = vld.sshfl [vmem:[#allocation1 + $0x20] sm:$0xff pattern:$0x73625140] }
 0x233   : > { %4040 = vst [vmem:[#allocation58_spill] sm:$0xff] %v3476_v25 }
 0x234   : > { %1754 = vst [vmem:[#allocation1] ss:$4 sm:$0xff] %v3226_v47 }
 0x235   : > { %1757 = vst [vmem:[#allocation1 + $0x20] ss:$4 sm:$0xff] %v3229_v48  ;;  %v1372_v25 = vpop.f32.mrf.mxu2  ;;  %v4066_v48 = vld [vmem:[#allocation38_spill] sm:$0xff] }
 0x23b   : > { %v3490_v49 = vld.sshfl [vmem:[#allocation1] sm:$0xff pattern:$0x73625140] }
 0x23c   : > { %4041 = vst [vmem:[#allocation59_spill] sm:$0xff] %v3490_v49  ;;  %v3493_v45 = vld.sshfl [vmem:[#allocation1 + $0x20] sm:$0xff pattern:$0x73625140]  ;;  %v3506_v49 = vsel %vm876_vm4, %v1372_v25, -1e+30 }
 0x23d   : > { %4042 = vst [vmem:[#allocation60_spill] sm:$0xff] %v3493_v45  ;;  %v1383_v45 = vsel %vm1058_vm3, %v3506_v49, -inf }
 0x23e   : > { %1760 = vst [vmem:[#allocation1] ss:$4 sm:$0xff] %v3239_v19  ;;  %1384 = vmax.xlane.f32.xlu0 %v1383_v45  ;;  %v3531_v45 = vsel %vm875_vm2, %v1370_v27, -1e+30 }
 0x23f   : > { %1763 = vst [vmem:[#allocation1 + $0x20] ss:$4 sm:$0xff] %v3242_v52 }
 0x240   : > { %4045 = vst [vmem:[#allocation63_spill] sm:$0xff] %v3506_v49 }
 0x241   : > { %4052 = vst [vmem:[#allocation70_spill] sm:$0xff] %v3531_v45 }
 0x245   : > { %v3497_v41 = vld.sshfl [vmem:[#allocation1] sm:$0xff pattern:$0x73625140] }
 0x246   : > { %4043 = vst [vmem:[#allocation61_spill] sm:$0xff] %v3497_v41  ;;  %v3499_v15 = vld.sshfl [vmem:[#allocation1 + $0x20] sm:$0xff pattern:$0x73625140] }
 0x247   : > { %4044 = vst [vmem:[#allocation62_spill] sm:$0xff] %v3499_v15 }
 0x248   : > { %1766 = vst [vmem:[#allocation1] ss:$4 sm:$0xff] %v3252_v22 }
 0x249   : > { %1769 = vst [vmem:[#allocation1 + $0x20] ss:$4 sm:$0xff] %v3255_v54 }
 0x24f   : > { %v3510_v21 = vld.sshfl [vmem:[#allocation1] sm:$0xff pattern:$0x73625140] }
 0x250   : > { %4046 = vst [vmem:[#allocation64_spill] sm:$0xff] %v3510_v21  ;;  %v3512_v52 = vld.sshfl [vmem:[#allocation1 + $0x20] sm:$0xff pattern:$0x73625140] }
 0x251   : > { %4047 = vst [vmem:[#allocation65_spill] sm:$0xff] %v3512_v52  ;;  %v1380_v52 = vsel %vm1058_vm3, %v3531_v45, -inf }
 0x252   : > { %1772 = vst [vmem:[#allocation1] ss:$4 sm:$0xff] %v3264_v57  ;;  %1381 = vmax.xlane.f32.xlu2 %v1380_v52  ;;  %v4065_v57 = vld [vmem:[#allocation37_spill] sm:$0xff] }
 0x253   : > { %1775 = vst [vmem:[#allocation1 + $0x20] ss:$4 sm:$0xff] %v3267_v58  ;;  %v4064_v58 = vld [vmem:[#allocation36_spill] sm:$0xff] }
 0x259   : > { %v3516_v15 = vld.sshfl [vmem:[#allocation1] sm:$0xff pattern:$0x73625140] }
 0x25a   : > { %4048 = vst [vmem:[#allocation66_spill] sm:$0xff] %v3516_v15  ;;  %v3518_v41 = vld.sshfl [vmem:[#allocation1 + $0x20] sm:$0xff pattern:$0x73625140] }
 0x25b   : > { %4049 = vst [vmem:[#allocation67_spill] sm:$0xff] %v3518_v41 }
 0x25c   : > { %1778 = vst [vmem:[#allocation1] ss:$4 sm:$0xff] %v3276_v26 }
 0x25d   : > { %1781 = vst [vmem:[#allocation1 + $0x20] ss:$4 sm:$0xff] %v3279_v7 }
 0x263   : > { %v3522_v25 = vld.sshfl [vmem:[#allocation1] sm:$0xff pattern:$0x73625140] }
 0x264   : > { %4050 = vst [vmem:[#allocation68_spill] sm:$0xff] %v3522_v25  ;;  %v3524_v54 = vld.sshfl [vmem:[#allocation1 + $0x20] sm:$0xff pattern:$0x73625140] }
 0x265   : > { %4051 = vst [vmem:[#allocation69_spill] sm:$0xff] %v3524_v54 }
 0x266   : > { %1784 = vst [vmem:[#allocation1] ss:$4 sm:$0xff] %v3288_v8 }
 0x267   : > { %1787 = vst [vmem:[#allocation1 + $0x20] ss:$4 sm:$0xff] %v3291_v9 }
 0x26d   : > { %v3535_v21 = vld.sshfl [vmem:[#allocation1] sm:$0xff pattern:$0x73625140] }
 0x26e   : > { %4053 = vst [vmem:[#allocation71_spill] sm:$0xff] %v3535_v21  ;;  %v3537_v41 = vld.sshfl [vmem:[#allocation1 + $0x20] sm:$0xff pattern:$0x73625140] }
 0x26f   : > { %4054 = vst [vmem:[#allocation72_spill] sm:$0xff] %v3537_v41 }
 0x270   : > { %1790 = vst [vmem:[#allocation1] ss:$4 sm:$0xff] %v3300_v63 }
 0x271   : > { %1793 = vst [vmem:[#allocation1 + $0x20] ss:$4 sm:$0xff] %v3303_v12 }
 0x277   : > { %v3541_v25 = vld.sshfl [vmem:[#allocation1] sm:$0xff pattern:$0x73625140] }
 0x278   : > { %4055 = vst [vmem:[#allocation73_spill] sm:$0xff] %v3541_v25  ;;  %v3543_v54 = vld.sshfl [vmem:[#allocation1 + $0x20] sm:$0xff pattern:$0x73625140] }
 0x279   : > { %4056 = vst [vmem:[#allocation74_spill] sm:$0xff] %v3543_v54 }
 0x27a   : > { %1873 = vst [vmem:[#allocation1] ss:$4 sm:$0xff] %v3137_v2 }
 0x27b   : > { %1877 = vst [vmem:[#allocation1 + $0x20] ss:$4 sm:$0xff] %v3140_v3 }
 0x281   : > { %v1874_v27 = vld.sshfl [vmem:[#allocation1] sm:$0xff pattern:$0x73625140] }
 0x282   : > { %v1878_v15 = vld.sshfl [vmem:[#allocation1 + $0x20] sm:$0xff pattern:$0x73625140]  ;;  %1880 = vst [vmem:[#allocation1] ss:$4 sm:$0xff] %v3145_v4  ;;  %v1922_v2 = vunpack.c.l.b16 %v1874_v27  ;;  %v1186_v27 = vunpack.c.l.b16 %v3245_v53  ;;  %v4062_v53 = vld [vmem:[#allocation32_spill] sm:$0xff] }
 0x283   : > { %1883 = vst [vmem:[#allocation1 + $0x20] ss:$4 sm:$0xff] %v3148_v5  ;;  %v1923_v3 = vunpack.c.l.b16 %v1878_v15  ;;  %v1193_v15 = vunpack.c.l.b16 %v3283_v61  ;;  %v1194_v26 = vunpack.c.l.b16 %v4062_v53  ;;  %v4067_v53 = vld [vmem:[#allocation39_spill] sm:$0xff] }
 0x284   : > { %v1938_v63 = vrot.slane %v1922_v2, 3  ;;  %v4058_v2 = vld [vmem:[#allocation25_spill] sm:$0xff]  ;;  %v1199_v45 = vunpack.c.l.b16 %v4067_v53  ;;  %v1621_v53 = vunpack.c.l.b16 %v3437_v38  ;;  %v1628_v38 = vunpack.c.l.b16 %v3459_v40 }
 0x285   : > { %v1939_v25 = vrot.slane %v1923_v3, 2  ;;  %v4059_v3 = vld [vmem:[#allocation17_spill] sm:$0xff] }
 0x286   : > { %v1184_v61 = vunpack.c.l.b16 %v4059_v3 }
 0x287   : > { %v1940_v8 = vsel %vm998_vm10, %v1939_v25, %v1938_v63  ;;  %v1187_v63 = vunpack.c.l.b16 %v3247_v20  ;;  %v4063_v20 = vld [vmem:[#allocation33_spill] sm:$0xff] }
 0x289   : > { %v1881_v41 = vld.sshfl [vmem:[#allocation1] sm:$0xff pattern:$0x73625140]  ;;  %v1204_v19 = vrot.slane %v1187_v63, 5  ;;  %v1216_v63 = vrot.slane %v1194_v26, 6  ;;  %v1076_v40 = vpop.permute.xlu1 %1075 }
 0x28a   : > { %v1884_v21 = vld.sshfl [vmem:[#allocation1 + $0x20] sm:$0xff pattern:$0x73625140]  ;;  %1886 = vst [vmem:[#allocation1] ss:$4 sm:$0xff] %v3153_v16  ;;  %v1924_v54 = vunpack.c.l.b16 %v1881_v41 }
 0x28b   : > { %1889 = vst [vmem:[#allocation1 + $0x20] ss:$4 sm:$0xff] %v3156_v17  ;;  %v1925_v17 = vunpack.c.l.b16 %v1884_v21 }
 0x28c   : > { %v1941_v4 = vrot.slane %v1924_v54, 1  ;;  %v4061_v54 = vld [vmem:[#allocation29_spill] sm:$0xff] }
 0x28d   : > { %v1192_v7 = vunpack.c.l.b16 %v4061_v54 }
 0x291   : > { %v1887_v52 = vld.sshfl [vmem:[#allocation1] sm:$0xff pattern:$0x73625140] }
 0x292   : > { %v1890_v12 = vld.sshfl [vmem:[#allocation1 + $0x20] sm:$0xff pattern:$0x73625140]  ;;  %1892 = vst [vmem:[#allocation1] ss:$4 sm:$0xff] %v3161_v28  ;;  %v1926_v5 = vunpack.c.l.b16 %v1887_v52  ;;  %v1942_v28 = vsel %vm1001_vm11, %v1941_v4, %v1940_v8  ;;  %v1188_v52 = vunpack.c.l.b16 %v3257_v24  ;;  %v1196_v24 = vunpack.c.l.b16 %v4064_v58 }
 0x293   : > { %1895 = vst [vmem:[#allocation1 + $0x20] ss:$4 sm:$0xff] %v3164_v29  ;;  %v1185_v29 = vunpack.c.l.b16 %v3234_v51  ;;  %v1927_v41 = vunpack.c.l.b16 %v1890_v12  ;;  %v1943_v51 = vsel %vm1004_vm12, %v1925_v17, %v1942_v28  ;;  %v4060_v12 = vld [vmem:[#allocation26_spill] sm:$0xff]  ;;  %v1198_v17 = vunpack.c.l.b16 %v4066_v48 }
 0x294   : > { %v1944_v25 = vrot.slane %v1926_v5, 7  ;;  %v1191_v4 = vunpack.c.l.b16 %v4060_v12  ;;  %v1195_v5 = vunpack.c.l.b16 %v4063_v20  ;;  %v1206_v28 = vrot.slane %v1188_v52, 4 }
 0x295   : > { %v1200_v22 = vrot.slane %v1185_v29, 7  ;;  %v3585_v49 = vrot.slane %v1927_v41, 6  ;;  %v1226_v41 = vrot.slane %v1199_v45, 1 }
 0x296   : > { %v1212_v58 = vrot.slane %v1191_v4, 1  ;;  %v3592_v26 = vsel %vm1007_vm13, %v1944_v25, %v1943_v51  ;;  %v1618_v25 = vunpack.c.l.b16 %v3429_v31  ;;  %v1623_v31 = vunpack.c.l.b16 %v3443_v30 }
 0x297   : > { %v1201_v20 = vsel %vm998_vm10, %v1200_v22, %v1184_v61 }
 0x299   : > { %v3553_v9 = vld.sshfl [vmem:[#allocation1] sm:$0xff pattern:$0x73625140] }
 0x29a   : > { %v3556_v16 = vld.sshfl [vmem:[#allocation1 + $0x20] sm:$0xff pattern:$0x73625140]  ;;  %1898 = vst [vmem:[#allocation1] ss:$4 sm:$0xff] %v3169_v32  ;;  %v4057_v32 = vld [vmem:[#allocation22_spill] sm:$0xff] }
 0x29b   : > { %1901 = vst [vmem:[#allocation1 + $0x20] ss:$4 sm:$0xff] %v3172_v33  ;;  %v1189_v21 = vunpack.c.l.b16 %v4057_v32  ;;  %v1190_v33 = vunpack.c.l.b16 %v4058_v2  ;;  %v1197_v32 = vunpack.c.l.b16 %v4065_v57  ;;  %v1202_v2 = vrot.slane %v1186_v27, 6 }
 0x29c   : > { %v1214_v27 = vrot.slane %v1193_v15, 7 }
 0x29d   : > { %v1208_v3 = vrot.slane %v1189_v21, 3  ;;  %v1210_v47 = vrot.slane %v1190_v33, 2  ;;  %v1203_v29 = vsel %vm1001_vm11, %v1202_v2, %v1201_v20  ;;  %v1218_v21 = vrot.slane %v1195_v5, 5 }
 0x29e   : > { %v1205_v52 = vsel %vm1004_vm12, %v1204_v19, %v1203_v29  ;;  %v1220_v33 = vrot.slane %v1196_v24, 4  ;;  %v1215_v22 = vsel %vm998_vm10, %v1214_v27, %v1192_v7  ;;  %v1222_v4 = vrot.slane %v1197_v32, 3 }
 0x29f   : > { %v1224_v2 = vrot.slane %v1198_v17, 2  ;;  %v1617_v17 = vunpack.c.l.b16 %v3425_v10  ;;  %v1622_v10 = vunpack.c.l.b16 %v3441_v11  ;;  %v1626_v29 = vunpack.c.l.b16 %v3453_v44 }
 0x2a0   : > { %v1630_v11 = vunpack.c.l.b16 %v3465_v60  ;;  %v1083_v60 = vsub.f32 %v3365_v34, %v1076_v40 }
 0x2a1   : > { %v1899_v8 = vld.sshfl [vmem:[#allocation1] sm:$0xff pattern:$0x73625140] }
 0x2a2   : > { %v1902_v12 = vld.sshfl [vmem:[#allocation1 + $0x20] sm:$0xff pattern:$0x73625140]  ;;  %1904 = vst [vmem:[#allocation1] ss:$4 sm:$0xff] %v3179_v36  ;;  %v1930_v54 = vunpack.c.l.b16 %v1899_v8  ;;  %v1207_v8 = vsel %vm1007_vm13, %v1206_v28, %v1205_v52  ;;  %v1616_v28 = vunpack.c.l.b16 %v3423_v50 }
 0x2a3   : > { %1907 = vst [vmem:[#allocation1 + $0x20] ss:$4 sm:$0xff] %v3182_v37  ;;  %v1931_v57 = vunpack.c.l.b16 %v1902_v12  ;;  %v1209_v61 = vsel %vm1010_vm14, %v1208_v3, %v1207_v8  ;;  %v1217_v37 = vsel %vm1001_vm11, %v1216_v63, %v1215_v22  ;;  %v1633_v63 = vrot.slane %v1617_v17, 1 }
 0x2a4   : > { %v1952_v48 = vrot.slane %v1930_v54, 3  ;;  %v1211_v19 = vsel %vm1013_vm15, %v1210_v47, %v1209_v61  ;;  %v1219_v15 = vsel %vm1004_vm12, %v1218_v21, %v1217_v37  ;;  %v1619_v47 = vunpack.c.l.b16 %v3431_v59 }
 0x2a5   : > { %v1953_v36 = vrot.slane %v1931_v57, 2  ;;  %v1213_v24 = vsel %vm1016_vm0, %v1212_v58, %v1211_v19  ;;  %v1221_v7 = vsel %vm1007_vm13, %v1220_v33, %v1219_v15  ;;  %v1620_v54 = vunpack.c.l.b16 %v3435_v56  ;;  %v4068_v19 = vld [vmem:[#allocation12_spill] sm:$0xff] }
 0x2a6   : > { %v1223_v32 = vsel %vm1010_vm14, %v1222_v4, %v1221_v7  ;;  %v1625_v57 = vunpack.c.l.b16 %v3449_v1  ;;  %v1627_v56 = vunpack.c.l.b16 %v3455_v23  ;;  %v1632_v30 = vrot.slane %v1616_v28, 2 }
 0x2a7   : > { %v1954_v5 = vsel %vm998_vm10, %v1953_v36, %v1952_v48  ;;  %v1225_v12 = vsel %vm1013_vm15, %v1224_v2, %v1223_v32  ;;  %v1631_v48 = vunpack.c.l.b16 %v3467_v43  ;;  %v1638_v52 = vrot.slane %v1620_v54, 6 }
 0x2a8   : > { %v1227_v20 = vsel %vm1016_vm0, %v1226_v41, %v1225_v12  ;;  %v1640_v1 = vrot.slane %v1621_v53, 5  ;;  %v1634_v44 = vsel %vm998_vm10, %v1633_v63, %v1632_v30  ;;  %v1642_v21 = vrot.slane %v1622_v10, 4  ;;  %v4073_v30 = vld [vmem:[#allocation14_spill] sm:$0xff] }
 0x2a9   : > { %v1905_v3 = vld.sshfl [vmem:[#allocation1] sm:$0xff pattern:$0x73625140]  ;;  %v1228_v58 = vpack.c.b16 %v1227_v20, %v1213_v24  ;;  %v1644_v23 = vrot.slane %v1623_v31, 3  ;;  %v1647_v8 = vrot.slane %v1625_v57, 1  ;;  %v1650_v22 = vrot.slane %v1627_v56, 7  ;;  %v1081_v31 = vpop.permute.xlu1 %1080 }
 0x2aa   : > { %v1908_v51 = vld.sshfl [vmem:[#allocation1 + $0x20] sm:$0xff pattern:$0x73625140]  ;;  %1910 = vst [vmem:[#allocation1] ss:$4 sm:$0xff] %v3187_v42  ;;  %v1932_v45 = vunpack.c.l.b16 %v1905_v3  ;;  %v1624_v42 = vunpack.c.l.b16 %v3447_v39  ;;  %v1636_v39 = vrot.slane %v1619_v47, 7  ;;  %v4069_v47 = vunpack.c.l.b16 %v3553_v9 }
 0x2ab   : > { %1913 = vst [vmem:[#allocation1 + $0x20] ss:$4 sm:$0xff] %v3190_v46  ;;  %v1933_v50 = vunpack.c.l.b16 %v1908_v51  ;;  %v1629_v46 = vunpack.c.l.b16 %v3461_v18  ;;  %1240 = vmatpush.bf16.msra.mxu1 %v1228_v58  ;;  %v1635_v18 = vsel %vm1001_vm11, %v1618_v25, %v1634_v44  ;;  %v1652_v61 = vrot.slane %v1628_v38, 6  ;;  %v4071_v57 = vld [vmem:[#allocation44_spill] sm:$0xff]  ;;  %v4072_v38 = vld [vmem:[#allocation13_spill] sm:$0xff] }
 0x2ac   : > { %v1955_v59 = vrot.slane %v1932_v45, 1  ;;  %v1646_v33 = vrot.slane %v1624_v42, 2  ;;  %v1637_v4 = vsel %vm1004_vm12, %v1636_v39, %v1635_v18  ;;  %v1656_v24 = vrot.slane %v1630_v11, 4 }
 0x2ad   : > { %v1654_v2 = vrot.slane %v1629_v46, 5  ;;  %v1639_v41 = vsel %vm1007_vm13, %v1638_v52, %v1637_v4  ;;  %v1085_v7 = vmul.f32 1.442695, %v1083_v60  ;;  %v1658_v25 = vrot.slane %v1631_v48, 3  ;;  %v2511_v4 = vld [vmem:[#allocation2 + $0x10] sm:$0xff] }
 0x2ae   : > { %v1956_v27 = vsel %vm1001_vm11, %v1955_v59, %v1954_v5  ;;  %v1648_v5 = vsel %vm998_vm10, %v1647_v8, %v1646_v33  ;;  %v1641_v3 = vsel %vm1010_vm14, %v1640_v1, %v1639_v41  ;;  %v1948_v51 = vrot.slane %v4069_v47, 5 }
 0x2af   : > { %v1649_v34 = vsel %vm1001_vm11, %v1626_v29, %v1648_v5  ;;  %v1643_v32 = vsel %vm1013_vm15, %v1642_v21, %v1641_v3  ;;  %2599 = vpow2.f32 %v1085_v7  ;;  %v1947_v12 = vsel %vm1010_vm14, %v3585_v49, %v3592_v26 }
 0x2b0   : > { %v1651_v17 = vsel %vm1004_vm12, %v1650_v22, %v1649_v34  ;;  %v1645_v53 = vsel %vm1016_vm0, %v1644_v23, %v1643_v32  ;;  %v4070_v9 = vunpack.c.l.b16 %v3556_v16  ;;  %v1084_v29 = vsub.f32 %v4071_v57, %v1081_v31  ;;  %v2512_v22 = vld [vmem:[#allocation2 + $0x18] sm:$0xff]  ;;  %v4079_v31 = vld [vmem:[#allocation49_spill] sm:$0xff] }
 0x2b1   : > { %v1911_v36 = vld.sshfl [vmem:[#allocation1] sm:$0xff pattern:$0x73625140]  ;;  %v1653_v45 = vsel %vm1007_vm13, %v1652_v61, %v1651_v17  ;;  %v1949_v26 = vsel %vm1013_vm15, %v1948_v51, %v1947_v12  ;;  %v1385_v60 = vpop.xlane.xlu0 %1384  ;;  %v1090_v17 = vld [vmem:[#allocation4 + $0x8] sm:$0xff]  ;;  %v4075_v12 = vld [vmem:[#allocation40_spill] sm:$0xff] }
 0x2b2   : > { %v1914_v37 = vld.sshfl [vmem:[#allocation1 + $0x20] sm:$0xff pattern:$0x73625140]  ;;  %1916 = vst [vmem:[#allocation1] ss:$4 sm:$0xff] %v3197_v55  ;;  %v1934_v43 = vunpack.c.l.b16 %v1911_v36  ;;  %v1957_v55 = vsel %vm1004_vm12, %v1933_v50, %v1956_v27  ;;  %v1655_v50 = vsel %vm1010_vm14, %v1654_v2, %v1653_v45  ;;  %v1950_v58 = vrot.slane %v4070_v9, 4  ;;  %v1109_v2 = vpop.permute.xlu2 %1108 }
 0x2b3   : > { %1919 = vst [vmem:[#allocation1 + $0x20] ss:$4 sm:$0xff] %v4068_v19  ;;  %v1935_v15 = vunpack.c.l.b16 %v1914_v37  ;;  %v1657_v10 = vsel %vm1013_vm15, %v1656_v24, %v1655_v50  ;;  %v1087_v48 = vmul.f32 1.442695, %v1084_v29  ;;  %v3660_v61 = vld [vmem:[#allocation3 + $0x18] sm:$0xff]  ;;  %v3672_v19 = vld [vmem:[#allocation3 + $0x10] sm:$0xff]  ;;  %v4074_v24 = vsub.f32 %v3474_v14, %v3481_v6 }
 0x2b4   : > { %v1958_v28 = vrot.slane %v1934_v43, 7  ;;  %v1659_v42 = vsel %vm1016_vm0, %v1658_v25, %v1657_v10  ;;  %v1951_v1 = vsel %vm1016_vm0, %v1950_v58, %v1949_v26  ;;  %v3664_v37 = vmax.f32 %v3660_v61, %v1385_v60  ;;  %v1104_v25 = vld [vmem:[#allocation5] sm:$0xff]  ;;  %v4076_v14 = vld [vmem:[#allocation42_spill] sm:$0xff]  ;;  %v4080_v9 = vld [vmem:[#allocation51_spill] sm:$0xff] }
 0x2b5   : > { %v1960_v54 = vrot.slane %v1935_v15, 6  ;;  %v1660_v46 = vpack.c.b16 %v1659_v42, %v1645_v53  ;;  %v2600_v63 = vpop.eup %2599  ;;  %2601 = vpow2.f32 %v1087_v48  ;;  %v1071_v7 = vmul.f32 1.442695, %v4074_v24  ;;  %v4081_v42 = vld [vmem:[#allocation45_spill] sm:$0xff]  ;;  %v4082_v29 = vld [vmem:[#allocation50_spill] sm:$0xff] }
 0x2b6   : > { %v1959_v20 = vsel %vm1007_vm13, %v1958_v28, %v1957_v55  ;;  %v1093_v52 = vsel %vm1058_vm3, %v2600_v63, 0.0  ;;  %v1389_v43 = vsub.f32 %v3660_v61, %v3664_v37  ;;  %1558 = vst.msk [vmem:[#allocation3 + $0x18] sm:$0xff] %vm1101_vm5, %v3664_v37  ;;  %v1089_v28 = vld [vmem:[#allocation4] sm:$0xff]  ;;  %v1116_v6 = vmul.f32 %v1109_v2, %v1104_v25 }
 0x2b7   : > { %v1961_v11 = vsel %vm1010_vm14, %v1960_v54, %v1959_v20  ;;  %v1665_v39 = vsel %vm1033_vm1, %v1660_v46, 0  ;;  %1094 = vadd.xlane.f32.xlu2 %v1093_v52  ;;  %2603 = vpow2.f32 %v1071_v7  ;;  %v1091_v3 = vmul.f32 %v3488_v0, %v1089_v28  ;;  %v4077_v0 = vld [vmem:[#allocation41_spill] sm:$0xff]  ;;  %v4078_v20 = vld [vmem:[#allocation43_spill] sm:$0xff]  ;;  %v4084_v46 = vld [vmem:[#allocation46_spill] sm:$0xff] }
 0x2b8   : > { %1674 = vmatpush.bf16.xpose.msrb.mxu1 %v1665_v39  ;;  %v1490_v54 = vunpack.c.l.b16 %v4075_v12  ;;  %v1492_v53 = vunpack.c.l.b16 %v4076_v14  ;;  %v1491_v50 = vunpack.c.l.b16 %v4077_v0  ;;  %v1493_v10 = vunpack.c.l.b16 %v4078_v20  ;;  %v4087_v39 = vld [vmem:[#allocation47_spill] sm:$0xff] }
 0x2b9   : > { %v1917_v59 = vld.sshfl [vmem:[#allocation1] sm:$0xff pattern:$0x73625140]  ;;  %v1500_v58 = vunpack.c.l.b16 %v4080_v9  ;;  %v1494_v57 = vunpack.c.l.b16 %v4081_v42  ;;  %v1496_v52 = vunpack.c.l.b16 %v4087_v39 }
 0x2ba   : > { %v1920_v56 = vld.sshfl [vmem:[#allocation1 + $0x20] sm:$0xff pattern:$0x73625140]  ;;  %v1936_v49 = vunpack.c.l.b16 %v1917_v59  ;;  %2053 = vst [vmem:[#allocation1] ss:$4 sm:$0xff] %v4072_v38  ;;  %v1498_v59 = vunpack.c.l.b16 %v4079_v31  ;;  %v1506_v38 = vrot.slane %v1490_v54, 1 }
 0x2bb   : > { %v1937_v27 = vunpack.c.l.b16 %v1920_v56  ;;  %2057 = vst [vmem:[#allocation1 + $0x20] ss:$4 sm:$0xff] %v4073_v30  ;;  %v2602_v36 = vpop.eup %2601  ;;  %v1499_v56 = vunpack.c.l.b16 %v4082_v29  ;;  %v1516_v2 = vrot.slane %v1496_v52, 3  ;;  %v1522_v28 = vrot.slane %v1500_v58, 7 }
 0x2bc   : > { %v1962_v16 = vrot.slane %v1936_v49, 5  ;;  %v1096_v18 = vsel %vm1058_vm3, %v2602_v36, 0.0  ;;  %v1118_v8 = vpack.c.bf16 %v2602_v36, %v2600_v63  ;;  %v4083_v49 = vld [vmem:[#allocation52_spill] sm:$0xff]  ;;  %v4086_v63 = vld [vmem:[#allocation54_spill] sm:$0xff] }
 0x2bd   : > { %v1964_v44 = vrot.slane %v1937_v27, 4  ;;  %1097 = vadd.xlane.f32.xlu1 %v1096_v18  ;;  %v3687_v32 = vpop.eup %2603  ;;  %v1501_v26 = vunpack.c.l.b16 %v4083_v49  ;;  %v1495_v27 = vunpack.c.l.b16 %v4084_v46  ;;  %v1503_v48 = vunpack.c.l.b16 %v4086_v63  ;;  %v4090_v36 = vld [vmem:[#allocation56_spill] sm:$0xff] }
 0x2be   : > { %v1963_v21 = vsel %vm1013_vm15, %v1962_v16, %v1961_v11  ;;  %2487 = vmatmul.msk.bf16.vlgmr.msra.gmra.mxu1 %vm1058_vm3, %v1118_v8  ;;  %v1092_v47 = vmul.f32 %v3687_v32, %v1090_v17  ;;  %v4085_v11 = vld [vmem:[#allocation53_spill] sm:$0xff]  ;;  %v1508_v16 = vrot.slane %v1492_v53, 7  ;;  %v1505_v18 = vunpack.c.l.b16 %v4090_v36 }
 0x2bf   : > { %v1965_v23 = vsel %vm1016_vm0, %v1964_v44, %v1963_v21  ;;  %v1502_v30 = vunpack.c.l.b16 %v4085_v11  ;;  %v1507_v21 = vsel %vm998_vm10, %v1491_v50, %v1506_v38  ;;  %v1528_v25 = vrot.slane %v1503_v48, 4  ;;  %v4092_v48 = vld [vmem:[#allocation70_spill] sm:$0xff] }
 0x2c0   : > { %v1966_v33 = vpack.c.b16 %v1965_v23, %v1951_v1  ;;  %v4088_v1 = vld [vmem:[#allocation55_spill] sm:$0xff]  ;;  %v1510_v23 = vrot.slane %v1493_v10, 6  ;;  %v1509_v8 = vsel %vm1001_vm11, %v1508_v16, %v1507_v21  ;;  %v1532_v53 = vrot.slane %v1505_v18, 2 }
 0x2c1   : > { %v1504_v44 = vunpack.c.l.b16 %v4088_v1  ;;  %v1526_v17 = vrot.slane %v1502_v30, 5  ;;  %v3767_v18 = vld [vmem:[#allocation3 + $0x38] sm:$0xff] }
 0x2c2   : > { %v1971_v40 = vsel %vm1033_vm1, %v1966_v33, 0  ;;  %v4089_v33 = vld [vmem:[#allocation48_spill] sm:$0xff]  ;;  %v1511_v60 = vsel %vm1004_vm12, %v1510_v23, %v1509_v8 }
 0x2c3   : > { %1980 = vmatpush.bf16.xpose.msrb.mxu0 %v1971_v40  ;;  %v1497_v40 = vunpack.c.l.b16 %v4089_v33  ;;  %v1530_v12 = vrot.slane %v1504_v44, 3 }
 0x2c5   : > { %v1382_v15 = vpop.xlane.xlu2 %1381  ;;  %v1518_v7 = vrot.slane %v1497_v40, 2 }
 0x2c6   : > { %v3675_v41 = vmax.f32 %v3672_v19, %v1382_v15  ;;  %v1520_v15 = vrot.slane %v1498_v59, 1 }
 0x2c8   : > { %v1388_v5 = vsub.f32 %v3672_v19, %v3675_v41  ;;  %1557 = vst.msk [vmem:[#allocation3 + $0x10] sm:$0xff] %vm1101_vm5, %v3675_v41  ;;  %1396 = vperm.xlu0 %2596, %v3675_v41   ;;  %v1392_v41 = vmul.f32 1.442695, %v1389_v43 }
 0x2ca   : > { %2504 = vmatmul.msk.bf16.vlgmr.msrb.gmra.mxu0 %vm1033_vm1, %v2512_v22  ;;  %v1512_v22 = vrot.slane %v1494_v57, 5 }
 0x2cc   : > { %v1513_v24 = vsel %vm1007_vm13, %v1512_v22, %v1511_v60  ;;  %v1684_v60 = vld [vmem:[#allocation3 + $0x20] sm:$0xff] }
 0x2ce   : > { %2498 = vmatmul.msk.bf16.vlgmr.msrb.gmra.mxu1 %vm1033_vm1, %v2511_v4  ;;  %v1514_v4 = vrot.slane %v1495_v27, 4  ;;  %v4091_v27 = vld [vmem:[#allocation63_spill] sm:$0xff] }
 0x2cf   : > { %1401 = vperm.xlu2 %2595, %v3664_v37   ;;  %v4096_v37 = vld [vmem:[#allocation19_spill] sm:$0xff] }
 0x32a   : > { %v1095_v34 = vpop.xlane.xlu2 %1094 }
 0x32b   : > { %v1099_v55 = vadd.f32 %v1095_v34, %v1091_v3  ;;  %v1524_v3 = vrot.slane %v1501_v26, 6  ;;  %v1515_v34 = vsel %vm1010_vm14, %v1514_v4, %v1513_v24  ;;  %v1685_v24 = vld [vmem:[#allocation3 + $0x28] sm:$0xff] }
 0x32d   : > { %1102 = vst.msk [vmem:[#allocation4] sm:$0xff] %vm1101_vm5, %v1099_v55  ;;  %v1521_v55 = vsel %vm998_vm10, %v1499_v56, %v1520_v15  ;;  %v1390_v15 = vmul.f32 1.442695, %v1388_v5  ;;  %v3789_v5 = vld.sshfl [vmem:[#allocation1] sm:$0xff pattern:$0x73625140] }
 0x330   : > { %v1098_v51 = vpop.xlane.xlu1 %1097 }
 0x331   : > { %v1100_v45 = vadd.f32 %v1098_v51, %v1092_v47  ;;  %v1517_v51 = vsel %vm1013_vm15, %v1516_v2, %v1515_v34 }
 0x332   : > { %v1519_v20 = vsel %vm1016_vm0, %v1518_v7, %v1517_v51  ;;  %v1402_v49 = vpop.permute.xlu2 %1401 }
 0x333   : > { %1103 = vst.msk [vmem:[#allocation4 + $0x8] sm:$0xff] %vm1101_vm5, %v1100_v45  ;;  %v1523_v45 = vsel %vm1001_vm11, %v1522_v28, %v1521_v55  ;;  %v1405_v11 = vsub.f32 %v4091_v27, %v1402_v49  ;;  %v4099_v27 = vld [vmem:[#allocation23_spill] sm:$0xff] }
 0x334   : > { %v1525_v14 = vsel %vm1004_vm12, %v1524_v3, %v1523_v45  ;;  %v3791_v45 = vld.sshfl [vmem:[#allocation1 + $0x20] sm:$0xff pattern:$0x73625140] }
 0x335   : > { %v1527_v0 = vsel %vm1007_vm13, %v1526_v17, %v1525_v14  ;;  %v1408_v30 = vmul.f32 1.442695, %v1405_v11  ;;  %v1411_v17 = vld [vmem:[#allocation4 + $0x10] sm:$0xff]  ;;  %v4100_v11 = vld [vmem:[#allocation24_spill] sm:$0xff] }
 0x336   : > { %v1529_v10 = vsel %vm1010_vm14, %v1528_v25, %v1527_v0 }
 0x337   : > { %v1531_v59 = vsel %vm1013_vm15, %v1530_v12, %v1529_v10  ;;  %2605 = vpow2.f32 %v1408_v30  ;;  %v4093_v12 = vld [vmem:[#allocation15_spill] sm:$0xff] }
 0x338   : > { %v1533_v9 = vsel %vm1016_vm0, %v1532_v53, %v1531_v59  ;;  %2060 = vst [vmem:[#allocation1] ss:$4 sm:$0xff] %v4093_v12  ;;  %v4114_v12 = vld [vmem:[#allocation71_spill] sm:$0xff] }
 0x339   : > { %v1534_v58 = vpack.c.b16 %v1533_v9, %v1519_v20  ;;  %v1105_v20 = vld [vmem:[#allocation5 + $0x8] sm:$0xff] }
 0x33a   : > { %v1397_v63 = vpop.permute.xlu0 %1396 }
 0x33b   : > { %v1242_v47 = vpop.f32.mrf.mxu1  ;;  %1546 = vmatpush.bf16.msra.mxu3 %v1534_v58  ;;  %v1404_v16 = vsub.f32 %v4092_v48, %v1397_v63  ;;  %v4097_v58 = vld [vmem:[#allocation20_spill] sm:$0xff] }
 0x33c   : > { %v1247_v54 = vadd.f32 %v1242_v47, %v1116_v6 }
 0x33d   : > { %v1406_v1 = vmul.f32 1.442695, %v1404_v16  ;;  %v2606_v44 = vpop.eup %2605  ;;  %v4102_v16 = vld [vmem:[#allocation28_spill] sm:$0xff] }
 0x33e   : > { %1249 = vst.msk [vmem:[#allocation5] sm:$0xff] %vm1033_vm1, %v1247_v54  ;;  %v4094_v54 = vld [vmem:[#allocation16_spill] sm:$0xff]  ;;  %v1418_v14 = vsel %vm1058_vm3, %v2606_v44, 0.0 }
 0x33f   : > { %2607 = vpow2.f32 %v1406_v1  ;;  %2063 = vst [vmem:[#allocation1 + $0x20] ss:$4 sm:$0xff] %v4094_v54  ;;  %v3796_v53 = vld.sshfl [vmem:[#allocation1] sm:$0xff pattern:$0x73625140]  ;;  %v1808_v54 = vunpack.c.l.b16 %v4114_v12 }
 0x340   : > { %2609 = vpow2.f32 %v1390_v15  ;;  %v4109_v15 = vld [vmem:[#allocation60_spill] sm:$0xff] }
 0x343   : > { %v3729_v42 = vpop.f32.mrf.mxu1 }
 0x345   : > { %v2608_v21 = vpop.eup %2607 }
 0x346   : > { %v1415_v23 = vsel %vm1058_vm3, %v2608_v21, 0.0  ;;  %v1440_v33 = vpack.c.bf16 %v2606_v44, %v2608_v21  ;;  %v2610_v34 = vpop.eup %2609  ;;  %v3798_v0 = vld.sshfl [vmem:[#allocation1 + $0x20] sm:$0xff pattern:$0x73625140]  ;;  %v4105_v21 = vld [vmem:[#allocation57_spill] sm:$0xff] }
 0x347   : > { %v1982_v50 = vpop.f32.mrf.mxu0  ;;  %1416 = vadd.xlane.f32.xlu1 %v1415_v23  ;;  %v1413_v25 = vmul.f32 %v2610_v34, %v1411_v17  ;;  %2069 = vst [vmem:[#allocation1 + $0x20] ss:$4 sm:$0xff] %v4096_v37  ;;  %v4104_v44 = vld [vmem:[#allocation31_spill] sm:$0xff]  ;;  %v1796_v23 = vunpack.c.l.b16 %v4105_v21  ;;  %v4116_v37 = vld [vmem:[#allocation72_spill] sm:$0xff]  ;;  %v4121_v21 = vld [vmem:[#allocation74_spill] sm:$0xff] }
 0x348   : > { %v3723_v31 = vsel %vm875_vm2, %v1982_v50, -1e+30  ;;  %2493 = vmatmul.msk.bf16.vlgmr.msra.gmra.mxu3 %vm1058_vm3, %v1440_v33  ;;  %v4095_v50 = vld [vmem:[#allocation18_spill] sm:$0xff] }
 0x349   : > { %v1992_v6 = vsel %vm1058_vm3, %v3723_v31, -inf  ;;  %2066 = vst [vmem:[#allocation1] ss:$4 sm:$0xff] %v4095_v50  ;;  %v4106_v33 = vld [vmem:[#allocation58_spill] sm:$0xff] }
 0x34a   : > { %1993 = vmax.xlane.f32.xlu2 %v1992_v6 }
 0x34b   : > { %v1676_v26 = vpop.f32.mrf.mxu1 }
 0x34c   : > { %v3741_v38 = vsel %vm875_vm2, %v1676_v26, -1e+30 }
 0x34d   : > { %v1686_v46 = vsel %vm1058_vm3, %v3741_v38, -inf }
 0x34e   : > { %v3807_v9 = vld.sshfl [vmem:[#allocation1 + $0x20] sm:$0xff pattern:$0x73625140] }
 0x34f   : > { %v1984_v57 = vpop.f32.mrf.mxu0 }
 0x350   : > { %v3734_v29 = vsel %vm876_vm4, %v1984_v57, -1e+30  ;;  %v3805_v59 = vld.sshfl [vmem:[#allocation1] sm:$0xff pattern:$0x73625140] }
 0x351   : > { %v1995_v56 = vsel %vm1058_vm3, %v3734_v29, -inf  ;;  %2072 = vst [vmem:[#allocation1] ss:$4 sm:$0xff] %v4097_v58  ;;  %v4117_v58 = vld [vmem:[#allocation64_spill] sm:$0xff] }
 0x352   : > { %1996 = vmax.xlane.f32.xlu0 %v1995_v56  ;;  %1687 = vmax.xlane.f32.xlu2 %v1686_v46  ;;  %v4098_v56 = vld [vmem:[#allocation21_spill] sm:$0xff] }
 0x353   : > { %v1678_v39 = vpop.f32.mrf.mxu1  ;;  %2075 = vst [vmem:[#allocation1 + $0x20] ss:$4 sm:$0xff] %v4098_v56  ;;  %v4118_v56 = vld [vmem:[#allocation73_spill] sm:$0xff] }
 0x354   : > { %v3750_v52 = vsel %vm876_vm4, %v1678_v39, -1e+30 }
 0x355   : > { %v1689_v62 = vsel %vm1058_vm3, %v3750_v52, -inf }
 0x358   : > { %v3813_v26 = vld.sshfl [vmem:[#allocation1] sm:$0xff pattern:$0x73625140] }
 0x359   : > { %2078 = vst [vmem:[#allocation1] ss:$4 sm:$0xff] %v4099_v27 }
 0x35a   : > { %1690 = vmax.xlane.f32.xlu0 %v1689_v62  ;;  %v3815_v46 = vld.sshfl [vmem:[#allocation1 + $0x20] sm:$0xff pattern:$0x73625140]  ;;  %v4103_v62 = vld [vmem:[#allocation30_spill] sm:$0xff] }
 0x35b   : > { %2081 = vst [vmem:[#allocation1 + $0x20] ss:$4 sm:$0xff] %v4100_v11 }
 0x360   : > { %1113 = vperm.xlu1 %2594, %v3687_v32   ;;  %v3822_v63 = vld.sshfl [vmem:[#allocation1] sm:$0xff pattern:$0x73625140] }
 0x362   : > { %v3824_v48 = vld.sshfl [vmem:[#allocation1 + $0x20] sm:$0xff pattern:$0x73625140] }
 0x363   : > { %2087 = vst [vmem:[#allocation1 + $0x20] ss:$4 sm:$0xff] %v4102_v16  ;;  %v4119_v16 = vld [vmem:[#allocation34_spill] sm:$0xff] }
 0x36a   : > { %v3830_v1 = vld.sshfl [vmem:[#allocation1 + $0x20] sm:$0xff pattern:$0x73625140] }
 0x36b   : > { %2093 = vst [vmem:[#allocation1 + $0x20] ss:$4 sm:$0xff] %v4104_v44 }
 0x3ba   : > { %v1417_v47 = vpop.xlane.xlu1 %1416 }
 0x3bb   : > { %v1421_v51 = vadd.f32 %v1417_v47, %v1413_v25  ;;  %v4112_v25 = vld [vmem:[#allocation61_spill] sm:$0xff] }
 0x3bc   : > { %v1800_v47 = vunpack.c.l.b16 %v4112_v25 }
 0x3bd   : > { %v1994_v35 = vpop.xlane.xlu2 %1993  ;;  %1423 = vst.msk [vmem:[#allocation4 + $0x10] sm:$0xff] %vm1101_vm5, %v1421_v51  ;;  %v4113_v51 = vld [vmem:[#allocation68_spill] sm:$0xff] }
 0x3be   : > { %v3760_v40 = vmax.f32 %v3757_v13, %v1994_v35  ;;  %v1797_v35 = vunpack.c.l.b16 %v4106_v33  ;;  %v1818_v11 = vrot.slane %v1800_v47, 6 }
 0x3c0   : > { %v2000_v36 = vsub.f32 %v3757_v13, %v3760_v40  ;;  %2169 = vst.msk [vmem:[#allocation3 + $0x30] sm:$0xff] %vm1101_vm5, %v3760_v40  ;;  %2008 = vperm.xlu0 %2596, %v3760_v40  }
 0x3c5   : > { %v1997_v8 = vpop.xlane.xlu0 %1996  ;;  %v1688_v4 = vpop.xlane.xlu2 %1687 }
 0x3c6   : > { %v3770_v22 = vmax.f32 %v3767_v18, %v1997_v8  ;;  %v1692_v2 = vmax.f32 %v1684_v60, %v1688_v4  ;;  %v4107_v8 = vld [vmem:[#allocation66_spill] sm:$0xff]  ;;  %v4108_v4 = vld [vmem:[#allocation67_spill] sm:$0xff] }
 0x3c8   : > { %v2001_v32 = vsub.f32 %v3767_v18, %v3770_v22  ;;  %2170 = vst.msk [vmem:[#allocation3 + $0x38] sm:$0xff] %vm1101_vm5, %v3770_v22  ;;  %1702 = vperm.xlu2 %2595, %v1692_v2   ;;  %v1694_v43 = vsub.f32 %v1684_v60, %v1692_v2  ;;  %v1804_v60 = vunpack.c.l.b16 %v4107_v8  ;;  %v4122_v8 = vld [vmem:[#allocation35_spill] sm:$0xff] }
 0x3c9   : > { %1863 = vst.msk [vmem:[#allocation3 + $0x20] sm:$0xff] %vm1101_vm5, %v1692_v2  ;;  %v1805_v2 = vunpack.c.l.b16 %v4108_v4 }
 0x3ca   : > { %v1696_v10 = vmul.f32 1.442695, %v1694_v43  ;;  %v1809_v43 = vunpack.c.l.b16 %v4116_v37 }
 0x3cd   : > { %v1691_v7 = vpop.xlane.xlu0 %1690 }
 0x3ce   : > { %v1693_v28 = vmax.f32 %v1685_v24, %v1691_v7  ;;  %v4110_v7 = vld [vmem:[#allocation69_spill] sm:$0xff] }
 0x3d0   : > { %v1695_v3 = vsub.f32 %v1685_v24, %v1693_v28  ;;  %1864 = vst.msk [vmem:[#allocation3 + $0x28] sm:$0xff] %vm1101_vm5, %v1693_v28  ;;  %1707 = vperm.xlu2 %2595, %v1693_v28   ;;  %v1799_v24 = vunpack.c.l.b16 %v4109_v15  ;;  %v1807_v28 = vunpack.c.l.b16 %v4110_v7  ;;  %v1827_v7 = vrot.slane %v1805_v2, 1 }
 0x3d1   : > { %v2103_v2 = vunpack.c.l.b16 %v3791_v45 }
 0x3d2   : > { %v1698_v55 = vmul.f32 1.442695, %v1695_v3  ;;  %v1114_v6 = vpop.permute.xlu1 %1113  ;;  %v1812_v3 = vrot.slane %v1796_v23, 2  ;;  %v1811_v23 = vunpack.c.l.b16 %v4121_v21 }
 0x3d3   : > { %v1117_v57 = vmul.f32 %v1114_v6, %v1105_v20 }
 0x3d4   : > { %2611 = vpow2.f32 %v1698_v55  ;;  %v4111_v55 = vld [vmem:[#allocation59_spill] sm:$0xff] }
 0x3d5   : > { %2613 = vpow2.f32 %v1392_v41  ;;  %v1248_v49 = vadd.f32 %v3729_v42, %v1117_v57  ;;  %v4101_v42 = vld [vmem:[#allocation27_spill] sm:$0xff]  ;;  %v1798_v17 = vunpack.c.l.b16 %v4111_v55  ;;  %v1806_v41 = vunpack.c.l.b16 %v4113_v51 }
 0x3d6   : > { %2615 = vpow2.f32 %v1696_v10  ;;  %2084 = vst [vmem:[#allocation1] ss:$4 sm:$0xff] %v4101_v42  ;;  %v1816_v10 = vrot.slane %v1799_v24, 7  ;;  %v1802_v57 = vunpack.c.l.b16 %v4117_v58  ;;  %v3852_v42 = vld.sshfl [vmem:[#allocation1 + $0x20] sm:$0xff pattern:$0x73625140] }
 0x3d7   : > { %1250 = vst.msk [vmem:[#allocation5 + $0x8] sm:$0xff] %vm1033_vm1, %v1248_v49  ;;  %v1810_v49 = vunpack.c.l.b16 %v4118_v56  ;;  %v1826_v24 = vrot.slane %v1804_v60, 2  ;;  %v1830_v55 = vrot.slane %v1807_v28, 7  ;;  %v1834_v51 = vrot.slane %v1809_v43, 5 }
 0x3d8   : > { %2013 = vperm.xlu2 %2595, %v3770_v22   ;;  %2099 = vst [vmem:[#allocation1 + $0x20] ss:$4 sm:$0xff] %v4122_v8  ;;  %v1822_v15 = vrot.slane %v1802_v57, 4  ;;  %v2102_v60 = vunpack.c.l.b16 %v3789_v5  ;;  %v2106_v43 = vunpack.c.l.b16 %v3805_v59  ;;  %v2108_v57 = vunpack.c.l.b16 %v3813_v26  ;;  %v1718_v22 = vld [vmem:[#allocation4 + $0x28] sm:$0xff] }
 0x3d9   : > { %v1828_v47 = vsel %vm998_vm10, %v1827_v7, %v1826_v24  ;;  %v2110_v56 = vunpack.c.l.b16 %v3822_v63  ;;  %v2115_v26 = vunpack.c.l.b16 %v3852_v42 }
 0x3da   : > { %v3783_v19 = vpop.eup %2611  ;;  %v2118_v63 = vrot.slane %v2102_v60, 3 }
 0x3db   : > { %1741 = vperm.xlu1 %2594, %v3783_v19   ;;  %v3801_v61 = vpop.eup %2613  ;;  %v2140_v7 = vrot.slane %v2115_v26, 6 }
 0x3dc   : > { %v3819_v30 = vpop.eup %2615 }
 0x3dd   : > { %v3828_v39 = vld.sshfl [vmem:[#allocation1] sm:$0xff pattern:$0x73625140] }
 0x3de   : > { %2090 = vst [vmem:[#allocation1] ss:$4 sm:$0xff] %v4103_v62  ;;  %v4120_v62 = vld [vmem:[#allocation65_spill] sm:$0xff] }
 0x3df   : > { %v1803_v44 = vunpack.c.l.b16 %v4120_v62  ;;  %v2100_v45 = vld.sshfl [vmem:[#allocation1 + $0x20] sm:$0xff pattern:$0x73625140]  ;;  %v2119_v62 = vrot.slane %v2103_v2, 2 }
 0x3e0   : > { %1430 = vperm.xlu2 %2595, %v2610_v34   ;;  %v1813_v34 = vrot.slane %v1797_v35, 1 }
 0x3e2   : > { %v1814_v20 = vsel %vm998_vm10, %v1813_v34, %v1812_v3  ;;  %v1824_v34 = vrot.slane %v1803_v44, 3 }
 0x3e3   : > { %v1815_v27 = vsel %vm1001_vm11, %v1798_v17, %v1814_v20  ;;  %v1832_v17 = vrot.slane %v1808_v54, 6  ;;  %v1838_v20 = vrot.slane %v1811_v23, 3  ;;  %v2104_v54 = vunpack.c.l.b16 %v3796_v53 }
 0x3e4   : > { %v1817_v33 = vsel %vm1004_vm12, %v1816_v10, %v1815_v27  ;;  %v2105_v10 = vunpack.c.l.b16 %v3798_v0  ;;  %v2109_v27 = vunpack.c.l.b16 %v3815_v46  ;;  %v2111_v53 = vunpack.c.l.b16 %v3824_v48 }
 0x3e5   : > { %v3847_v6 = vld.sshfl [vmem:[#allocation1] sm:$0xff pattern:$0x73625140]  ;;  %v1819_v4 = vsel %vm1007_vm13, %v1818_v11, %v1817_v33  ;;  %v2112_v0 = vunpack.c.l.b16 %v3828_v39  ;;  %v2113_v11 = vunpack.c.l.b16 %v3830_v1  ;;  %v2121_v44 = vrot.slane %v2104_v54, 1 }
 0x3e6   : > { %2096 = vst [vmem:[#allocation1] ss:$4 sm:$0xff] %v4119_v16  ;;  %v2117_v23 = vunpack.c.l.b16 %v2100_v45  ;;  %v2124_v33 = vrot.slane %v2106_v43, 7  ;;  %v2120_v48 = vsel %vm998_vm10, %v2119_v62, %v2118_v63  ;;  %v2132_v39 = vrot.slane %v2110_v56, 3 }
 0x3e7   : > { %v2135_v8 = vrot.slane %v2112_v0, 1  ;;  %v2122_v1 = vsel %vm1001_vm11, %v2121_v44, %v2120_v48  ;;  %v1427_v44 = vld [vmem:[#allocation5 + $0x18] sm:$0xff]  ;;  %v2004_v48 = vmul.f32 1.442695, %v2001_v32  ;;  %v1720_v32 = vmul.f32 %v3783_v19, %v1718_v22 }
 0x3e8   : > { %1435 = vperm.xlu2 %2595, %v3801_v61   ;;  %v2123_v42 = vsel %vm1004_vm12, %v2105_v10, %v2122_v1  ;;  %v1412_v1 = vld [vmem:[#allocation4 + $0x18] sm:$0xff] }
 0x3ea   : > { %1419 = vadd.xlane.f32.xlu0 %v1418_v14  ;;  %v4115_v14 = vld [vmem:[#allocation62_spill] sm:$0xff] }
 0x3eb   : > { %v1801_v50 = vunpack.c.l.b16 %v4115_v14  ;;  %v1829_v14 = vsel %vm1001_vm11, %v1806_v41, %v1828_v47  ;;  %v2107_v41 = vunpack.c.l.b16 %v3807_v9  ;;  %v2114_v9 = vunpack.c.l.b16 %v3847_v6 }
 0x3ec   : > { %v1831_v37 = vsel %vm1004_vm12, %v1830_v55, %v1829_v14  ;;  %v2144_v47 = vrot.slane %v2117_v23, 4 }
 0x3ed   : > { %v1820_v35 = vrot.slane %v1801_v50, 5  ;;  %v1836_v50 = vrot.slane %v1810_v49, 4  ;;  %v1833_v28 = vsel %vm1007_vm13, %v1832_v17, %v1831_v37  ;;  %v2097_v49 = vld.sshfl [vmem:[#allocation1] sm:$0xff pattern:$0x73625140]  ;;  %v2126_v46 = vrot.slane %v2107_v41, 6 }
 0x3ee   : > { %v1835_v58 = vsel %vm1010_vm14, %v1834_v51, %v1833_v28  ;;  %v2116_v21 = vunpack.c.l.b16 %v2097_v49  ;;  %v2138_v6 = vrot.slane %v2114_v9, 7 }
 0x3ef   : > { %v1821_v3 = vsel %vm1010_vm14, %v1820_v35, %v1819_v4  ;;  %v1837_v5 = vsel %vm1013_vm15, %v1836_v50, %v1835_v58  ;;  %v2133_v35 = vrot.slane %v2111_v53, 2  ;;  %v2128_v4 = vrot.slane %v2108_v57, 5 }
 0x3f0   : > { %v1823_v25 = vsel %vm1013_vm15, %v1822_v15, %v1821_v3  ;;  %v1839_v59 = vsel %vm1016_vm0, %v1838_v20, %v1837_v5  ;;  %v2130_v15 = vrot.slane %v2109_v27, 4  ;;  %v2125_v3 = vsel %vm1007_vm13, %v2124_v33, %v2123_v42 }
 0x3f1   : > { %v1825_v12 = vsel %vm1016_vm0, %v1824_v34, %v1823_v25  ;;  %v2134_v24 = vsel %vm998_vm10, %v2133_v35, %v2132_v39  ;;  %v2142_v55 = vrot.slane %v2116_v21, 5  ;;  %v2127_v17 = vsel %vm1010_vm14, %v2126_v46, %v2125_v3 }
 0x3f2   : > { %v1840_v16 = vpack.c.b16 %v1839_v59, %v1825_v12  ;;  %v2136_v34 = vsel %vm1001_vm11, %v2135_v8, %v2134_v24  ;;  %v2129_v51 = vsel %vm1013_vm15, %v2128_v4, %v2127_v17  ;;  %v1426_v59 = vld [vmem:[#allocation5 + $0x10] sm:$0xff]  ;;  %v2002_v8 = vmul.f32 1.442695, %v2000_v36  ;;  %v1717_v17 = vld [vmem:[#allocation4 + $0x20] sm:$0xff] }
 0x3f3   : > { %v2137_v25 = vsel %vm1004_vm12, %v2113_v11, %v2136_v34  ;;  %v2131_v14 = vsel %vm1016_vm0, %v2130_v15, %v2129_v51  ;;  %v1548_v11 = vpop.f32.mrf.mxu3  ;;  %v1414_v4 = vmul.f32 %v3801_v61, %v1412_v1  ;;  %v2023_v24 = vld [vmem:[#allocation4 + $0x30] sm:$0xff]  ;;  %v2024_v61 = vld [vmem:[#allocation4 + $0x38] sm:$0xff]  ;;  %v1719_v51 = vmul.f32 %v3819_v30, %v1717_v17 }
 0x3f4   : > { %1852 = vmatpush.bf16.msrb.mxu3 %v1840_v16  ;;  %v2139_v12 = vsel %vm1007_vm13, %v2138_v6, %v2137_v25 }
 0x3f5   : > { %v2141_v50 = vsel %vm1010_vm14, %v2140_v7, %v2139_v12 }
 0x3f6   : > { %v2143_v20 = vsel %vm1013_vm15, %v2142_v55, %v2141_v50 }
 0x3f7   : > { %v2145_v60 = vsel %vm1016_vm0, %v2144_v47, %v2143_v20 }
 0x3f8   : > { %v2146_v2 = vpack.c.b16 %v2145_v60, %v2131_v14  ;;  %v1732_v14 = vld [vmem:[#allocation5 + $0x20] sm:$0xff]  ;;  %v1733_v60 = vld [vmem:[#allocation5 + $0x28] sm:$0xff] }
 0x3fa   : > { %2158 = vmatpush.bf16.msrb.mxu2 %v2146_v2  ;;  %v2038_v2 = vld [vmem:[#allocation5 + $0x30] sm:$0xff] }
 0x3fb   : > { %v1550_v46 = vpop.f32.mrf.mxu3 }
 0x3fe   : > { %1736 = vperm.xlu0 %2596, %v3819_v30  }
 0x422   : > { %v1703_v37 = vpop.permute.xlu2 %1702 }
 0x423   : > { %v1710_v28 = vsub.f32 %v3741_v38, %v1703_v37 }
 0x425   : > { %v1712_v54 = vmul.f32 1.442695, %v1710_v28 }
 0x427   : > { %2617 = vpow2.f32 %v1712_v54 }
 0x42a   : > { %v1708_v10 = vpop.permute.xlu2 %1707 }
 0x42b   : > { %v1711_v43 = vsub.f32 %v3750_v52, %v1708_v10 }
 0x42d   : > { %v1714_v58 = vmul.f32 1.442695, %v1711_v43  ;;  %v2618_v45 = vpop.eup %2617 }
 0x42e   : > { %v1721_v21 = vsel %vm1058_vm3, %v2618_v45, 0.0 }
 0x42f   : > { %2619 = vpow2.f32 %v1714_v58 }
 0x432   : > { %v2009_v41 = vpop.permute.xlu0 %2008  ;;  %v2014_v5 = vpop.permute.xlu2 %2013 }
 0x433   : > { %v2016_v57 = vsub.f32 %v3723_v31, %v2009_v41  ;;  %v2017_v49 = vsub.f32 %v3734_v29, %v2014_v5 }
 0x435   : > { %v2018_v56 = vmul.f32 1.442695, %v2016_v57  ;;  %v2620_v27 = vpop.eup %2619  ;;  %v2020_v53 = vmul.f32 1.442695, %v2017_v49  ;;  %v2039_v57 = vld [vmem:[#allocation5 + $0x38] sm:$0xff] }
 0x436   : > { %v1724_v38 = vsel %vm1058_vm3, %v2620_v27, 0.0  ;;  %v1746_v0 = vpack.c.bf16 %v2620_v27, %v2618_v45 }
 0x437   : > { %2621 = vpow2.f32 %v2018_v56  ;;  %1725 = vadd.xlane.f32.xlu1 %v1724_v38 }
 0x438   : > { %2623 = vpow2.f32 %v2020_v53  ;;  %2499 = vmatmul.msk.bf16.vlgmr.msrb.gmra.mxu3 %vm1058_vm3, %v1746_v0 }
 0x439   : > { %2625 = vpow2.f32 %v2004_v48 }
 0x43a   : > { %v1431_v9 = vpop.permute.xlu2 %1430  ;;  %2627 = vpow2.f32 %v2002_v8 }
 0x43b   : > { %v1438_v26 = vmul.f32 %v1431_v9, %v1426_v59 }
 0x43d   : > { %v2622_v52 = vpop.eup %2621  ;;  %v1553_v29 = vadd.f32 %v1548_v11, %v1438_v26 }
 0x43e   : > { %v2027_v31 = vsel %vm1058_vm3, %v2622_v52, 0.0  ;;  %v2624_v16 = vpop.eup %2623 }
 0x43f   : > { %2028 = vadd.xlane.f32.xlu2 %v2027_v31  ;;  %v2030_v63 = vsel %vm1058_vm3, %v2624_v16, 0.0  ;;  %v2052_v62 = vpack.c.bf16 %v2624_v16, %v2622_v52  ;;  %1555 = vst.msk [vmem:[#allocation5 + $0x10] sm:$0xff] %vm1033_vm1, %v1553_v29  ;;  %v2626_v35 = vpop.eup %2625 }
 0x440   : > { %2031 = vadd.xlane.f32.xlu0 %v2030_v63  ;;  %v2628_v42 = vpop.eup %2627  ;;  %v2026_v55 = vmul.f32 %v2626_v35, %v2024_v61 }
 0x441   : > { %2505 = vmatmul.msk.bf16.vlgmr.msrb.gmra.mxu2 %vm1058_vm3, %v2052_v62  ;;  %v2025_v40 = vmul.f32 %v2628_v42, %v2023_v24 }
 0x442   : > { %v1436_v23 = vpop.permute.xlu2 %1435 }
 0x443   : > { %v1439_v33 = vmul.f32 %v1436_v23, %v1427_v44 }
 0x445   : > { %v1554_v39 = vadd.f32 %v1550_v46, %v1439_v33 }
 0x447   : > { %1722 = vadd.xlane.f32.xlu2 %v1721_v21  ;;  %1556 = vst.msk [vmem:[#allocation5 + $0x18] sm:$0xff] %vm1033_vm1, %v1554_v39 }
 0x44d   : > { %v1742_v18 = vpop.permute.xlu1 %1741 }
 0x44e   : > { %v1745_v54 = vmul.f32 %v1742_v18, %v1733_v60 }
 0x450   : > { %2047 = vperm.xlu1 %2594, %v2626_v35  }
 0x45d   : > { %v1420_v6 = vpop.xlane.xlu0 %1419 }
 0x45e   : > { %v1422_v15 = vadd.f32 %v1420_v6, %v1414_v4 }
 0x45f   : > { %2042 = vperm.xlu2 %2595, %v2628_v42  }
 0x460   : > { %1424 = vst.msk [vmem:[#allocation4 + $0x18] sm:$0xff] %vm1101_vm5, %v1422_v15 }
 0x470   : > { %v1737_v7 = vpop.permute.xlu0 %1736 }
 0x471   : > { %v1744_v50 = vmul.f32 %v1737_v7, %v1732_v14 }
 0x4aa   : > { %v1726_v3 = vpop.xlane.xlu1 %1725 }
 0x4ab   : > { %v1728_v13 = vadd.f32 %v1726_v3, %v1720_v32 }
 0x4ad   : > { %1730 = vst.msk [vmem:[#allocation4 + $0x28] sm:$0xff] %vm1101_vm5, %v1728_v13 }
 0x4b2   : > { %v2029_v36 = vpop.xlane.xlu2 %2028 }
 0x4b3   : > { %v2033_v34 = vadd.f32 %v2029_v36, %v2025_v40  ;;  %v2032_v25 = vpop.xlane.xlu0 %2031 }
 0x4b4   : > { %v2034_v47 = vadd.f32 %v2032_v25, %v2026_v55 }
 0x4b5   : > { %2035 = vst.msk [vmem:[#allocation4 + $0x30] sm:$0xff] %vm1101_vm5, %v2033_v34 }
 0x4b6   : > { %2036 = vst.msk [vmem:[#allocation4 + $0x38] sm:$0xff] %vm1101_vm5, %v2034_v47 }
 0x4ba   : > { %v1723_v19 = vpop.xlane.xlu2 %1722 }
 0x4bb   : > { %v1727_v12 = vadd.f32 %v1723_v19, %v1719_v51  ;;  %v1854_v37 = vpop.f32.mrf.mxu3 }
 0x4bc   : > { %v1859_v20 = vadd.f32 %v1854_v37, %v1744_v50 }
 0x4bd   : > { %1729 = vst.msk [vmem:[#allocation4 + $0x20] sm:$0xff] %vm1101_vm5, %v1727_v12 }
 0x4be   : > { %1861 = vst.msk [vmem:[#allocation5 + $0x20] sm:$0xff] %vm1033_vm1, %v1859_v20 }
 0x4c2   : > { %v2043_v28 = vpop.permute.xlu2 %2042  ;;  %v2048_v56 = vpop.permute.xlu1 %2047 }
 0x4c3   : > { %v2050_v10 = vmul.f32 %v2043_v28, %v2038_v2  ;;  %v1856_v43 = vpop.f32.mrf.mxu3  ;;  %v2051_v5 = vmul.f32 %v2048_v56, %v2039_v57 }
 0x4c4   : > { %v2160_v58 = vpop.f32.mrf.mxu2  ;;  %v1860_v30 = vadd.f32 %v1856_v43, %v1745_v54 }
 0x4c5   : > { %v2165_v41 = vadd.f32 %v2160_v58, %v2050_v10 }
 0x4c6   : > { %1862 = vst.msk [vmem:[#allocation5 + $0x28] sm:$0xff] %vm1033_vm1, %v1860_v30 }
 0x4c7   : > { %2167 = vst.msk [vmem:[#allocation5 + $0x30] sm:$0xff] %vm1033_vm1, %v2165_v41 }
 0x4cb   : > { %2174 = sbr.rel (%p2506_p2) target bundleno = 1492 (0x5d4), region = 163 }
 0x4cc   : > { %v2162_v49 = vpop.f32.mrf.mxu2 }
 0x4cd   : > { %v2166_v45 = vadd.f32 %v2162_v49, %v2051_v5 }
 0x4cf   : > { %2168 = vst.msk [vmem:[#allocation5 + $0x38] sm:$0xff] %vm1033_vm1, %v2166_v45 }
 0x4d0   : > { %v2229_v27 = vld [vmem:[#allocation4 + $0x20] sm:$0xff]  ;;  %v2198_v53 = vld [vmem:[#allocation4 + $0x10] sm:$0xff]  ;;  %v2723_v38 = vmov 0   ;;  %v2230_v0 = vld [vmem:[#allocation4 + $0x28] sm:$0xff]  ;;  %vm2195_vm6 = vcmask 257024   ;;  %vm2226_vm7 = vcmask 519424  }
 0x4d1   : > { %2630 = vset.pattern.permute.xlu1 %v2723_v38  ;;  %2629 = vset.pattern.permute.xlu0 %v2723_v38  ;;  %2632 = vrcp.f32 %v2229_v27  ;;  %v2260_v52 = vld [vmem:[#allocation4 + $0x30] sm:$0xff]  ;;  %v2199_v59 = vld [vmem:[#allocation4 + $0x18] sm:$0xff]  ;;  %v2176_v16 = vld [vmem:[#allocation4 + $0x8] sm:$0xff]  ;;  %vm2257_vm8 = vcmask 781824   ;;  %vm2288_vm9 = vcmask 1044224  }
 0x4d2   : > { %2634 = vrcp.f32 %v2198_v53  ;;  %2631 = vset.pattern.permute.xlu2 %v2723_v38  ;;  %v2261_v9 = vld [vmem:[#allocation4 + $0x38] sm:$0xff]  ;;  %v2175_v63 = vld [vmem:[#allocation4] sm:$0xff]  ;;  %v2202_v48 = vld [vmem:[#allocation5 + $0x10] sm:$0xff] }
 0x4d3   : > { %2636 = vrcp.f32 %v2230_v0  ;;  %v2233_v46 = vld [vmem:[#allocation5 + $0x20] sm:$0xff]  ;;  %v2234_v22 = vld [vmem:[#allocation5 + $0x28] sm:$0xff]  ;;  %v2203_v32 = vld [vmem:[#allocation5 + $0x18] sm:$0xff] }
 0x4d4   : > { %2638 = vrcp.f32 %v2260_v52  ;;  %v2264_v61 = vld [vmem:[#allocation5 + $0x30] sm:$0xff]  ;;  %v2180_v55 = vld [vmem:[#allocation5 + $0x8] sm:$0xff]  ;;  %v2179_v17 = vld [vmem:[#allocation5] sm:$0xff] }
 0x4d5   : > { %2640 = vrcp.f32 %v2199_v59 }
 0x4d6   : > { %2642 = vrcp.f32 %v2261_v9  ;;  %v2265_v4 = vld [vmem:[#allocation5 + $0x38] sm:$0xff] }
 0x4d7   : > { %v2633_v31 = vpop.eup %2632  ;;  %2644 = vrcp.f32 %v2176_v16 }
 0x4d8   : > { %v2635_v11 = vpop.eup %2634  ;;  %2237 = vperm.xlu1 %2630, %v2633_v31   ;;  %2646 = vrcp.f32 %v2175_v63 }
 0x4d9   : > { %2206 = vperm.xlu0 %2629, %v2635_v11   ;;  %v2637_v26 = vpop.eup %2636 }
 0x4da   : > { %v2639_v29 = vpop.eup %2638 }
 0x4db   : > { %v2641_v62 = vpop.eup %2640  ;;  %2268 = vperm.xlu2 %2631, %v2639_v29  }
 0x4dc   : > { %v2643_v44 = vpop.eup %2642 }
 0x4dd   : > { %v2645_v21 = vpop.eup %2644 }
 0x4de   : > { %v2647_v23 = vpop.eup %2646 }
 0x4e0   : > { %2242 = vperm.xlu1 %2630, %v2637_v26  }
 0x4e1   : > { %2211 = vperm.xlu0 %2629, %v2641_v62  }
 0x4e3   : > { %2273 = vperm.xlu2 %2631, %v2643_v44  }
 0x4e8   : > { %2188 = vperm.xlu1 %2630, %v2645_v21  }
 0x4e9   : > { %2183 = vperm.xlu0 %2629, %v2647_v23  }
 0x535   : > { %v2269_v33 = vpop.permute.xlu2 %2268 }
 0x536   : > { %v2276_v25 = vmul.f32 %v2269_v33, %v2264_v61 }
 0x538   : > { %v2278_v50 = vpack.c.bf16 %v2276_v25, %v2276_v25 }
 0x53d   : > { %v2274_v6 = vpop.permute.xlu2 %2273 }
 0x53e   : > { %v2277_v18 = vmul.f32 %v2274_v6, %v2265_v4 }
 0x540   : > { %v2279_v7 = vpack.c.bf16 %v2277_v18, %v2277_v18 }
 0x54a   : > { %v2238_v39 = vpop.permute.xlu1 %2237 }
 0x54b   : > { %v2245_v35 = vmul.f32 %v2238_v39, %v2233_v46  ;;  %v2207_v8 = vpop.permute.xlu0 %2206 }
 0x54c   : > { %v2214_v1 = vmul.f32 %v2207_v8, %v2202_v48 }
 0x54d   : > { %v2247_v42 = vpack.c.bf16 %v2245_v35, %v2245_v35 }
 0x54e   : > { %v2216_v15 = vpack.c.bf16 %v2214_v1, %v2214_v1 }
 0x54f   : > { %2251 = vrot.lane.b32.xlu1 %v2247_v42, %s2724_s8 }
 0x550   : > { %2220 = vrot.lane.b32.xlu2 %v2216_v15, %s2725_s11 }
 0x552   : > { %v2243_v24 = vpop.permute.xlu1 %2242 }
 0x553   : > { %v2246_v3 = vmul.f32 %v2243_v24, %v2234_v22  ;;  %v2212_v13 = vpop.permute.xlu0 %2211 }
 0x554   : > { %v2215_v40 = vmul.f32 %v2212_v13, %v2203_v32 }
 0x555   : > { %v2248_v36 = vpack.c.bf16 %v2246_v3, %v2246_v3 }
 0x556   : > { %v2217_v34 = vpack.c.bf16 %v2215_v40, %v2215_v40 }
 0x557   : > { %2284 = vrot.lane.b32.xlu1 %v2279_v7, %s2726_s30 }
 0x558   : > { %2253 = vrot.lane.b32.xlu2 %v2248_v36, %s2724_s8  ;;  %2222 = vrot.lane.b32.xlu0 %v2217_v34, %s2725_s11 }
 0x55a   : > { %v2189_v47 = vpop.permute.xlu1 %2188 }
 0x55b   : > { %v2192_v51 = vmul.f32 %v2189_v47, %v2180_v55  ;;  %v2184_v19 = vpop.permute.xlu0 %2183 }
 0x55c   : > { %v2191_v12 = vmul.f32 %v2184_v19, %v2179_v17 }
 0x55d   : > { %v2194_v14 = vpack.c.bf16 %v2192_v51, %v2192_v51 }
 0x55e   : > { %v2193_v37 = vpack.c.bf16 %v2191_v12, %v2191_v12 }
 0x55f   : > { %2197 = vst.msk [vmem:[%s2935_s24 + $0x4] sm:$0xf] %vm2195_vm6, %v2194_v14 }
 0x560   : > { %2196 = vst.msk [vmem:[%s2935_s24] sm:$0xf] %vm2195_vm6, %v2193_v37  ;;  %2282 = vrot.lane.b32.xlu0 %v2278_v50, %s2726_s30 }
 0x5aa   : > { %v2221_v20 = vpop.permute.xlu2 %2220 }
 0x5ab   : > { %2227 = vst.msk [vmem:[%s2935_s24] sm:$0xf] %vm2226_vm7, %v2221_v20 }
 0x5b2   : > { %v2254_v28 = vpop.permute.xlu2 %2253 }
 0x5c1   : > { %v2252_v60 = vpop.permute.xlu1 %2251 }
 0x5c2   : > { %2258 = vst.msk [vmem:[%s2935_s24] sm:$0xf] %vm2257_vm8, %v2252_v60 }
 0x5c9   : > { %v2285_v54 = vpop.permute.xlu1 %2284 }
 0x5ca   : > { %v2223_v2 = vpop.permute.xlu0 %2222 }
 0x5cb   : > { %2228 = vst.msk [vmem:[%s2935_s24 + $0x4] sm:$0xf] %vm2226_vm7, %v2223_v2 }
 0x5cc   : > { %2259 = vst.msk [vmem:[%s2935_s24 + $0x4] sm:$0xf] %vm2257_vm8, %v2254_v28 }
 0x5cd   : > { %2290 = vst.msk [vmem:[%s2935_s24 + $0x4] sm:$0xf] %vm2288_vm9, %v2285_v54 }
 0x5d2   : > { %v2283_v10 = vpop.permute.xlu0 %2282 }
 0x5d3   : > { %2289 = vst.msk [vmem:[%s2935_s24] sm:$0xf] %vm2288_vm9, %v2283_v10 }
 0x5d4 PF: > { %s17_s0 = sadd.s32 1, %s2718_s0   ;;  %s4123_s22 = smov %s2690_s23 }
 0x5d5   : > { %p14_p3 = scmp.ge.s32.totalorder %s17_s0, 4   ;;  %s4124_s23 = smov %s2842_s14 }
 0x5d6   : > { %s4125_s24 = smov %s2698_s25  ;;  %s4126_s25 = smov %s2839_s13 }
 0x5d7   : > { %s4127_s26 = smov %s2706_s27  ;;  %s4128_s27 = smov %s2830_s9 }
 0x5d8   : > { %s4129_s28 = smov %s2714_s29  ;;  %s4130_s29 = smov %s4132_s1 }
 0x5d9   :  { %16 = sbr.rel (!%p14_p3) target bundleno = 8 (0x8), region = 237 }

</bundles_post_ra>
